<compile_context>
chip_gen: v6e
topology: v6e:2x2x1
jax: 0.10.0
libtpu: 0.0.40
codegen_flags: <defaults>
</compile_context>

<pallas_src>
import jax
import jax.numpy as jnp
from jax.experimental import pallas as pl
from jax.experimental.pallas import tpu as pltpu


def _round_up(v, m):
    return (v + m - 1) // m * m


def _pick_tile(m, pref, align=16, min_tile=16):
    """Tile size for an M-tiled grid: big tiles, but >=2 grid steps when
    possible so both v7x TensorCores get work under 'parallel' semantics."""
    m_al = _round_up(m, align)
    num = max(1, -(-m_al // pref))
    if num == 1 and m_al >= 2 * min_tile:
        num = 2
    return max(min_tile, _round_up(-(-m_al // num), align))


# ----------------------------------------------------------------------------
# Kernel 1: fused (M,K)@(K,N) + bias + PReLU  (bf16 MXU, f32 epilogue).
# Used M-tiled for conv1/conv2/conv3 on folded (lane-dense) im2col patches.
# ----------------------------------------------------------------------------
def _mm_bias_prelu_kernel(a_ref, w_ref, ba_ref, o_ref):
    acc = jnp.dot(a_ref[...], w_ref[...], preferred_element_type=jnp.float32)
    ba = ba_ref[...]                                   # (2, N) f32: bias/alpha
    acc = acc + ba[0:1]
    acc = jnp.where(acc > 0, acc, acc * ba[1:2])       # per-channel PReLU
    o_ref[...] = acc.astype(o_ref.dtype)


def matmul_bias_prelu(a, w, ba, *, tile_m=2048, out_dtype=jnp.bfloat16):
    """a:(M,K) bf16, w:(K,N) bf16, ba:(2,N) f32 -> (M,N) out_dtype."""
    m, k = a.shape
    n = w.shape[1]
    tm = _pick_tile(m, tile_m)
    mp = _round_up(m, tm)
    if mp != m:
        a = jnp.pad(a, ((0, mp - m), (0, 0)))
    out = pl.pallas_call(
        _mm_bias_prelu_kernel,
        out_shape=jax.ShapeDtypeStruct((mp, n), out_dtype),
        grid=(mp // tm,),
        in_specs=[
            pl.BlockSpec((tm, k), lambda i: (i, 0)),
            pl.BlockSpec((k, n), lambda i: (0, 0)),
            pl.BlockSpec((2, n), lambda i: (0, 0)),
        ],
        out_specs=pl.BlockSpec((tm, n), lambda i: (i, 0)),
        compiler_params=pltpu.CompilerParams(
            dimension_semantics=("parallel",)),
    )(a, w, ba)
    return out[:m] if mp != m else out


def conv2d_prelu(x, w_bd, ba, k, cout, *, tile_m=2048):
    """Valid conv (stride 1) + bias + PReLU via block-diagonal matmul.

    x:(N,H,W,Cin) bf16 NHWC.  w_bd:(fold*Kpad, fold*cout) block-diagonal bf16,
    ba:(2, fold*cout) f32 (bias / PReLU alpha tiled fold times).  `fold`
    consecutive im2col rows are packed into one 128-lane-dense output row;
    the fold/unfold reshapes are free row-major views done on the XLA side.
    """
    n, h, w, cin = x.shape
    ho, wo = h - k + 1, w - k + 1
    kdim = k * k * cin
    fold = w_bd.shape[1] // cout
    kpad = w_bd.shape[0] // fold
    m = n * ho * wo
    # im2col (XLA glue).
    # TODO(synk): fuse the patch extraction into the kernel (shifted-window
    # BlockSpec / manual DMA) to kill the k*k HBM patch blow-up.
    cols = [x[:, i:i + ho, j:j + wo, :] for i in range(k) for j in range(k)]
    patches = jnp.stack(cols, axis=3).reshape(m, kdim)
    mf = _round_up(m, fold)
    patches = jnp.pad(patches, ((0, mf - m), (0, kpad - kdim)))
    a_f = patches.reshape(mf // fold, fold * kpad)
    y = matmul_bias_prelu(a_f, w_bd, ba, tile_m=tile_m)   # (mf//fold, fold*cout)
    return y.reshape(mf, cout)[:m].reshape(n, ho, wo, cout)


# ----------------------------------------------------------------------------
# Kernel 2: fused tail = conv4(2x2) + PReLU4 + fc5 + PReLU5 + merged fc6 heads
# ([det(1) | box(4) | landmark(12) | zero pad] = 128 lanes).  Batch-tiled grid.
# ----------------------------------------------------------------------------
def _tail_kernel(p4_ref, w4_ref, ba4_ref, w5_ref, ba5_ref, w6_ref, b6_ref,
                 o_ref, c4_sc, h5_sc):
    tb = o_ref.shape[0]
    kk = p4_ref.shape[-1]                              # 256 = 2*2*64
    # conv4: all 9 output positions in ONE MXU call (leading-dim merge).
    a = p4_ref[...].reshape(9 * tb, kk)
    ba4 = ba4_ref[...]
    c4 = jnp.dot(a, w4_ref[...], preferred_element_type=jnp.float32)
    c4 = c4 + ba4[0:1]
    c4 = jnp.where(c4 > 0, c4, c4 * ba4[1:2])          # PReLU(128)
    c4_sc[...] = c4.astype(jnp.bfloat16)               # bound live ranges
    # fc5: accumulate the 9 position slabs into a VMEM scratch accumulator.
    h5_sc[...] = jnp.zeros_like(h5_sc)
    for p in range(9):
        h5_sc[...] += jnp.dot(c4_sc[pl.ds(p * tb, tb), :], w5_ref[p],
                              preferred_element_type=jnp.float32)
    ba5 = ba5_ref[...]
    h5 = h5_sc[...] + ba5[0:1]
    h5 = jnp.where(h5 > 0, h5, h5 * ba5[1:2])          # PReLU(256)
    # merged fc6 heads, lane-dense 128-wide output (sigmoid applied outside).
    o_ref[...] = jnp.dot(h5.astype(jnp.bfloat16), w6_ref[...],
                         preferred_element_type=jnp.float32) + b6_ref[...]


def onet_tail(x4, params, *, tile_b=64):
    """x4:(N,4,4,64) bf16 (post pool3) -> (N,128) f32 head logits."""
    n, c = x4.shape[0], x4.shape[-1]
    # conv4 2x2 windows grouped by output position; tiny (9,N,256) tensor.
    # TODO(synk): could be built in-kernel from x4, but the lane-dim concat
    # needs a Mosaic relayout; kept as XLA glue (low traffic, low priority).
    pos = []
    for h in range(3):
        for w in range(3):
            taps = [x4[:, h + dh, w + dw, :] for dh in range(2) for dw in range(2)]
            pos.append(jnp.concatenate(taps, axis=-1))
    p4 = jnp.stack(pos, axis=0)                        # (9, N, 256) bf16
    kk = 4 * c

    tb = _pick_tile(n, tile_b)
    npad = _round_up(n, tb)
    if npad != n:
        p4 = jnp.pad(p4, ((0, 0), (0, npad - n), (0, 0)))

    out = pl.pallas_call(
        _tail_kernel,
        out_shape=jax.ShapeDtypeStruct((npad, 128), jnp.float32),
        grid=(npad // tb,),
        in_specs=[
            pl.BlockSpec((9, tb, kk), lambda i: (0, i, 0)),
            pl.BlockSpec((kk, 128), lambda i: (0, 0)),
            pl.BlockSpec((2, 128), lambda i: (0, 0)),
            pl.BlockSpec((9, 128, 256), lambda i: (0, 0, 0)),
            pl.BlockSpec((2, 256), lambda i: (0, 0)),
            pl.BlockSpec((256, 128), lambda i: (0, 0)),
            pl.BlockSpec((1, 128), lambda i: (0, 0)),
        ],
        out_specs=pl.BlockSpec((tb, 128), lambda i: (i, 0)),
        scratch_shapes=[pltpu.VMEM((9 * tb, 128), jnp.bfloat16),
                        pltpu.VMEM((tb, 256), jnp.float32)],
        compiler_params=pltpu.CompilerParams(
            dimension_semantics=("parallel",)),
    )(p4, params["conv4_w"], params["conv4_ba"], params["fc5_w"],
      params["fc5_ba"], params["fc6_w"], params["fc6_b"])
    return out[:n]


# ----------------------------------------------------------------------------
# XLA-side glue (intentionally not Pallas, per review): ceil-mode max pooling
# as a pairwise jnp.maximum tree.
# ----------------------------------------------------------------------------
def maxpool2d_ceil(x, k, s):
    n, h, w, c = x.shape
    ho = -((h - k) // -s) + 1
    wo = -((w - k) // -s) + 1
    hp = (ho - 1) * s + k
    wp = (wo - 1) * s + k
    if hp > h or wp > w:
        x = jnp.pad(x, ((0, 0), (0, hp - h), (0, wp - w), (0, 0)),
                    constant_values=-jnp.inf)
    out = None
    for i in range(k):
        for j in range(k):
            win = x[:, i:i + (ho - 1) * s + 1:s, j:j + (wo - 1) * s + 1:s, :]
            out = win if out is None else jnp.maximum(out, win)
    return out


# ----------------------------------------------------------------------------
# Parameter init (xavier_uniform weights, bias=0.1, PReLU slope=0.25) + the
# layout packing the kernels expect (block-diagonal convs, merged heads).
# ----------------------------------------------------------------------------
def _xavier_uniform(key, shape, fan_in, fan_out):
    bound = (6.0 / (fan_in + fan_out)) ** 0.5
    return jax.random.uniform(key, shape, jnp.float32, -bound, bound)


def init_onet_weights(key):
    """Raw f32 weights in a torch-like (transposed) layout."""
    ks = jax.random.split(key, 8)

    def conv_w(k_, cin, cout, ksz):
        # Rows ordered (kh, kw, cin).  Port from torch:
        #   W(cout,cin,kh,kw).permute(2,3,1,0).reshape(ksz*ksz*cin, cout)
        return _xavier_uniform(k_, (ksz * ksz * cin, cout),
                               cin * ksz * ksz, cout * ksz * ksz)

    def fc_w(k_, din, dout):                           # torch weight.T
        return _xavier_uniform(k_, (din, dout), din, dout)

    return {
        "conv1_w": conv_w(ks[0], 3, 32, 3),
        "conv1_b": jnp.full((32,), 0.1, jnp.float32),
        "prelu1": jnp.full((32,), 0.25, jnp.float32),
        "conv2_w": conv_w(ks[1], 32, 64, 3),
        "conv2_b": jnp.full((64,), 0.1, jnp.float32),
        "prelu2": jnp.full((64,), 0.25, jnp.float32),
        "conv3_w": conv_w(ks[2], 64, 64, 3),
        "conv3_b": jnp.full((64,), 0.1, jnp.float32),
        "prelu3": jnp.full((64,), 0.25, jnp.float32),
        "conv4_w": conv_w(ks[3], 64, 128, 2),
        "conv4_b": jnp.full((128,), 0.1, jnp.float32),
        "prelu4": jnp.full((128,), 0.25, jnp.float32),
        # fc5 rows follow the torch NCHW flatten order c*9 + h*3 + w.
        "fc5_w": fc_w(ks[4], 128 * 9, 256),
        "fc5_b": jnp.full((256,), 0.1, jnp.float32),
        "prelu5": jnp.full((256,), 0.25, jnp.float32),
        "fc61_w": fc_w(ks[5], 256, 1),
        "fc61_b": jnp.full((1,), 0.1, jnp.float32),
        "fc62_w": fc_w(ks[6], 256, 4),
        "fc62_b": jnp.full((4,), 0.1, jnp.float32),
        "fc63_w": fc_w(ks[7], 256, 12),
        "fc63_b": jnp.full((12,), 0.1, jnp.float32),
    }


def _block_diag_weight(w, fold, kpad):
    """(Kdim, cout) -> (fold*kpad, fold*cout) block-diagonal bf16."""
    kdim, cout = w.shape
    wp = jnp.pad(w, ((0, kpad - kdim), (0, 0)))
    eye = jnp.eye(fold, dtype=w.dtype)
    return jnp.einsum("pq,kc->pkqc", eye, wp).reshape(
        fold * kpad, fold * cout).astype(jnp.bfloat16)


def pack_onet_params(raw):
    """Pre-arrange raw weights into the layouts the Pallas kernels expect."""
    p = {}
    # conv1-3: block-diagonal weights -> 128-lane-dense conv outputs.
    for i in (1, 2, 3):
        w = raw[f"conv{i}_w"]
        kdim, cout = w.shape
        fold = max(1, 128 // cout)
        kpad = _round_up(kdim, 16)                     # conv1: K 27 -> 32
        p[f"conv{i}_w"] = _block_diag_weight(w, fold, kpad)
        p[f"conv{i}_ba"] = jnp.stack(
            [jnp.tile(raw[f"conv{i}_b"], fold),
             jnp.tile(raw[f"prelu{i}"], fold)]).astype(jnp.float32)
    # tail: conv4 + per-position fc5 slabs + merged fc6 heads (pad to 128).
    p["conv4_w"] = raw["conv4_w"].astype(jnp.bfloat16)                 # (256,128)
    p["conv4_ba"] = jnp.stack([raw["conv4_b"], raw["prelu4"]]).astype(jnp.float32)
    p["fc5_w"] = jnp.transpose(raw["fc5_w"].reshape(128, 9, 256),
                               (1, 0, 2)).astype(jnp.bfloat16)         # (9,128,256)
    p["fc5_ba"] = jnp.stack([raw["fc5_b"], raw["prelu5"]]).astype(jnp.float32)
    w6 = jnp.concatenate([raw["fc61_w"], raw["fc62_w"], raw["fc63_w"]], axis=1)
    b6 = jnp.concatenate([raw["fc61_b"], raw["fc62_b"], raw["fc63_b"]])
    p["fc6_w"] = jnp.pad(w6, ((0, 0), (0, 128 - w6.shape[1]))).astype(jnp.bfloat16)
    p["fc6_b"] = jnp.pad(b6, (0, 128 - b6.shape[0])).reshape(1, 128).astype(jnp.float32)
    return p


# ----------------------------------------------------------------------------
# Forward pass (equivalent to ONet.forward on NCHW input, fixed 48x48).
# ----------------------------------------------------------------------------
def onet_forward(params, x_nchw):
    x = jnp.transpose(x_nchw, (0, 2, 3, 1)).astype(jnp.bfloat16)       # NCHW->NHWC
    x = conv2d_prelu(x, params["conv1_w"], params["conv1_ba"], 3, 32)  # 46x46x32
    x = maxpool2d_ceil(x, 3, 2)                                        # 23x23x32
    x = conv2d_prelu(x, params["conv2_w"], params["conv2_ba"], 3, 64)  # 21x21x64
    x = maxpool2d_ceil(x, 3, 2)                                        # 10x10x64
    x = conv2d_prelu(x, params["conv3_w"], params["conv3_ba"], 3, 64)  # 8x8x64
    x = maxpool2d_ceil(x, 2, 2)                                        # 4x4x64
    heads = onet_tail(x, params)                       # (N,128) f32 logits
    det = jax.nn.sigmoid(heads[:, 0:1])                # sigmoid on det only
    box = heads[:, 1:5]
    landmark = heads[:, 5:17]
    return det, box, landmark


def onet_reference(raw, x_nchw):
    """Pure f32 XLA reference mirroring the PyTorch module (for validation)."""
    x = jnp.transpose(x_nchw, (0, 2, 3, 1)).astype(jnp.float32)

    def conv_prelu(x, w, b, a, k):
        n, h, w_, cin = x.shape
        ho, wo = h - k + 1, w_ - k + 1
        cols = [x[:, i:i + ho, j:j + wo, :] for i in range(k) for j in range(k)]
        y = jnp.stack(cols, axis=3).reshape(n * ho * wo, k * k * cin) @ w + b
        y = jnp.where(y > 0, y, y * a)
        return y.reshape(n, ho, wo, -1)

    x = conv_prelu(x, raw["conv1_w"], raw["conv1_b"], raw["prelu1"], 3)
    x = maxpool2d_ceil(x, 3, 2)
    x = conv_prelu(x, raw["conv2_w"], raw["conv2_b"], raw["prelu2"], 3)
    x = maxpool2d_ceil(x, 3, 2)
    x = conv_prelu(x, raw["conv3_w"], raw["conv3_b"], raw["prelu3"], 3)
    x = maxpool2d_ceil(x, 2, 2)
    x = conv_prelu(x, raw["conv4_w"], raw["conv4_b"], raw["prelu4"], 2)  # (N,3,3,128)
    flat = jnp.transpose(x, (0, 3, 1, 2)).reshape(x.shape[0], -1)        # NCHW flatten
    h5 = flat @ raw["fc5_w"] + raw["fc5_b"]
    h5 = jnp.where(h5 > 0, h5, h5 * raw["prelu5"])
    det = jax.nn.sigmoid(h5 @ raw["fc61_w"] + raw["fc61_b"])
    box = h5 @ raw["fc62_w"] + raw["fc62_b"]
    landmark = h5 @ raw["fc63_w"] + raw["fc63_b"]
    return det, box, landmark


if __name__ == "__main__":
    key = jax.random.PRNGKey(0)
    pkey, xkey = jax.random.split(key)
    raw = init_onet_weights(pkey)
    params = pack_onet_params(raw)
    # ONet's fc5 (128*3*3) fixes the input spatial size to 48x48; batch=2.
    x = jax.random.normal(xkey, (2, 3, 48, 48), jnp.float32)

    det, box, landmark = jax.jit(onet_forward)(params, x)
    jax.block_until_ready((det, box, landmark))

    assert det.shape == (2, 1) and box.shape == (2, 4) and landmark.shape == (2, 12)
    assert bool(jnp.all((det >= 0.0) & (det <= 1.0)))

    # Loose-tolerance check vs an f32 XLA reference (kernel path is bf16 MXU).
    rdet, rbox, rlmk = jax.jit(onet_reference)(raw, x)
    assert float(jnp.max(jnp.abs(det - rdet))) < 6e-2
    assert float(jnp.max(jnp.abs(box - rbox))) < 2.5e-1
    assert float(jnp.max(jnp.abs(landmark - rlmk))) < 2.5e-1
    print("KERNEL_OK")
</pallas_src>

<mosaic_0001>
module attributes {stable_mosaic.version = 11 : i64} {
  func.func @_mm_bias_prelu_kernel(%arg0: i32, %arg1: memref<544x128xbf16, #tpu.memory_space<vmem>>, %arg2: memref<128x128xbf16, #tpu.memory_space<vmem>>, %arg3: memref<2x128xf32, #tpu.memory_space<vmem>>, %arg4: memref<544x128xbf16, #tpu.memory_space<vmem>>) attributes {dimension_semantics = [#tpu.dimension_semantics<parallel>], iteration_bounds = array<i64: 2>, scalar_prefetch = 0 : i64, scratch_operands = 0 : i64, tpu.core_type = #tpu.core_type<tc>, window_params = [{transform_indices = @transform_0, window_bounds = array<i64: 544, 128>}, {pipeline_mode = #tpu.pipeline_mode<synchronous>, transform_indices = @transform_1, window_bounds = array<i64: 128, 128>}, {pipeline_mode = #tpu.pipeline_mode<synchronous>, transform_indices = @transform_2, window_bounds = array<i64: 2, 128>}, {transform_indices = @transform_3, window_bounds = array<i64: 544, 128>}]} {
    %c0 = arith.constant 0 : index
    %c0_0 = arith.constant 0 : index
    %0 = vector.load %arg1[%c0, %c0_0] : memref<544x128xbf16, #tpu.memory_space<vmem>>, vector<544x128xbf16>
    %c0_1 = arith.constant 0 : index
    %c0_2 = arith.constant 0 : index
    %1 = vector.load %arg2[%c0_1, %c0_2] : memref<128x128xbf16, #tpu.memory_space<vmem>>, vector<128x128xbf16>
    %cst = arith.constant dense<0.000000e+00> : vector<544x128xf32>
    %2 = tpu.matmul %0, %1, %cst {dimension_numbers = #tpu.dot_dimension_numbers<[1], [0], [0], [1], [0, 0, 1, 1], [], []>} : vector<544x128xbf16>, vector<128x128xbf16>, vector<544x128xf32> -> vector<544x128xf32>
    %c0_3 = arith.constant 0 : index
    %c0_4 = arith.constant 0 : index
    %3 = vector.load %arg3[%c0_3, %c0_4] : memref<2x128xf32, #tpu.memory_space<vmem>>, vector<2x128xf32>
    %4 = vector.extract_strided_slice %3 {offsets = [0, 0], sizes = [1, 128], strides = [1, 1]} : vector<2x128xf32> to vector<1x128xf32>
    %5 = vector.broadcast %4 : vector<1x128xf32> to vector<544x128xf32>
    %6 = arith.addf %2, %5 : vector<544x128xf32>
    %cst_5 = arith.constant 0.000000e+00 : f32
    %7 = vector.broadcast %cst_5 : f32 to vector<544x128xf32>
    %8 = arith.cmpf ogt, %6, %7 : vector<544x128xf32>
    %9 = vector.extract_strided_slice %3 {offsets = [1, 0], sizes = [1, 128], strides = [1, 1]} : vector<2x128xf32> to vector<1x128xf32>
    %10 = vector.broadcast %9 : vector<1x128xf32> to vector<544x128xf32>
    %11 = arith.mulf %6, %10 : vector<544x128xf32>
    %12 = arith.select %8, %6, %11 : vector<544x128xi1>, vector<544x128xf32>
    %13 = arith.truncf %12 : vector<544x128xf32> to vector<544x128xbf16>
    %c0_6 = arith.constant 0 : index
    %c0_7 = arith.constant 0 : index
    %14 = vector.load %arg4[%c0_6, %c0_7] : memref<544x128xbf16, #tpu.memory_space<vmem>>, vector<544x128xbf16>
    tpu.vector_store %arg4[%c0_6, %c0_7], %13 {strides = array<i32>} : memref<544x128xbf16, #tpu.memory_space<vmem>>, vector<544x128xbf16>,
    return
  }
  func.func @transform_0(%arg0: i32) -> (i32, i32) {
    %c0_i32 = arith.constant 0 : i32
    %c0_i32_0 = arith.constant 0 : i32
    return %arg0, %c0_i32 : i32, i32
  }
  func.func @transform_1(%arg0: i32) -> (i32, i32) {
    %c0_i32 = arith.constant 0 : i32
    %c0_i32_0 = arith.constant 0 : i32
    %c0_i32_1 = arith.constant 0 : i32
    return %c0_i32, %c0_i32_0 : i32, i32
  }
  func.func @transform_2(%arg0: i32) -> (i32, i32) {
    %c0_i32 = arith.constant 0 : i32
    %c0_i32_0 = arith.constant 0 : i32
    %c0_i32_1 = arith.constant 0 : i32
    return %c0_i32, %c0_i32_0 : i32, i32
  }
  func.func @transform_3(%arg0: i32) -> (i32, i32) {
    %c0_i32 = arith.constant 0 : i32
    %c0_i32_0 = arith.constant 0 : i32
    return %arg0, %c0_i32 : i32, i32
  }
}

module attributes {stable_mosaic.version = 11 : i64} {
  func.func @_mm_bias_prelu_kernel(%arg0: i32, %arg1: memref<224x576xbf16, #tpu.memory_space<vmem>>, %arg2: memref<576x128xbf16, #tpu.memory_space<vmem>>, %arg3: memref<2x128xf32, #tpu.memory_space<vmem>>, %arg4: memref<224x128xbf16, #tpu.memory_space<vmem>>) attributes {dimension_semantics = [#tpu.dimension_semantics<parallel>], iteration_bounds = array<i64: 2>, scalar_prefetch = 0 : i64, scratch_operands = 0 : i64, tpu.core_type = #tpu.core_type<tc>, window_params = [{transform_indices = @transform_0, window_bounds = array<i64: 224, 576>}, {pipeline_mode = #tpu.pipeline_mode<synchronous>, transform_indices = @transform_1, window_bounds = array<i64: 576, 128>}, {pipeline_mode = #tpu.pipeline_mode<synchronous>, transform_indices = @transform_2, window_bounds = array<i64: 2, 128>}, {transform_indices = @transform_3, window_bounds = array<i64: 224, 128>}]} {
    %c0 = arith.constant 0 : index
    %c0_0 = arith.constant 0 : index
    %0 = vector.load %arg1[%c0, %c0_0] : memref<224x576xbf16, #tpu.memory_space<vmem>>, vector<224x576xbf16>
    %c0_1 = arith.constant 0 : index
    %c0_2 = arith.constant 0 : index
    %1 = vector.load %arg2[%c0_1, %c0_2] : memref<576x128xbf16, #tpu.memory_space<vmem>>, vector<576x128xbf16>
    %cst = arith.constant dense<0.000000e+00> : vector<224x128xf32>
    %2 = tpu.matmul %0, %1, %cst {dimension_numbers = #tpu.dot_dimension_numbers<[1], [0], [0], [1], [0, 0, 1, 1], [], []>} : vector<224x576xbf16>, vector<576x128xbf16>, vector<224x128xf32> -> vector<224x128xf32>
    %c0_3 = arith.constant 0 : index
    %c0_4 = arith.constant 0 : index
    %3 = vector.load %arg3[%c0_3, %c0_4] : memref<2x128xf32, #tpu.memory_space<vmem>>, vector<2x128xf32>
    %4 = vector.extract_strided_slice %3 {offsets = [0, 0], sizes = [1, 128], strides = [1, 1]} : vector<2x128xf32> to vector<1x128xf32>
    %5 = vector.broadcast %4 : vector<1x128xf32> to vector<224x128xf32>
    %6 = arith.addf %2, %5 : vector<224x128xf32>
    %cst_5 = arith.constant 0.000000e+00 : f32
    %7 = vector.broadcast %cst_5 : f32 to vector<224x128xf32>
    %8 = arith.cmpf ogt, %6, %7 : vector<224x128xf32>
    %9 = vector.extract_strided_slice %3 {offsets = [1, 0], sizes = [1, 128], strides = [1, 1]} : vector<2x128xf32> to vector<1x128xf32>
    %10 = vector.broadcast %9 : vector<1x128xf32> to vector<224x128xf32>
    %11 = arith.mulf %6, %10 : vector<224x128xf32>
    %12 = arith.select %8, %6, %11 : vector<224x128xi1>, vector<224x128xf32>
    %13 = arith.truncf %12 : vector<224x128xf32> to vector<224x128xbf16>
    %c0_6 = arith.constant 0 : index
    %c0_7 = arith.constant 0 : index
    %14 = vector.load %arg4[%c0_6, %c0_7] : memref<224x128xbf16, #tpu.memory_space<vmem>>, vector<224x128xbf16>
    tpu.vector_store %arg4[%c0_6, %c0_7], %13 {strides = array<i32>} : memref<224x128xbf16, #tpu.memory_space<vmem>>, vector<224x128xbf16>,
    return
  }
  func.func @transform_0(%arg0: i32) -> (i32, i32) {
    %c0_i32 = arith.constant 0 : i32
    %c0_i32_0 = arith.constant 0 : i32
    return %arg0, %c0_i32 : i32, i32
  }
  func.func @transform_1(%arg0: i32) -> (i32, i32) {
    %c0_i32 = arith.constant 0 : i32
    %c0_i32_0 = arith.constant 0 : i32
    %c0_i32_1 = arith.constant 0 : i32
    return %c0_i32, %c0_i32_0 : i32, i32
  }
  func.func @transform_2(%arg0: i32) -> (i32, i32) {
    %c0_i32 = arith.constant 0 : i32
    %c0_i32_0 = arith.constant 0 : i32
    %c0_i32_1 = arith.constant 0 : i32
    return %c0_i32, %c0_i32_0 : i32, i32
  }
  func.func @transform_3(%arg0: i32) -> (i32, i32) {
    %c0_i32 = arith.constant 0 : i32
    %c0_i32_0 = arith.constant 0 : i32
    return %arg0, %c0_i32 : i32, i32
  }
}

module attributes {stable_mosaic.version = 11 : i64} {
  func.func @_mm_bias_prelu_kernel(%arg0: i32, %arg1: memref<32x1152xbf16, #tpu.memory_space<vmem>>, %arg2: memref<1152x128xbf16, #tpu.memory_space<vmem>>, %arg3: memref<2x128xf32, #tpu.memory_space<vmem>>, %arg4: memref<32x128xbf16, #tpu.memory_space<vmem>>) attributes {dimension_semantics = [#tpu.dimension_semantics<parallel>], iteration_bounds = array<i64: 2>, scalar_prefetch = 0 : i64, scratch_operands = 0 : i64, tpu.core_type = #tpu.core_type<tc>, window_params = [{transform_indices = @transform_0, window_bounds = array<i64: 32, 1152>}, {pipeline_mode = #tpu.pipeline_mode<synchronous>, transform_indices = @transform_1, window_bounds = array<i64: 1152, 128>}, {pipeline_mode = #tpu.pipeline_mode<synchronous>, transform_indices = @transform_2, window_bounds = array<i64: 2, 128>}, {transform_indices = @transform_3, window_bounds = array<i64: 32, 128>}]} {
    %c0 = arith.constant 0 : index
    %c0_0 = arith.constant 0 : index
    %0 = vector.load %arg1[%c0, %c0_0] : memref<32x1152xbf16, #tpu.memory_space<vmem>>, vector<32x1152xbf16>
    %c0_1 = arith.constant 0 : index
    %c0_2 = arith.constant 0 : index
    %1 = vector.load %arg2[%c0_1, %c0_2] : memref<1152x128xbf16, #tpu.memory_space<vmem>>, vector<1152x128xbf16>
    %cst = arith.constant dense<0.000000e+00> : vector<32x128xf32>
    %2 = tpu.matmul %0, %1, %cst {dimension_numbers = #tpu.dot_dimension_numbers<[1], [0], [0], [1], [0, 0, 1, 1], [], []>} : vector<32x1152xbf16>, vector<1152x128xbf16>, vector<32x128xf32> -> vector<32x128xf32>
    %c0_3 = arith.constant 0 : index
    %c0_4 = arith.constant 0 : index
    %3 = vector.load %arg3[%c0_3, %c0_4] : memref<2x128xf32, #tpu.memory_space<vmem>>, vector<2x128xf32>
    %4 = vector.extract_strided_slice %3 {offsets = [0, 0], sizes = [1, 128], strides = [1, 1]} : vector<2x128xf32> to vector<1x128xf32>
    %5 = vector.broadcast %4 : vector<1x128xf32> to vector<32x128xf32>
    %6 = arith.addf %2, %5 : vector<32x128xf32>
    %cst_5 = arith.constant 0.000000e+00 : f32
    %7 = vector.broadcast %cst_5 : f32 to vector<32x128xf32>
    %8 = arith.cmpf ogt, %6, %7 : vector<32x128xf32>
    %9 = vector.extract_strided_slice %3 {offsets = [1, 0], sizes = [1, 128], strides = [1, 1]} : vector<2x128xf32> to vector<1x128xf32>
    %10 = vector.broadcast %9 : vector<1x128xf32> to vector<32x128xf32>
    %11 = arith.mulf %6, %10 : vector<32x128xf32>
    %12 = arith.select %8, %6, %11 : vector<32x128xi1>, vector<32x128xf32>
    %13 = arith.truncf %12 : vector<32x128xf32> to vector<32x128xbf16>
    %c0_6 = arith.constant 0 : index
    %c0_7 = arith.constant 0 : index
    %14 = vector.load %arg4[%c0_6, %c0_7] : memref<32x128xbf16, #tpu.memory_space<vmem>>, vector<32x128xbf16>
    tpu.vector_store %arg4[%c0_6, %c0_7], %13 {strides = array<i32>} : memref<32x128xbf16, #tpu.memory_space<vmem>>, vector<32x128xbf16>,
    return
  }
  func.func @transform_0(%arg0: i32) -> (i32, i32) {
    %c0_i32 = arith.constant 0 : i32
    %c0_i32_0 = arith.constant 0 : i32
    return %arg0, %c0_i32 : i32, i32
  }
  func.func @transform_1(%arg0: i32) -> (i32, i32) {
    %c0_i32 = arith.constant 0 : i32
    %c0_i32_0 = arith.constant 0 : i32
    %c0_i32_1 = arith.constant 0 : i32
    return %c0_i32, %c0_i32_0 : i32, i32
  }
  func.func @transform_2(%arg0: i32) -> (i32, i32) {
    %c0_i32 = arith.constant 0 : i32
    %c0_i32_0 = arith.constant 0 : i32
    %c0_i32_1 = arith.constant 0 : i32
    return %c0_i32, %c0_i32_0 : i32, i32
  }
  func.func @transform_3(%arg0: i32) -> (i32, i32) {
    %c0_i32 = arith.constant 0 : i32
    %c0_i32_0 = arith.constant 0 : i32
    return %arg0, %c0_i32 : i32, i32
  }
}

module attributes {stable_mosaic.version = 11 : i64} {
  func.func @_tail_kernel(%arg0: i32, %arg1: memref<9x16x256xbf16, #tpu.memory_space<vmem>>, %arg2: memref<256x128xbf16, #tpu.memory_space<vmem>>, %arg3: memref<2x128xf32, #tpu.memory_space<vmem>>, %arg4: memref<9x128x256xbf16, #tpu.memory_space<vmem>>, %arg5: memref<2x256xf32, #tpu.memory_space<vmem>>, %arg6: memref<256x128xbf16, #tpu.memory_space<vmem>>, %arg7: memref<1x128xf32, #tpu.memory_space<vmem>>, %arg8: memref<16x128xf32, #tpu.memory_space<vmem>>, %arg9: memref<144x128xbf16, #tpu.memory_space<vmem>>, %arg10: memref<16x256xf32, #tpu.memory_space<vmem>>) attributes {dimension_semantics = [#tpu.dimension_semantics<parallel>], iteration_bounds = array<i64: 1>, scalar_prefetch = 0 : i64, scratch_operands = 2 : i64, tpu.core_type = #tpu.core_type<tc>, window_params = [{transform_indices = @transform_0, window_bounds = array<i64: 9, 16, 256>}, {pipeline_mode = #tpu.pipeline_mode<synchronous>, transform_indices = @transform_1, window_bounds = array<i64: 256, 128>}, {pipeline_mode = #tpu.pipeline_mode<synchronous>, transform_indices = @transform_2, window_bounds = array<i64: 2, 128>}, {pipeline_mode = #tpu.pipeline_mode<synchronous>, transform_indices = @transform_3, window_bounds = array<i64: 9, 128, 256>}, {pipeline_mode = #tpu.pipeline_mode<synchronous>, transform_indices = @transform_4, window_bounds = array<i64: 2, 256>}, {pipeline_mode = #tpu.pipeline_mode<synchronous>, transform_indices = @transform_5, window_bounds = array<i64: 256, 128>}, {pipeline_mode = #tpu.pipeline_mode<synchronous>, transform_indices = @transform_6, window_bounds = array<i64: 1, 128>}, {transform_indices = @transform_7, window_bounds = array<i64: 16, 128>}]} {
    %c0 = arith.constant 0 : index
    %c0_0 = arith.constant 0 : index
    %c0_1 = arith.constant 0 : index
    %0 = vector.load %arg1[%c0, %c0_0, %c0_1] : memref<9x16x256xbf16, #tpu.memory_space<vmem>>, vector<9x16x256xbf16>
    %1 = vector.shape_cast %0 : vector<9x16x256xbf16> to vector<144x256xbf16>
    %c0_2 = arith.constant 0 : index
    %c0_3 = arith.constant 0 : index
    %2 = vector.load %arg3[%c0_2, %c0_3] : memref<2x128xf32, #tpu.memory_space<vmem>>, vector<2x128xf32>
    %c0_4 = arith.constant 0 : index
    %c0_5 = arith.constant 0 : index
    %3 = vector.load %arg2[%c0_4, %c0_5] : memref<256x128xbf16, #tpu.memory_space<vmem>>, vector<256x128xbf16>
    %cst = arith.constant dense<0.000000e+00> : vector<144x128xf32>
    %4 = tpu.matmul %1, %3, %cst {dimension_numbers = #tpu.dot_dimension_numbers<[1], [0], [0], [1], [0, 0, 1, 1], [], []>} : vector<144x256xbf16>, vector<256x128xbf16>, vector<144x128xf32> -> vector<144x128xf32>
    %5 = vector.extract_strided_slice %2 {offsets = [0, 0], sizes = [1, 128], strides = [1, 1]} : vector<2x128xf32> to vector<1x128xf32>
    %6 = vector.broadcast %5 : vector<1x128xf32> to vector<144x128xf32>
    %7 = arith.addf %4, %6 : vector<144x128xf32>
    %cst_6 = arith.constant 0.000000e+00 : f32
    %8 = vector.broadcast %cst_6 : f32 to vector<144x128xf32>
    %9 = arith.cmpf ogt, %7, %8 : vector<144x128xf32>
    %10 = vector.extract_strided_slice %2 {offsets = [1, 0], sizes = [1, 128], strides = [1, 1]} : vector<2x128xf32> to vector<1x128xf32>
    %11 = vector.broadcast %10 : vector<1x128xf32> to vector<144x128xf32>
    %12 = arith.mulf %7, %11 : vector<144x128xf32>
    %13 = arith.select %9, %7, %12 : vector<144x128xi1>, vector<144x128xf32>
    %14 = arith.truncf %13 : vector<144x128xf32> to vector<144x128xbf16>
    %c0_7 = arith.constant 0 : index
    %c0_8 = arith.constant 0 : index
    %15 = vector.load %arg9[%c0_7, %c0_8] : memref<144x128xbf16, #tpu.memory_space<vmem>>, vector<144x128xbf16>
    tpu.vector_store %arg9[%c0_7, %c0_8], %14 {strides = array<i32>} : memref<144x128xbf16, #tpu.memory_space<vmem>>, vector<144x128xbf16>,
    %cst_9 = arith.constant 0.000000e+00 : f32
    %16 = vector.broadcast %cst_9 : f32 to vector<16x256xf32>
    %c0_10 = arith.constant 0 : index
    %c0_11 = arith.constant 0 : index
    %17 = vector.load %arg10[%c0_10, %c0_11] : memref<16x256xf32, #tpu.memory_space<vmem>>, vector<16x256xf32>
    tpu.vector_store %arg10[%c0_10, %c0_11], %16 {strides = array<i32>} : memref<16x256xf32, #tpu.memory_space<vmem>>, vector<16x256xf32>,
    %c0_12 = arith.constant 0 : index
    %c0_13 = arith.constant 0 : index
    %18 = vector.load %arg10[%c0_12, %c0_13] : memref<16x256xf32, #tpu.memory_space<vmem>>, vector<16x256xf32>
    %c0_14 = arith.constant 0 : index
    %c0_15 = arith.constant 0 : index
    %19 = vector.load %arg9[%c0_14, %c0_15] : memref<144x128xbf16, #tpu.memory_space<vmem>>, vector<16x128xbf16>
    %c0_16 = arith.constant 0 : index
    %c0_17 = arith.constant 0 : index
    %c0_18 = arith.constant 0 : index
    %20 = vector.load %arg4[%c0_16, %c0_17, %c0_18] : memref<9x128x256xbf16, #tpu.memory_space<vmem>>, vector<1x128x256xbf16>
    %21 = vector.shape_cast %20 : vector<1x128x256xbf16> to vector<128x256xbf16>
    %cst_19 = arith.constant dense<0.000000e+00> : vector<16x256xf32>
    %22 = tpu.matmul %19, %21, %cst_19 {dimension_numbers = #tpu.dot_dimension_numbers<[1], [0], [0], [1], [0, 0, 1, 1], [], []>} : vector<16x128xbf16>, vector<128x256xbf16>, vector<16x256xf32> -> vector<16x256xf32>
    %23 = arith.addf %18, %22 : vector<16x256xf32>
    %c0_20 = arith.constant 0 : index
    %c0_21 = arith.constant 0 : index
    %24 = vector.load %arg10[%c0_20, %c0_21] : memref<16x256xf32, #tpu.memory_space<vmem>>, vector<16x256xf32>
    tpu.vector_store %arg10[%c0_20, %c0_21], %23 {strides = array<i32>} : memref<16x256xf32, #tpu.memory_space<vmem>>, vector<16x256xf32>,
    %c0_22 = arith.constant 0 : index
    %c0_23 = arith.constant 0 : index
    %25 = vector.load %arg10[%c0_22, %c0_23] : memref<16x256xf32, #tpu.memory_space<vmem>>, vector<16x256xf32>
    %c16 = arith.constant 16 : index
    %c0_24 = arith.constant 0 : index
    %26 = vector.load %arg9[%c16, %c0_24] : memref<144x128xbf16, #tpu.memory_space<vmem>>, vector<16x128xbf16>
    %c1 = arith.constant 1 : index
    %c0_25 = arith.constant 0 : index
    %c0_26 = arith.constant 0 : index
    %27 = vector.load %arg4[%c1, %c0_25, %c0_26] : memref<9x128x256xbf16, #tpu.memory_space<vmem>>, vector<1x128x256xbf16>
    %28 = vector.shape_cast %27 : vector<1x128x256xbf16> to vector<128x256xbf16>
    %cst_27 = arith.constant dense<0.000000e+00> : vector<16x256xf32>
    %29 = tpu.matmul %26, %28, %cst_27 {dimension_numbers = #tpu.dot_dimension_numbers<[1], [0], [0], [1], [0, 0, 1, 1], [], []>} : vector<16x128xbf16>, vector<128x256xbf16>, vector<16x256xf32> -> vector<16x256xf32>
    %30 = arith.addf %25, %29 : vector<16x256xf32>
    %c0_28 = arith.constant 0 : index
    %c0_29 = arith.constant 0 : index
    %31 = vector.load %arg10[%c0_28, %c0_29] : memref<16x256xf32, #tpu.memory_space<vmem>>, vector<16x256xf32>
    tpu.vector_store %arg10[%c0_28, %c0_29], %30 {strides = array<i32>} : memref<16x256xf32, #tpu.memory_space<vmem>>, vector<16x256xf32>,
    %c0_30 = arith.constant 0 : index
    %c0_31 = arith.constant 0 : index
    %32 = vector.load %arg10[%c0_30, %c0_31] : memref<16x256xf32, #tpu.memory_space<vmem>>, vector<16x256xf32>
    %c32 = arith.constant 32 : index
    %c0_32 = arith.constant 0 : index
    %33 = vector.load %arg9[%c32, %c0_32] : memref<144x128xbf16, #tpu.memory_space<vmem>>, vector<16x128xbf16>
    %c2 = arith.constant 2 : index
    %c0_33 = arith.constant 0 : index
    %c0_34 = arith.constant 0 : index
    %34 = vector.load %arg4[%c2, %c0_33, %c0_34] : memref<9x128x256xbf16, #tpu.memory_space<vmem>>, vector<1x128x256xbf16>
    %35 = vector.shape_cast %34 : vector<1x128x256xbf16> to vector<128x256xbf16>
    %cst_35 = arith.constant dense<0.000000e+00> : vector<16x256xf32>
    %36 = tpu.matmul %33, %35, %cst_35 {dimension_numbers = #tpu.dot_dimension_numbers<[1], [0], [0], [1], [0, 0, 1, 1], [], []>} : vector<16x128xbf16>, vector<128x256xbf16>, vector<16x256xf32> -> vector<16x256xf32>
    %37 = arith.addf %32, %36 : vector<16x256xf32>
    %c0_36 = arith.constant 0 : index
    %c0_37 = arith.constant 0 : index
    %38 = vector.load %arg10[%c0_36, %c0_37] : memref<16x256xf32, #tpu.memory_space<vmem>>, vector<16x256xf32>
    tpu.vector_store %arg10[%c0_36, %c0_37], %37 {strides = array<i32>} : memref<16x256xf32, #tpu.memory_space<vmem>>, vector<16x256xf32>,
    %c0_38 = arith.constant 0 : index
    %c0_39 = arith.constant 0 : index
    %39 = vector.load %arg10[%c0_38, %c0_39] : memref<16x256xf32, #tpu.memory_space<vmem>>, vector<16x256xf32>
    %c48 = arith.constant 48 : index
    %c0_40 = arith.constant 0 : index
    %40 = vector.load %arg9[%c48, %c0_40] : memref<144x128xbf16, #tpu.memory_space<vmem>>, vector<16x128xbf16>
    %c3 = arith.constant 3 : index
    %c0_41 = arith.constant 0 : index
    %c0_42 = arith.constant 0 : index
    %41 = vector.load %arg4[%c3, %c0_41, %c0_42] : memref<9x128x256xbf16, #tpu.memory_space<vmem>>, vector<1x128x256xbf16>
    %42 = vector.shape_cast %41 : vector<1x128x256xbf16> to vector<128x256xbf16>
    %cst_43 = arith.constant dense<0.000000e+00> : vector<16x256xf32>
    %43 = tpu.matmul %40, %42, %cst_43 {dimension_numbers = #tpu.dot_dimension_numbers<[1], [0], [0], [1], [0, 0, 1, 1], [], []>} : vector<16x128xbf16>, vector<128x256xbf16>, vector<16x256xf32> -> vector<16x256xf32>
    %44 = arith.addf %39, %43 : vector<16x256xf32>
    %c0_44 = arith.constant 0 : index
    %c0_45 = arith.constant 0 : index
    %45 = vector.load %arg10[%c0_44, %c0_45] : memref<16x256xf32, #tpu.memory_space<vmem>>, vector<16x256xf32>
    tpu.vector_store %arg10[%c0_44, %c0_45], %44 {strides = array<i32>} : memref<16x256xf32, #tpu.memory_space<vmem>>, vector<16x256xf32>,
    %c0_46 = arith.constant 0 : index
    %c0_47 = arith.constant 0 : index
    %46 = vector.load %arg10[%c0_46, %c0_47] : memref<16x256xf32, #tpu.memory_space<vmem>>, vector<16x256xf32>
    %c64 = arith.constant 64 : index
    %c0_48 = arith.constant 0 : index
    %47 = vector.load %arg9[%c64, %c0_48] : memref<144x128xbf16, #tpu.memory_space<vmem>>, vector<16x128xbf16>
    %c4 = arith.constant 4 : index
    %c0_49 = arith.constant 0 : index
    %c0_50 = arith.constant 0 : index
    %48 = vector.load %arg4[%c4, %c0_49, %c0_50] : memref<9x128x256xbf16, #tpu.memory_space<vmem>>, vector<1x128x256xbf16>
    %49 = vector.shape_cast %48 : vector<1x128x256xbf16> to vector<128x256xbf16>
    %cst_51 = arith.constant dense<0.000000e+00> : vector<16x256xf32>
    %50 = tpu.matmul %47, %49, %cst_51 {dimension_numbers = #tpu.dot_dimension_numbers<[1], [0], [0], [1], [0, 0, 1, 1], [], []>} : vector<16x128xbf16>, vector<128x256xbf16>, vector<16x256xf32> -> vector<16x256xf32>
    %51 = arith.addf %46, %50 : vector<16x256xf32>
    %c0_52 = arith.constant 0 : index
    %c0_53 = arith.constant 0 : index
    %52 = vector.load %arg10[%c0_52, %c0_53] : memref<16x256xf32, #tpu.memory_space<vmem>>, vector<16x256xf32>
    tpu.vector_store %arg10[%c0_52, %c0_53], %51 {strides = array<i32>} : memref<16x256xf32, #tpu.memory_space<vmem>>, vector<16x256xf32>,
    %c0_54 = arith.constant 0 : index
    %c0_55 = arith.constant 0 : index
    %53 = vector.load %arg10[%c0_54, %c0_55] : memref<16x256xf32, #tpu.memory_space<vmem>>, vector<16x256xf32>
    %c80 = arith.constant 80 : index
    %c0_56 = arith.constant 0 : index
    %54 = vector.load %arg9[%c80, %c0_56] : memref<144x128xbf16, #tpu.memory_space<vmem>>, vector<16x128xbf16>
    %c5 = arith.constant 5 : index
    %c0_57 = arith.constant 0 : index
    %c0_58 = arith.constant 0 : index
    %55 = vector.load %arg4[%c5, %c0_57, %c0_58] : memref<9x128x256xbf16, #tpu.memory_space<vmem>>, vector<1x128x256xbf16>
    %56 = vector.shape_cast %55 : vector<1x128x256xbf16> to vector<128x256xbf16>
    %cst_59 = arith.constant dense<0.000000e+00> : vector<16x256xf32>
    %57 = tpu.matmul %54, %56, %cst_59 {dimension_numbers = #tpu.dot_dimension_numbers<[1], [0], [0], [1], [0, 0, 1, 1], [], []>} : vector<16x128xbf16>, vector<128x256xbf16>, vector<16x256xf32> -> vector<16x256xf32>
    %58 = arith.addf %53, %57 : vector<16x256xf32>
    %c0_60 = arith.constant 0 : index
    %c0_61 = arith.constant 0 : index
    %59 = vector.load %arg10[%c0_60, %c0_61] : memref<16x256xf32, #tpu.memory_space<vmem>>, vector<16x256xf32>
    tpu.vector_store %arg10[%c0_60, %c0_61], %58 {strides = array<i32>} : memref<16x256xf32, #tpu.memory_space<vmem>>, vector<16x256xf32>,
    %c0_62 = arith.constant 0 : index
    %c0_63 = arith.constant 0 : index
    %60 = vector.load %arg10[%c0_62, %c0_63] : memref<16x256xf32, #tpu.memory_space<vmem>>, vector<16x256xf32>
    %c96 = arith.constant 96 : index
    %c0_64 = arith.constant 0 : index
    %61 = vector.load %arg9[%c96, %c0_64] : memref<144x128xbf16, #tpu.memory_space<vmem>>, vector<16x128xbf16>
    %c6 = arith.constant 6 : index
    %c0_65 = arith.constant 0 : index
    %c0_66 = arith.constant 0 : index
    %62 = vector.load %arg4[%c6, %c0_65, %c0_66] : memref<9x128x256xbf16, #tpu.memory_space<vmem>>, vector<1x128x256xbf16>
    %63 = vector.shape_cast %62 : vector<1x128x256xbf16> to vector<128x256xbf16>
    %cst_67 = arith.constant dense<0.000000e+00> : vector<16x256xf32>
    %64 = tpu.matmul %61, %63, %cst_67 {dimension_numbers = #tpu.dot_dimension_numbers<[1], [0], [0], [1], [0, 0, 1, 1], [], []>} : vector<16x128xbf16>, vector<128x256xbf16>, vector<16x256xf32> -> vector<16x256xf32>
    %65 = arith.addf %60, %64 : vector<16x256xf32>
    %c0_68 = arith.constant 0 : index
    %c0_69 = arith.constant 0 : index
    %66 = vector.load %arg10[%c0_68, %c0_69] : memref<16x256xf32, #tpu.memory_space<vmem>>, vector<16x256xf32>
    tpu.vector_store %arg10[%c0_68, %c0_69], %65 {strides = array<i32>} : memref<16x256xf32, #tpu.memory_space<vmem>>, vector<16x256xf32>,
    %c0_70 = arith.constant 0 : index
    %c0_71 = arith.constant 0 : index
    %67 = vector.load %arg10[%c0_70, %c0_71] : memref<16x256xf32, #tpu.memory_space<vmem>>, vector<16x256xf32>
    %c112 = arith.constant 112 : index
    %c0_72 = arith.constant 0 : index
    %68 = vector.load %arg9[%c112, %c0_72] : memref<144x128xbf16, #tpu.memory_space<vmem>>, vector<16x128xbf16>
    %c7 = arith.constant 7 : index
    %c0_73 = arith.constant 0 : index
    %c0_74 = arith.constant 0 : index
    %69 = vector.load %arg4[%c7, %c0_73, %c0_74] : memref<9x128x256xbf16, #tpu.memory_space<vmem>>, vector<1x128x256xbf16>
    %70 = vector.shape_cast %69 : vector<1x128x256xbf16> to vector<128x256xbf16>
    %cst_75 = arith.constant dense<0.000000e+00> : vector<16x256xf32>
    %71 = tpu.matmul %68, %70, %cst_75 {dimension_numbers = #tpu.dot_dimension_numbers<[1], [0], [0], [1], [0, 0, 1, 1], [], []>} : vector<16x128xbf16>, vector<128x256xbf16>, vector<16x256xf32> -> vector<16x256xf32>
    %72 = arith.addf %67, %71 : vector<16x256xf32>
    %c0_76 = arith.constant 0 : index
    %c0_77 = arith.constant 0 : index
    %73 = vector.load %arg10[%c0_76, %c0_77] : memref<16x256xf32, #tpu.memory_space<vmem>>, vector<16x256xf32>
    tpu.vector_store %arg10[%c0_76, %c0_77], %72 {strides = array<i32>} : memref<16x256xf32, #tpu.memory_space<vmem>>, vector<16x256xf32>,
    %c0_78 = arith.constant 0 : index
    %c0_79 = arith.constant 0 : index
    %74 = vector.load %arg10[%c0_78, %c0_79] : memref<16x256xf32, #tpu.memory_space<vmem>>, vector<16x256xf32>
    %c128 = arith.constant 128 : index
    %c0_80 = arith.constant 0 : index
    %75 = vector.load %arg9[%c128, %c0_80] : memref<144x128xbf16, #tpu.memory_space<vmem>>, vector<16x128xbf16>
    %c8 = arith.constant 8 : index
    %c0_81 = arith.constant 0 : index
    %c0_82 = arith.constant 0 : index
    %76 = vector.load %arg4[%c8, %c0_81, %c0_82] : memref<9x128x256xbf16, #tpu.memory_space<vmem>>, vector<1x128x256xbf16>
    %77 = vector.shape_cast %76 : vector<1x128x256xbf16> to vector<128x256xbf16>
    %cst_83 = arith.constant dense<0.000000e+00> : vector<16x256xf32>
    %78 = tpu.matmul %75, %77, %cst_83 {dimension_numbers = #tpu.dot_dimension_numbers<[1], [0], [0], [1], [0, 0, 1, 1], [], []>} : vector<16x128xbf16>, vector<128x256xbf16>, vector<16x256xf32> -> vector<16x256xf32>
    %79 = arith.addf %74, %78 : vector<16x256xf32>
    %c0_84 = arith.constant 0 : index
    %c0_85 = arith.constant 0 : index
    %80 = vector.load %arg10[%c0_84, %c0_85] : memref<16x256xf32, #tpu.memory_space<vmem>>, vector<16x256xf32>
    tpu.vector_store %arg10[%c0_84, %c0_85], %79 {strides = array<i32>} : memref<16x256xf32, #tpu.memory_space<vmem>>, vector<16x256xf32>,
    %c0_86 = arith.constant 0 : index
    %c0_87 = arith.constant 0 : index
    %81 = vector.load %arg5[%c0_86, %c0_87] : memref<2x256xf32, #tpu.memory_space<vmem>>, vector<2x256xf32>
    %c0_88 = arith.constant 0 : index
    %c0_89 = arith.constant 0 : index
    %82 = vector.load %arg10[%c0_88, %c0_89] : memref<16x256xf32, #tpu.memory_space<vmem>>, vector<16x256xf32>
    %83 = vector.extract_strided_slice %81 {offsets = [0, 0], sizes = [1, 256], strides = [1, 1]} : vector<2x256xf32> to vector<1x256xf32>
    %84 = vector.broadcast %83 : vector<1x256xf32> to vector<16x256xf32>
    %85 = arith.addf %82, %84 : vector<16x256xf32>
    %cst_90 = arith.constant 0.000000e+00 : f32
    %86 = vector.broadcast %cst_90 : f32 to vector<16x256xf32>
    %87 = arith.cmpf ogt, %85, %86 : vector<16x256xf32>
    %88 = vector.extract_strided_slice %81 {offsets = [1, 0], sizes = [1, 256], strides = [1, 1]} : vector<2x256xf32> to vector<1x256xf32>
    %89 = vector.broadcast %88 : vector<1x256xf32> to vector<16x256xf32>
    %90 = arith.mulf %85, %89 : vector<16x256xf32>
    %91 = arith.select %87, %85, %90 : vector<16x256xi1>, vector<16x256xf32>
    %92 = arith.truncf %91 : vector<16x256xf32> to vector<16x256xbf16>
    %c0_91 = arith.constant 0 : index
    %c0_92 = arith.constant 0 : index
    %93 = vector.load %arg6[%c0_91, %c0_92] : memref<256x128xbf16, #tpu.memory_space<vmem>>, vector<256x128xbf16>
    %cst_93 = arith.constant dense<0.000000e+00> : vector<16x128xf32>
    %94 = tpu.matmul %92, %93, %cst_93 {dimension_numbers = #tpu.dot_dimension_numbers<[1], [0], [0], [1], [0, 0, 1, 1], [], []>} : vector<16x256xbf16>, vector<256x128xbf16>, vector<16x128xf32> -> vector<16x128xf32>
    %c0_94 = arith.constant 0 : index
    %c0_95 = arith.constant 0 : index
    %95 = vector.load %arg7[%c0_94, %c0_95] : memref<1x128xf32, #tpu.memory_space<vmem>>, vector<1x128xf32>
    %96 = vector.broadcast %95 : vector<1x128xf32> to vector<16x128xf32>
    %97 = arith.addf %94, %96 : vector<16x128xf32>
    %c0_96 = arith.constant 0 : index
    %c0_97 = arith.constant 0 : index
    %98 = vector.load %arg8[%c0_96, %c0_97] : memref<16x128xf32, #tpu.memory_space<vmem>>, vector<16x128xf32>
    tpu.vector_store %arg8[%c0_96, %c0_97], %97 {strides = array<i32>} : memref<16x128xf32, #tpu.memory_space<vmem>>, vector<16x128xf32>,
    return
  }
  func.func @transform_0(%arg0: i32) -> (i32, i32, i32) {
    %c0_i32 = arith.constant 0 : i32
    %c0_i32_0 = arith.constant 0 : i32
    %c0_i32_1 = arith.constant 0 : i32
    return %c0_i32, %arg0, %c0_i32_0 : i32, i32, i32
  }
  func.func @transform_1(%arg0: i32) -> (i32, i32) {
    %c0_i32 = arith.constant 0 : i32
    %c0_i32_0 = arith.constant 0 : i32
    %c0_i32_1 = arith.constant 0 : i32
    return %c0_i32, %c0_i32_0 : i32, i32
  }
  func.func @transform_2(%arg0: i32) -> (i32, i32) {
    %c0_i32 = arith.constant 0 : i32
    %c0_i32_0 = arith.constant 0 : i32
    %c0_i32_1 = arith.constant 0 : i32
    return %c0_i32, %c0_i32_0 : i32, i32
  }
  func.func @transform_3(%arg0: i32) -> (i32, i32, i32) {
    %c0_i32 = arith.constant 0 : i32
    %c0_i32_0 = arith.constant 0 : i32
    %c0_i32_1 = arith.constant 0 : i32
    %c0_i32_2 = arith.constant 0 : i32
    return %c0_i32, %c0_i32_0, %c0_i32_1 : i32, i32, i32
  }
  func.func @transform_4(%arg0: i32) -> (i32, i32) {
    %c0_i32 = arith.constant 0 : i32
    %c0_i32_0 = arith.constant 0 : i32
    %c0_i32_1 = arith.constant 0 : i32
    return %c0_i32, %c0_i32_0 : i32, i32
  }
  func.func @transform_5(%arg0: i32) -> (i32, i32) {
    %c0_i32 = arith.constant 0 : i32
    %c0_i32_0 = arith.constant 0 : i32
    %c0_i32_1 = arith.constant 0 : i32
    return %c0_i32, %c0_i32_0 : i32, i32
  }
  func.func @transform_6(%arg0: i32) -> (i32, i32) {
    %c0_i32 = arith.constant 0 : i32
    %c0_i32_0 = arith.constant 0 : i32
    %c0_i32_1 = arith.constant 0 : i32
    return %c0_i32, %c0_i32_0 : i32, i32
  }
  func.func @transform_7(%arg0: i32) -> (i32, i32) {
    %c0_i32 = arith.constant 0 : i32
    %c0_i32_0 = arith.constant 0 : i32
    return %arg0, %c0_i32 : i32, i32
  }
}

</mosaic_0001>

<bundles_post_ra>
// kernel: onet_forward.4
= control target key start
LH: loop header
LB: loop body
LE: loop exit
PB: predicated region body
PF: predicated region fallthrough
CT: control target
= control target key end

     0   :  { %s2035_s12 = smov 0   ;;  %s2300_s0 = inlined_call_operand.vmem [shape: bf16[1088,128], index: 0, kind: input, shape index: {}]   ;;  %s2301_s1 = inlined_call_operand.vmem [shape: bf16[128,128], index: 1, kind: input, shape index: {}]   ;;  %s2302_s2 = inlined_call_operand.vmem [shape: f32[2,128], index: 2, kind: input, shape index: {}]   ;;  %s2303_s3 = inlined_call_operand.vmem [shape: bf16[1088,128], index: 3, kind: output, shape index: {}]  }
   0x1 LB: > { %s1425_s13 = sadd.s32 4294967295, %s2013_s12   ;;  %p1429_p0 = scmp.ge.s32.totalorder %s2013_s12, 1  ;;  %s2013_s12 = sphi %s2035_s12, %s13_s12  }
   0x2   : > { %p138_p1 = scmp.lt.s32.totalorder %s2013_s12, 3 }
   0x4   : > { %p139_p2 = pnand %p1429_p0, %p138_p1 }
   0x5   : > { %s162_s16 = smul.u32 (!%p139_p2), 68, %s1425_s13 }
   0x6   : > { %142 = sbr.rel (%p139_p2) target bundleno = 320 (0x140), region = 32 }
   0x7   : > { %p163_p3 = scmp.lt.s32.totalorder (!%p139_p2), %s162_s16, 135 }
   0xb   : > { %v1965_v0 = vld [vmem:[%s2301_s1 + $0x38] sm:$0xff]   ;;  %v1966_v1 = vld [vmem:[%s2301_s1 + $0x30] sm:$0xff]   ;;  %v1967_v2 = vld [vmem:[%s2301_s1 + $0x28] sm:$0xff]   ;;  %s2305_s16 = smov (!%p163_p3, %s162_s16), 135  ;;  %v260_v42 = vlaneseq }
   0xc   : > { %1857 = vmatprep.subr.bf16.mxu0 %v1965_v0  ;;  %1941 = vmatprep.subr.bf16.mxu1 %v1965_v0  ;;  %s1430_s21 = sshll.u32 %s2305_s16, 2  ;;  %v1968_v3 = vld [vmem:[%s2301_s1 + $0x20] sm:$0xff]   ;;  %v1969_v6 = vld [vmem:[%s2301_s1 + $0x18] sm:$0xff]   ;;  %v1970_v7 = vld [vmem:[%s2301_s1 + $0x10] sm:$0xff]  }
   0xd   : > { %1858 = vmatpush3.bf16.msra.mxu0 %v1965_v0  ;;  %1949 = vmatpush3.bf16.msra.mxu1 %v1965_v0  ;;  %s2063_s26 = scalar_lea.vmem %s2300_s0, %s1430_s21  ;;  %v1971_v8 = vld [vmem:[%s2301_s1 + $0x8] sm:$0xff]   ;;  %v1972_v9 = vld [vmem:[%s2301_s1] sm:$0xff]   ;;  %v261_v43 = vshrl.u32 %v260_v42, 7  ;;  %s2137_s13 = scalar_lea.vmem %s2303_s3, %s1430_s21 }
   0xe   : > { %1859 = vmatprep.subr.bf16.mxu0 %v1966_v1  ;;  %1942 = vmatprep.subr.bf16.mxu1 %v1966_v1  ;;  %v1973_v4 = vld [vmem:[%s2063_s26] sm:$0xff]   ;;  %v1974_v5 = vld [vmem:[%s2063_s26 + $0x90] sm:$0xff]   ;;  %v1975_v10 = vld [vmem:[%s2063_s26 + $0x8] sm:$0xff]  }
   0xf   : > { %1873 = vmatprep.mubr.bf16.mxu0 %v1973_v4  ;;  %1909 = vmatprep.mubr.bf16.mxu1 %v1974_v5  ;;  %v1976_v11 = vld [vmem:[%s2063_s26 + $0x98] sm:$0xff]   ;;  %v1977_v12 = vld [vmem:[%s2063_s26 + $0x10] sm:$0xff]   ;;  %v1978_v13 = vld [vmem:[%s2063_s26 + $0xa0] sm:$0xff]   ;;  %v262_v44 = vsub.s32 0, %v261_v43  ;;  %v891_v46 = vsub.s32 1, %v261_v43 }
  0x10   : > { %v1979_v14 = vld [vmem:[%s2063_s26 + $0x18] sm:$0xff]   ;;  %v1980_v15 = vld [vmem:[%s2063_s26 + $0xa8] sm:$0xff]   ;;  %v1981_v16 = vld [vmem:[%s2063_s26 + $0x20] sm:$0xff]  }
  0x11   : > { %1860 = vmatpush3.bf16.msra.mxu0 %v1966_v1  ;;  %1950 = vmatpush3.bf16.msra.mxu1 %v1966_v1  ;;  %v1982_v17 = vld [vmem:[%s2063_s26 + $0xb0] sm:$0xff]   ;;  %v1983_v18 = vld [vmem:[%s2063_s26 + $0x28] sm:$0xff]   ;;  %v1984_v19 = vld [vmem:[%s2063_s26 + $0xb8] sm:$0xff]  }
  0x12   : > { %1861 = vmatprep.subr.bf16.mxu0 %v1967_v2  ;;  %1943 = vmatprep.subr.bf16.mxu1 %v1967_v2  ;;  %v1985_v20 = vld [vmem:[%s2063_s26 + $0x30] sm:$0xff]   ;;  %v1986_v21 = vld [vmem:[%s2063_s26 + $0xc0] sm:$0xff]   ;;  %v1987_v22 = vld [vmem:[%s2063_s26 + $0x38] sm:$0xff]  }
  0x13   : > { %v1988_v23 = vld [vmem:[%s2063_s26 + $0xc8] sm:$0xff]   ;;  %v1989_v24 = vld [vmem:[%s2063_s26 + $0x40] sm:$0xff]   ;;  %v1990_v25 = vld [vmem:[%s2063_s26 + $0xd0] sm:$0xff]  }
  0x14   : > { %v1991_v26 = vld [vmem:[%s2063_s26 + $0x48] sm:$0xff]   ;;  %v1992_v27 = vld [vmem:[%s2063_s26 + $0xd8] sm:$0xff]   ;;  %v1993_v28 = vld [vmem:[%s2063_s26 + $0x50] sm:$0xff]  }
  0x15   : > { %1862 = vmatpush3.bf16.msra.mxu0 %v1967_v2  ;;  %1951 = vmatpush3.bf16.msra.mxu1 %v1967_v2  ;;  %v1994_v29 = vld [vmem:[%s2063_s26 + $0xe0] sm:$0xff]   ;;  %v1995_v30 = vld [vmem:[%s2063_s26 + $0x58] sm:$0xff]   ;;  %v1996_v31 = vld [vmem:[%s2063_s26 + $0xe8] sm:$0xff]  }
  0x16   : > { %1863 = vmatprep.subr.bf16.mxu0 %v1968_v3  ;;  %1944 = vmatprep.subr.bf16.mxu1 %v1968_v3  ;;  %v1997_v32 = vld [vmem:[%s2063_s26 + $0x60] sm:$0xff]   ;;  %v1998_v33 = vld [vmem:[%s2063_s26 + $0xf0] sm:$0xff]   ;;  %v1999_v34 = vld [vmem:[%s2063_s26 + $0x68] sm:$0xff]  }
  0x17   : > { %v2000_v35 = vld [vmem:[%s2063_s26 + $0xf8] sm:$0xff]   ;;  %v2001_v36 = vld [vmem:[%s2063_s26 + $0x70] sm:$0xff]   ;;  %v2002_v37 = vld [vmem:[%s2063_s26 + $0x100] sm:$0xff]  }
  0x18   : > { %v2003_v38 = vld [vmem:[%s2063_s26 + $0x78] sm:$0xff]   ;;  %v2004_v39 = vld [vmem:[%s2063_s26 + $0x108] sm:$0xff]   ;;  %v2005_v40 = vld [vmem:[%s2063_s26 + $0x80] sm:$0xff]  }
  0x19   : > { %1864 = vmatpush3.bf16.msra.mxu0 %v1968_v3  ;;  %1952 = vmatpush3.bf16.msra.mxu1 %v1968_v3  ;;  %v2006_v41 = vld [vmem:[%s2063_s26 + $0x88] sm:$0xff]   ;;  %v259_v45 = vld [vmem:[%s2302_s2] sm:$0x3] }
  0x1a   : > { %1865 = vmatprep.subr.bf16.mxu0 %v1969_v6  ;;  %1945 = vmatprep.subr.bf16.mxu1 %v1969_v6  ;;  %v2114_v47 = vrot.slane %v259_v45, %v262_v44  ;;  %v2116_v48 = vrot.slane %v259_v45, %v891_v46 }
  0x1d   : > { %1866 = vmatpush3.bf16.msra.mxu0 %v1969_v6  ;;  %1953 = vmatpush3.bf16.msra.mxu1 %v1969_v6 }
  0x1e   : > { %1867 = vmatprep.subr.bf16.mxu0 %v1970_v7  ;;  %1946 = vmatprep.subr.bf16.mxu1 %v1970_v7 }
  0x21   : > { %1868 = vmatpush3.bf16.msra.mxu0 %v1970_v7  ;;  %1954 = vmatpush3.bf16.msra.mxu1 %v1970_v7 }
  0x22   : > { %1869 = vmatprep.subr.bf16.mxu0 %v1971_v8  ;;  %1947 = vmatprep.subr.bf16.mxu1 %v1971_v8 }
  0x25   : > { %1870 = vmatpush3.bf16.msra.mxu0 %v1971_v8  ;;  %1955 = vmatpush3.bf16.msra.mxu1 %v1971_v8 }
  0x26   : > { %1871 = vmatprep.subr.bf16.mxu0 %v1972_v9  ;;  %1948 = vmatprep.subr.bf16.mxu1 %v1972_v9 }
  0x29   : > { %1872 = vmatpush3.bf16.msra.mxu0 %v1972_v9  ;;  %1956 = vmatpush3.bf16.msra.mxu1 %v1972_v9 }
  0x2c   : > { %1874 = vmatmul.mubr.bf16.vlgmr.msra.gmra.mxu0 %v1975_v10  ;;  %1910 = vmatmul.mubr.bf16.vlgmr.msra.gmra.mxu1 %v1976_v11 }
  0x2d   : > { %1877 = vmatprep.mubr.bf16.mxu0 %v1977_v12  ;;  %1913 = vmatprep.mubr.bf16.mxu1 %v1978_v13 }
  0x34   : > { %1878 = vmatmul.mubr.bf16.gmra.mxu0 %v1979_v14  ;;  %1914 = vmatmul.mubr.bf16.gmra.mxu1 %v1980_v15 }
  0x35   : > { %1881 = vmatprep.mubr.bf16.mxu0 %v1981_v16  ;;  %1917 = vmatprep.mubr.bf16.mxu1 %v1982_v17 }
  0x3c   : > { %1882 = vmatmul.mubr.bf16.gmra.mxu0 %v1983_v18  ;;  %1918 = vmatmul.mubr.bf16.gmra.mxu1 %v1984_v19 }
  0x3d   : > { %1885 = vmatprep.mubr.bf16.mxu0 %v1985_v20  ;;  %1921 = vmatprep.mubr.bf16.mxu1 %v1986_v21 }
  0x44   : > { %1886 = vmatmul.mubr.bf16.gmra.mxu0 %v1987_v22  ;;  %1922 = vmatmul.mubr.bf16.gmra.mxu1 %v1988_v23 }
  0x45   : > { %1889 = vmatprep.mubr.bf16.mxu0 %v1989_v24  ;;  %1925 = vmatprep.mubr.bf16.mxu1 %v1990_v25 }
  0x4c   : > { %1890 = vmatmul.mubr.bf16.gmra.mxu0 %v1991_v26  ;;  %1926 = vmatmul.mubr.bf16.gmra.mxu1 %v1992_v27 }
  0x4d   : > { %1893 = vmatprep.mubr.bf16.mxu0 %v1993_v28  ;;  %1929 = vmatprep.mubr.bf16.mxu1 %v1994_v29 }
  0x54   : > { %1894 = vmatmul.mubr.bf16.gmra.mxu0 %v1995_v30  ;;  %1930 = vmatmul.mubr.bf16.gmra.mxu1 %v1996_v31 }
  0x55   : > { %1897 = vmatprep.mubr.bf16.mxu0 %v1997_v32  ;;  %1933 = vmatprep.mubr.bf16.mxu1 %v1998_v33 }
  0x5c   : > { %1898 = vmatmul.mubr.bf16.gmra.mxu0 %v1999_v34  ;;  %1934 = vmatmul.mubr.bf16.gmra.mxu1 %v2000_v35 }
  0x5d   : > { %1901 = vmatprep.mubr.bf16.mxu0 %v2001_v36  ;;  %1937 = vmatprep.mubr.bf16.mxu1 %v2002_v37 }
  0x64   : > { %1902 = vmatmul.mubr.bf16.gmra.mxu0 %v2003_v38  ;;  %1938 = vmatmul.mubr.bf16.gmra.mxu1 %v2004_v39 }
  0x65   : > { %1905 = vmatprep.mubr.bf16.mxu0 %v2005_v40 }
  0x6c   : > { %1906 = vmatmul.mubr.bf16.gmra.mxu0 %v2006_v41 }
  0xec   : > { %v1875_v49 = vpop.f32.mrf.mxu0  ;;  %v1911_v50 = vpop.f32.mrf.mxu1 }
  0xed   : > { %v559_v51 = vadd.f32 %v1875_v49, %v2114_v47  ;;  %v703_v52 = vadd.f32 %v1911_v50, %v2114_v47 }
  0xee   : > { %v550_v53 = vpop.f32.mrf.mxu0  ;;  %v694_v54 = vpop.f32.mrf.mxu1 }
  0xef   : > { %vm823_vm0 = vcmp.gt.f32.partialorder %v559_v51, 0.0  ;;  %v895_v55 = vmul.f32 %v2116_v48, %v559_v51  ;;  %vm859_vm1 = vcmp.gt.f32.partialorder %v703_v52, 0.0  ;;  %v931_v56 = vmul.f32 %v2116_v48, %v703_v52 }
  0xf0   : > { %v551_v57 = vadd.f32 %v550_v53, %v2114_v47  ;;  %v695_v58 = vadd.f32 %v694_v54, %v2114_v47  ;;  %v1876_v59 = vpop.f32.mrf.mxu0  ;;  %v1912_v60 = vpop.f32.mrf.mxu1 }
  0xf1   : > { %v963_v61 = vsel %vm823_vm0, %v559_v51, %v895_v55  ;;  %v562_v62 = vadd.f32 %v1876_v59, %v2114_v47  ;;  %v706_v63 = vadd.f32 %v1912_v60, %v2114_v47  ;;  %v999_v0 = vsel %vm859_vm1, %v703_v52, %v931_v56 }
  0xf2   : > { %vm821_vm2 = vcmp.gt.f32.partialorder %v551_v57, 0.0  ;;  %vm857_vm3 = vcmp.gt.f32.partialorder %v695_v58, 0.0  ;;  %v929_v1 = vmul.f32 %v2116_v48, %v695_v58  ;;  %v553_v2 = vpop.f32.mrf.mxu0  ;;  %v697_v3 = vpop.f32.mrf.mxu1  ;;  %v893_v6 = vmul.f32 %v2116_v48, %v551_v57 }
  0xf3   : > { %vm824_vm4 = vcmp.gt.f32.partialorder %v562_v62, 0.0  ;;  %v896_v4 = vmul.f32 %v2116_v48, %v562_v62  ;;  %vm860_vm5 = vcmp.gt.f32.partialorder %v706_v63, 0.0  ;;  %v932_v5 = vmul.f32 %v2116_v48, %v706_v63 }
  0xf4   : > { %v997_v7 = vsel %vm857_vm3, %v695_v58, %v929_v1  ;;  %v554_v8 = vadd.f32 %v553_v2, %v2114_v47  ;;  %v698_v9 = vadd.f32 %v697_v3, %v2114_v47  ;;  %v1879_v10 = vpop.f32.mrf.mxu0  ;;  %v1915_v11 = vpop.f32.mrf.mxu1  ;;  %v961_v23 = vsel %vm821_vm2, %v551_v57, %v893_v6 }
  0xf5   : > { %v964_v12 = vsel %vm824_vm4, %v562_v62, %v896_v4  ;;  %v1000_v13 = vsel %vm860_vm5, %v706_v63, %v932_v5  ;;  %v575_v14 = vadd.f32 %v1879_v10, %v2114_v47  ;;  %v719_v15 = vadd.f32 %v1915_v11, %v2114_v47 }
  0xf6   : > { %v1620_v16 = vpack.c.bf16 %v964_v12, %v963_v61  ;;  %v1710_v17 = vpack.c.bf16 %v1000_v13, %v999_v0  ;;  %vm822_vm6 = vcmp.gt.f32.partialorder %v554_v8, 0.0  ;;  %v894_v18 = vmul.f32 %v2116_v48, %v554_v8  ;;  %v566_v19 = vpop.f32.mrf.mxu0  ;;  %v710_v20 = vpop.f32.mrf.mxu1 }
  0xf7   : > { %vm858_vm7 = vcmp.gt.f32.partialorder %v698_v9, 0.0  ;;  %v930_v21 = vmul.f32 %v2116_v48, %v698_v9  ;;  %vm827_vm8 = vcmp.gt.f32.partialorder %v575_v14, 0.0  ;;  %v899_v22 = vmul.f32 %v2116_v48, %v575_v14 }
  0xf8   : > { %1782 = vst [vmem:[%s2137_s13 + $0x8] sm:$0xff] %v1620_v16   ;;  %1800 = vst [vmem:[%s2137_s13 + $0x98] sm:$0xff] %v1710_v17   ;;  %v962_v24 = vsel %vm822_vm6, %v554_v8, %v894_v18  ;;  %v935_v25 = vmul.f32 %v2116_v48, %v719_v15  ;;  %v567_v26 = vadd.f32 %v566_v19, %v2114_v47  ;;  %v1880_v27 = vpop.f32.mrf.mxu0  ;;  %v1916_v28 = vpop.f32.mrf.mxu1  ;;  %vm863_vm9 = vcmp.gt.f32.partialorder %v719_v15, 0.0 }
  0xf9   : > { %v1615_v29 = vpack.c.bf16 %v962_v24, %v961_v23  ;;  %v998_v30 = vsel %vm858_vm7, %v698_v9, %v930_v21  ;;  %v711_v31 = vadd.f32 %v710_v20, %v2114_v47  ;;  %v967_v33 = vsel %vm827_vm8, %v575_v14, %v899_v22 }
  0xfa   : > { %v1705_v32 = vpack.c.bf16 %v998_v30, %v997_v7  ;;  %vm825_vm10 = vcmp.gt.f32.partialorder %v567_v26, 0.0  ;;  %v897_v34 = vmul.f32 %v2116_v48, %v567_v26  ;;  %v569_v35 = vpop.f32.mrf.mxu0  ;;  %v713_v36 = vpop.f32.mrf.mxu1  ;;  %v578_v38 = vadd.f32 %v1880_v27, %v2114_v47 }
  0xfb   : > { %1616 = vst [vmem:[%s2137_s13] sm:$0xff] %v1615_v29   ;;  %vm861_vm11 = vcmp.gt.f32.partialorder %v711_v31, 0.0  ;;  %v933_v37 = vmul.f32 %v2116_v48, %v711_v31  ;;  %v722_v39 = vadd.f32 %v1916_v28, %v2114_v47  ;;  %v1003_v40 = vsel %vm863_vm9, %v719_v15, %v935_v25 }
  0xfc   : > { %1799 = vst [vmem:[%s2137_s13 + $0x90] sm:$0xff] %v1705_v32   ;;  %v965_v41 = vsel %vm825_vm10, %v567_v26, %v897_v34  ;;  %v570_v42 = vadd.f32 %v569_v35, %v2114_v47  ;;  %v714_v43 = vadd.f32 %v713_v36, %v2114_v47  ;;  %v1883_v44 = vpop.f32.mrf.mxu0  ;;  %v1919_v45 = vpop.f32.mrf.mxu1  ;;  %vm828_vm12 = vcmp.gt.f32.partialorder %v578_v38, 0.0 }
  0xfd   : > { %v1001_v46 = vsel %vm861_vm11, %v711_v31, %v933_v37  ;;  %v900_v49 = vmul.f32 %v2116_v48, %v578_v38  ;;  %vm864_vm13 = vcmp.gt.f32.partialorder %v722_v39, 0.0  ;;  %v936_v50 = vmul.f32 %v2116_v48, %v722_v39 }
  0xfe   : > { %vm826_vm14 = vcmp.gt.f32.partialorder %v570_v42, 0.0  ;;  %v898_v51 = vmul.f32 %v2116_v48, %v570_v42  ;;  %vm862_vm15 = vcmp.gt.f32.partialorder %v714_v43, 0.0  ;;  %v582_v52 = vpop.f32.mrf.mxu0  ;;  %v726_v53 = vpop.f32.mrf.mxu1  ;;  %v934_v55 = vmul.f32 %v2116_v48, %v714_v43 }
  0xff   : > { %v968_v54 = vsel %vm828_vm12, %v578_v38, %v900_v49  ;;  %v591_v56 = vadd.f32 %v1883_v44, %v2114_v47  ;;  %v735_v57 = vadd.f32 %v1919_v45, %v2114_v47  ;;  %v1004_v59 = vsel %vm864_vm13, %v722_v39, %v936_v50 }
 0x100   : > { %v1630_v58 = vpack.c.bf16 %v968_v54, %v967_v33  ;;  %v966_v60 = vsel %vm826_vm14, %v570_v42, %v898_v51  ;;  %v583_v61 = vadd.f32 %v582_v52, %v2114_v47  ;;  %v1884_v62 = vpop.f32.mrf.mxu0  ;;  %v1920_v63 = vpop.f32.mrf.mxu1  ;;  %v1720_v0 = vpack.c.bf16 %v1004_v59, %v1003_v40 }
 0x101   : > { %v1625_v1 = vpack.c.bf16 %v966_v60, %v965_v41  ;;  %v1002_v2 = vsel %vm862_vm15, %v714_v43, %v934_v55  ;;  %vm831_vm0 = vcmp.gt.f32.partialorder %v591_v56, 0.0  ;;  %v903_v4 = vmul.f32 %v2116_v48, %v591_v56 }
 0x102   : > { %1784 = vst [vmem:[%s2137_s13 + $0x18] sm:$0xff] %v1630_v58   ;;  %v1715_v3 = vpack.c.bf16 %v1002_v2, %v1001_v46  ;;  %vm867_vm1 = vcmp.gt.f32.partialorder %v735_v57, 0.0  ;;  %v939_v5 = vmul.f32 %v2116_v48, %v735_v57  ;;  %v585_v6 = vpop.f32.mrf.mxu0  ;;  %v729_v7 = vpop.f32.mrf.mxu1  ;;  %1802 = vst [vmem:[%s2137_s13 + $0xa8] sm:$0xff] %v1720_v0   ;;  %vm829_vm2 = vcmp.gt.f32.partialorder %v583_v61, 0.0 }
 0x103   : > { %1783 = vst [vmem:[%s2137_s13 + $0x10] sm:$0xff] %v1625_v1   ;;  %v901_v8 = vmul.f32 %v2116_v48, %v583_v61  ;;  %v727_v9 = vadd.f32 %v726_v53, %v2114_v47  ;;  %v594_v10 = vadd.f32 %v1884_v62, %v2114_v47  ;;  %v971_v11 = vsel %vm831_vm0, %v591_v56, %v903_v4 }
 0x104   : > { %1801 = vst [vmem:[%s2137_s13 + $0xa0] sm:$0xff] %v1715_v3   ;;  %v1007_v12 = vsel %vm867_vm1, %v735_v57, %v939_v5  ;;  %v738_v13 = vadd.f32 %v1920_v63, %v2114_v47  ;;  %v586_v14 = vadd.f32 %v585_v6, %v2114_v47  ;;  %v1887_v15 = vpop.f32.mrf.mxu0  ;;  %v1923_v16 = vpop.f32.mrf.mxu1  ;;  %v730_v25 = vadd.f32 %v729_v7, %v2114_v47 }
 0x105   : > { %v969_v17 = vsel %vm829_vm2, %v583_v61, %v901_v8  ;;  %vm865_vm3 = vcmp.gt.f32.partialorder %v727_v9, 0.0  ;;  %v937_v18 = vmul.f32 %v2116_v48, %v727_v9  ;;  %vm832_vm4 = vcmp.gt.f32.partialorder %v594_v10, 0.0 }
 0x106   : > { %v904_v19 = vmul.f32 %v2116_v48, %v594_v10  ;;  %vm868_vm5 = vcmp.gt.f32.partialorder %v738_v13, 0.0  ;;  %v940_v20 = vmul.f32 %v2116_v48, %v738_v13  ;;  %vm830_vm6 = vcmp.gt.f32.partialorder %v586_v14, 0.0  ;;  %v598_v21 = vpop.f32.mrf.mxu0  ;;  %v742_v22 = vpop.f32.mrf.mxu1 }
 0x107   : > { %v1005_v23 = vsel %vm865_vm3, %v727_v9, %v937_v18  ;;  %v902_v24 = vmul.f32 %v2116_v48, %v586_v14  ;;  %v607_v26 = vadd.f32 %v1887_v15, %v2114_v47  ;;  %v751_v29 = vadd.f32 %v1923_v16, %v2114_v47 }
 0x108   : > { %v972_v27 = vsel %vm832_vm4, %v594_v10, %v904_v19  ;;  %v1008_v28 = vsel %vm868_vm5, %v738_v13, %v940_v20  ;;  %v599_v30 = vadd.f32 %v598_v21, %v2114_v47  ;;  %v1888_v31 = vpop.f32.mrf.mxu0  ;;  %v1924_v32 = vpop.f32.mrf.mxu1  ;;  %vm866_vm7 = vcmp.gt.f32.partialorder %v730_v25, 0.0 }
 0x109   : > { %v1640_v33 = vpack.c.bf16 %v972_v27, %v971_v11  ;;  %v1730_v34 = vpack.c.bf16 %v1008_v28, %v1007_v12  ;;  %v970_v35 = vsel %vm830_vm6, %v586_v14, %v902_v24  ;;  %v938_v37 = vmul.f32 %v2116_v48, %v730_v25 }
 0x10a   : > { %v1635_v36 = vpack.c.bf16 %v970_v35, %v969_v17  ;;  %vm835_vm8 = vcmp.gt.f32.partialorder %v607_v26, 0.0  ;;  %v907_v38 = vmul.f32 %v2116_v48, %v607_v26  ;;  %v601_v39 = vpop.f32.mrf.mxu0  ;;  %v745_v40 = vpop.f32.mrf.mxu1  ;;  %vm871_vm9 = vcmp.gt.f32.partialorder %v751_v29, 0.0 }
 0x10b   : > { %1786 = vst [vmem:[%s2137_s13 + $0x28] sm:$0xff] %v1640_v33   ;;  %1804 = vst [vmem:[%s2137_s13 + $0xb8] sm:$0xff] %v1730_v34   ;;  %v943_v41 = vmul.f32 %v2116_v48, %v751_v29  ;;  %vm833_vm10 = vcmp.gt.f32.partialorder %v599_v30, 0.0  ;;  %v905_v42 = vmul.f32 %v2116_v48, %v599_v30  ;;  %v1006_v43 = vsel %vm866_vm7, %v730_v25, %v938_v37 }
 0x10c   : > { %1785 = vst [vmem:[%s2137_s13 + $0x20] sm:$0xff] %v1635_v36   ;;  %v975_v44 = vsel %vm835_vm8, %v607_v26, %v907_v38  ;;  %v743_v45 = vadd.f32 %v742_v22, %v2114_v47  ;;  %v610_v46 = vadd.f32 %v1888_v31, %v2114_v47  ;;  %v1891_v49 = vpop.f32.mrf.mxu0  ;;  %v1927_v50 = vpop.f32.mrf.mxu1  ;;  %v1725_v51 = vpack.c.bf16 %v1006_v43, %v1005_v23 }
 0x10d   : > { %v1011_v52 = vsel %vm871_vm9, %v751_v29, %v943_v41  ;;  %v973_v53 = vsel %vm833_vm10, %v599_v30, %v905_v42  ;;  %v754_v54 = vadd.f32 %v1924_v32, %v2114_v47  ;;  %v602_v60 = vadd.f32 %v601_v39, %v2114_v47 }
 0x10e   : > { %vm869_vm11 = vcmp.gt.f32.partialorder %v743_v45, 0.0  ;;  %v941_v55 = vmul.f32 %v2116_v48, %v743_v45  ;;  %vm836_vm12 = vcmp.gt.f32.partialorder %v610_v46, 0.0  ;;  %v908_v56 = vmul.f32 %v2116_v48, %v610_v46  ;;  %v614_v57 = vpop.f32.mrf.mxu0  ;;  %v758_v58 = vpop.f32.mrf.mxu1  ;;  %1803 = vst [vmem:[%s2137_s13 + $0xb0] sm:$0xff] %v1725_v51  }
 0x10f   : > { %vm872_vm13 = vcmp.gt.f32.partialorder %v754_v54, 0.0  ;;  %v944_v59 = vmul.f32 %v2116_v48, %v754_v54  ;;  %v746_v61 = vadd.f32 %v745_v40, %v2114_v47  ;;  %v623_v0 = vadd.f32 %v1891_v49, %v2114_v47 }
 0x110   : > { %v1009_v62 = vsel %vm869_vm11, %v743_v45, %v941_v55  ;;  %v976_v63 = vsel %vm836_vm12, %v610_v46, %v908_v56  ;;  %v767_v1 = vadd.f32 %v1927_v50, %v2114_v47  ;;  %v1892_v2 = vpop.f32.mrf.mxu0  ;;  %v1928_v3 = vpop.f32.mrf.mxu1  ;;  %vm834_vm14 = vcmp.gt.f32.partialorder %v602_v60, 0.0 }
 0x111   : > { %v1650_v4 = vpack.c.bf16 %v976_v63, %v975_v44  ;;  %v1012_v5 = vsel %vm872_vm13, %v754_v54, %v944_v59  ;;  %v906_v6 = vmul.f32 %v2116_v48, %v602_v60  ;;  %vm870_vm15 = vcmp.gt.f32.partialorder %v746_v61, 0.0 }
 0x112   : > { %v1740_v7 = vpack.c.bf16 %v1012_v5, %v1011_v52  ;;  %v942_v8 = vmul.f32 %v2116_v48, %v746_v61  ;;  %vm839_vm0 = vcmp.gt.f32.partialorder %v623_v0, 0.0  ;;  %v617_v9 = vpop.f32.mrf.mxu0  ;;  %v761_v10 = vpop.f32.mrf.mxu1  ;;  %v911_v12 = vmul.f32 %v2116_v48, %v623_v0 }
 0x113   : > { %1788 = vst [vmem:[%s2137_s13 + $0x38] sm:$0xff] %v1650_v4   ;;  %v974_v11 = vsel %vm834_vm14, %v602_v60, %v906_v6  ;;  %vm875_vm1 = vcmp.gt.f32.partialorder %v767_v1, 0.0  ;;  %v947_v13 = vmul.f32 %v2116_v48, %v767_v1  ;;  %v615_v16 = vadd.f32 %v614_v57, %v2114_v47 }
 0x114   : > { %1806 = vst [vmem:[%s2137_s13 + $0xc8] sm:$0xff] %v1740_v7   ;;  %v1645_v14 = vpack.c.bf16 %v974_v11, %v973_v53  ;;  %v1010_v15 = vsel %vm870_vm15, %v746_v61, %v942_v8  ;;  %v759_v17 = vadd.f32 %v758_v58, %v2114_v47  ;;  %v1895_v18 = vpop.f32.mrf.mxu0  ;;  %v1931_v19 = vpop.f32.mrf.mxu1  ;;  %v979_v21 = vsel %vm839_vm0, %v623_v0, %v911_v12 }
 0x115   : > { %v1735_v20 = vpack.c.bf16 %v1010_v15, %v1009_v62  ;;  %v1015_v22 = vsel %vm875_vm1, %v767_v1, %v947_v13  ;;  %v626_v23 = vadd.f32 %v1892_v2, %v2114_v47  ;;  %vm837_vm2 = vcmp.gt.f32.partialorder %v615_v16, 0.0 }
 0x116   : > { %1787 = vst [vmem:[%s2137_s13 + $0x30] sm:$0xff] %v1645_v14   ;;  %v909_v24 = vmul.f32 %v2116_v48, %v615_v16  ;;  %vm873_vm3 = vcmp.gt.f32.partialorder %v759_v17, 0.0  ;;  %v945_v25 = vmul.f32 %v2116_v48, %v759_v17  ;;  %v630_v26 = vpop.f32.mrf.mxu0  ;;  %v774_v27 = vpop.f32.mrf.mxu1  ;;  %v770_v29 = vadd.f32 %v1928_v3, %v2114_v47 }
 0x117   : > { %1805 = vst [vmem:[%s2137_s13 + $0xc0] sm:$0xff] %v1735_v20   ;;  %vm840_vm4 = vcmp.gt.f32.partialorder %v626_v23, 0.0  ;;  %v912_v28 = vmul.f32 %v2116_v48, %v626_v23  ;;  %v618_v30 = vadd.f32 %v617_v9, %v2114_v47  ;;  %v762_v33 = vadd.f32 %v761_v10, %v2114_v47 }
 0x118   : > { %v977_v31 = vsel %vm837_vm2, %v615_v16, %v909_v24  ;;  %v1013_v32 = vsel %vm873_vm3, %v759_v17, %v945_v25  ;;  %v639_v34 = vadd.f32 %v1895_v18, %v2114_v47  ;;  %v1896_v35 = vpop.f32.mrf.mxu0  ;;  %v1932_v36 = vpop.f32.mrf.mxu1  ;;  %vm876_vm5 = vcmp.gt.f32.partialorder %v770_v29, 0.0 }
 0x119   : > { %v980_v37 = vsel %vm840_vm4, %v626_v23, %v912_v28  ;;  %v948_v38 = vmul.f32 %v2116_v48, %v770_v29  ;;  %vm838_vm6 = vcmp.gt.f32.partialorder %v618_v30, 0.0  ;;  %v910_v40 = vmul.f32 %v2116_v48, %v618_v30 }
 0x11a   : > { %v1660_v39 = vpack.c.bf16 %v980_v37, %v979_v21  ;;  %vm874_vm7 = vcmp.gt.f32.partialorder %v762_v33, 0.0  ;;  %v946_v41 = vmul.f32 %v2116_v48, %v762_v33  ;;  %v633_v42 = vpop.f32.mrf.mxu0  ;;  %v777_v43 = vpop.f32.mrf.mxu1  ;;  %vm843_vm8 = vcmp.gt.f32.partialorder %v639_v34, 0.0 }
 0x11b   : > { %v1016_v44 = vsel %vm876_vm5, %v770_v29, %v948_v38  ;;  %v915_v45 = vmul.f32 %v2116_v48, %v639_v34  ;;  %v783_v46 = vadd.f32 %v1931_v19, %v2114_v47  ;;  %v978_v50 = vsel %vm838_vm6, %v618_v30, %v910_v40 }
 0x11c   : > { %1790 = vst [vmem:[%s2137_s13 + $0x48] sm:$0xff] %v1660_v39   ;;  %v1750_v49 = vpack.c.bf16 %v1016_v44, %v1015_v22  ;;  %v1014_v51 = vsel %vm874_vm7, %v762_v33, %v946_v41  ;;  %v631_v52 = vadd.f32 %v630_v26, %v2114_v47  ;;  %v1899_v53 = vpop.f32.mrf.mxu0  ;;  %v1935_v54 = vpop.f32.mrf.mxu1  ;;  %v1655_v55 = vpack.c.bf16 %v978_v50, %v977_v31 }
 0x11d   : > { %v1745_v56 = vpack.c.bf16 %v1014_v51, %v1013_v32  ;;  %v983_v57 = vsel %vm843_vm8, %v639_v34, %v915_v45  ;;  %vm879_vm9 = vcmp.gt.f32.partialorder %v783_v46, 0.0  ;;  %v951_v58 = vmul.f32 %v2116_v48, %v783_v46 }
 0x11e   : > { %1808 = vst [vmem:[%s2137_s13 + $0xd8] sm:$0xff] %v1750_v49   ;;  %vm841_vm10 = vcmp.gt.f32.partialorder %v631_v52, 0.0  ;;  %v913_v59 = vmul.f32 %v2116_v48, %v631_v52  ;;  %v775_v60 = vadd.f32 %v774_v27, %v2114_v47  ;;  %v646_v61 = vpop.f32.mrf.mxu0  ;;  %v790_v62 = vpop.f32.mrf.mxu1  ;;  %1789 = vst [vmem:[%s2137_s13 + $0x40] sm:$0xff] %v1655_v55   ;;  %v642_v63 = vadd.f32 %v1896_v35, %v2114_v47 }
 0x11f   : > { %1807 = vst [vmem:[%s2137_s13 + $0xd0] sm:$0xff] %v1745_v56   ;;  %v786_v0 = vadd.f32 %v1932_v36, %v2114_v47  ;;  %v634_v1 = vadd.f32 %v633_v42, %v2114_v47  ;;  %v778_v2 = vadd.f32 %v777_v43, %v2114_v47  ;;  %v1019_v3 = vsel %vm879_vm9, %v783_v46, %v951_v58 }
 0x120   : > { %v981_v4 = vsel %vm841_vm10, %v631_v52, %v913_v59  ;;  %vm877_vm11 = vcmp.gt.f32.partialorder %v775_v60, 0.0  ;;  %v949_v5 = vmul.f32 %v2116_v48, %v775_v60  ;;  %v1900_v6 = vpop.f32.mrf.mxu0  ;;  %v1936_v7 = vpop.f32.mrf.mxu1  ;;  %vm844_vm12 = vcmp.gt.f32.partialorder %v642_v63, 0.0 }
 0x121   : > { %v916_v8 = vmul.f32 %v2116_v48, %v642_v63  ;;  %vm880_vm13 = vcmp.gt.f32.partialorder %v786_v0, 0.0  ;;  %v952_v9 = vmul.f32 %v2116_v48, %v786_v0  ;;  %vm842_vm14 = vcmp.gt.f32.partialorder %v634_v1, 0.0 }
 0x122   : > { %v1017_v10 = vsel %vm877_vm11, %v775_v60, %v949_v5  ;;  %v914_v11 = vmul.f32 %v2116_v48, %v634_v1  ;;  %vm878_vm15 = vcmp.gt.f32.partialorder %v778_v2, 0.0  ;;  %v649_v12 = vpop.f32.mrf.mxu0  ;;  %v793_v13 = vpop.f32.mrf.mxu1  ;;  %v950_v16 = vmul.f32 %v2116_v48, %v778_v2 }
 0x123   : > { %v984_v14 = vsel %vm844_vm12, %v642_v63, %v916_v8  ;;  %v1020_v15 = vsel %vm880_vm13, %v786_v0, %v952_v9  ;;  %v655_v17 = vadd.f32 %v1899_v53, %v2114_v47  ;;  %v799_v21 = vadd.f32 %v1935_v54, %v2114_v47 }
 0x124   : > { %v1670_v18 = vpack.c.bf16 %v984_v14, %v983_v57  ;;  %v1760_v19 = vpack.c.bf16 %v1020_v15, %v1019_v3  ;;  %v982_v20 = vsel %vm842_vm14, %v634_v1, %v914_v11  ;;  %v1903_v22 = vpop.f32.mrf.mxu0  ;;  %v1939_v23 = vpop.f32.mrf.mxu1  ;;  %v1018_v25 = vsel %vm878_vm15, %v778_v2, %v950_v16 }
 0x125   : > { %v1665_v24 = vpack.c.bf16 %v982_v20, %v981_v4  ;;  %vm847_vm0 = vcmp.gt.f32.partialorder %v655_v17, 0.0  ;;  %v919_v26 = vmul.f32 %v2116_v48, %v655_v17  ;;  %v1755_v27 = vpack.c.bf16 %v1018_v25, %v1017_v10 }
 0x126   : > { %1792 = vst [vmem:[%s2137_s13 + $0x58] sm:$0xff] %v1670_v18   ;;  %1810 = vst [vmem:[%s2137_s13 + $0xe8] sm:$0xff] %v1760_v19   ;;  %vm883_vm1 = vcmp.gt.f32.partialorder %v799_v21, 0.0  ;;  %v955_v28 = vmul.f32 %v2116_v48, %v799_v21  ;;  %v647_v29 = vadd.f32 %v646_v61, %v2114_v47  ;;  %v662_v30 = vpop.f32.mrf.mxu0  ;;  %v791_v32 = vadd.f32 %v790_v62, %v2114_v47  ;;  %v806_v38 = vpop.f32.mrf.mxu1 }
 0x127   : > { %1791 = vst [vmem:[%s2137_s13 + $0x50] sm:$0xff] %v1665_v24   ;;  %v987_v31 = vsel %vm847_vm0, %v655_v17, %v919_v26  ;;  %v658_v33 = vadd.f32 %v1900_v6, %v2114_v47  ;;  %v802_v34 = vadd.f32 %v1936_v7, %v2114_v47  ;;  %1809 = vst [vmem:[%s2137_s13 + $0xe0] sm:$0xff] %v1755_v27  }
 0x128   : > { %v1023_v35 = vsel %vm883_vm1, %v799_v21, %v955_v28  ;;  %vm845_vm2 = vcmp.gt.f32.partialorder %v647_v29, 0.0  ;;  %v917_v36 = vmul.f32 %v2116_v48, %v647_v29  ;;  %v650_v37 = vadd.f32 %v649_v12, %v2114_v47  ;;  %v1904_v39 = vpop.f32.mrf.mxu0  ;;  %v1940_v55 = vpop.f32.mrf.mxu1 }
 0x129   : > { %vm881_vm3 = vcmp.gt.f32.partialorder %v791_v32, 0.0  ;;  %v953_v40 = vmul.f32 %v2116_v48, %v791_v32  ;;  %vm848_vm4 = vcmp.gt.f32.partialorder %v658_v33, 0.0  ;;  %v920_v41 = vmul.f32 %v2116_v48, %v658_v33 }
 0x12a   : > { %v985_v42 = vsel %vm845_vm2, %v647_v29, %v917_v36  ;;  %vm884_vm5 = vcmp.gt.f32.partialorder %v802_v34, 0.0  ;;  %v956_v43 = vmul.f32 %v2116_v48, %v802_v34  ;;  %vm846_vm6 = vcmp.gt.f32.partialorder %v650_v37, 0.0  ;;  %v665_v44 = vpop.f32.mrf.mxu0  ;;  %v809_v6 = vpop.f32.mrf.mxu1 }
 0x12b   : > { %v1021_v45 = vsel %vm881_vm3, %v791_v32, %v953_v40  ;;  %v988_v46 = vsel %vm848_vm4, %v658_v33, %v920_v41  ;;  %v918_v49 = vmul.f32 %v2116_v48, %v650_v37  ;;  %v794_v50 = vadd.f32 %v793_v13, %v2114_v47 }
 0x12c   : > { %v1680_v51 = vpack.c.bf16 %v988_v46, %v987_v31  ;;  %v1024_v52 = vsel %vm884_vm5, %v802_v34, %v956_v43  ;;  %v671_v53 = vadd.f32 %v1903_v22, %v2114_v47  ;;  %v815_v54 = vadd.f32 %v1939_v23, %v2114_v47  ;;  %v1907_v56 = vpop.f32.mrf.mxu0 }
 0x12d   : > { %v1770_v57 = vpack.c.bf16 %v1024_v52, %v1023_v35  ;;  %v986_v58 = vsel %vm846_vm6, %v650_v37, %v918_v49  ;;  %vm882_vm7 = vcmp.gt.f32.partialorder %v794_v50, 0.0  ;;  %v954_v59 = vmul.f32 %v2116_v48, %v794_v50 }
 0x12e   : > { %1794 = vst [vmem:[%s2137_s13 + $0x68] sm:$0xff] %v1680_v51   ;;  %v1675_v60 = vpack.c.bf16 %v986_v58, %v985_v42  ;;  %vm851_vm8 = vcmp.gt.f32.partialorder %v671_v53, 0.0  ;;  %v923_v61 = vmul.f32 %v2116_v48, %v671_v53  ;;  %vm887_vm9 = vcmp.gt.f32.partialorder %v815_v54, 0.0  ;;  %v678_v62 = vpop.f32.mrf.mxu0 }
 0x12f   : > { %1812 = vst [vmem:[%s2137_s13 + $0xf8] sm:$0xff] %v1770_v57   ;;  %v1022_v63 = vsel %vm882_vm7, %v794_v50, %v954_v59  ;;  %v959_v0 = vmul.f32 %v2116_v48, %v815_v54  ;;  %v663_v1 = vadd.f32 %v662_v30, %v2114_v47  ;;  %v807_v2 = vadd.f32 %v806_v38, %v2114_v47 }
 0x130   : > { %1793 = vst [vmem:[%s2137_s13 + $0x60] sm:$0xff] %v1675_v60   ;;  %v1765_v3 = vpack.c.bf16 %v1022_v63, %v1021_v45  ;;  %v674_v4 = vadd.f32 %v1904_v39, %v2114_v47  ;;  %v818_v5 = vadd.f32 %v1940_v55, %v2114_v47  ;;  %v991_v7 = vsel %vm851_vm8, %v671_v53, %v923_v61  ;;  %v1908_v10 = vpop.f32.mrf.mxu0 }
 0x131   : > { %v1027_v8 = vsel %vm887_vm9, %v815_v54, %v959_v0  ;;  %v921_v9 = vmul.f32 %v2116_v48, %v663_v1  ;;  %v957_v11 = vmul.f32 %v2116_v48, %v807_v2  ;;  %vm885_vm12 = vcmp.gt.f32.partialorder %v807_v2, 0.0 }
 0x132   : > { %1811 = vst [vmem:[%s2137_s13 + $0xf0] sm:$0xff] %v1765_v3   ;;  %vm852_vm10 = vcmp.gt.f32.partialorder %v674_v4, 0.0  ;;  %v924_v12 = vmul.f32 %v2116_v48, %v674_v4  ;;  %vm888_vm11 = vcmp.gt.f32.partialorder %v818_v5, 0.0  ;;  %v960_v13 = vmul.f32 %v2116_v48, %v818_v5  ;;  %v681_v22 = vpop.f32.mrf.mxu0 }
 0x133   : > { %v666_v14 = vadd.f32 %v665_v44, %v2114_v47  ;;  %v810_v15 = vadd.f32 %v809_v6, %v2114_v47  ;;  %vm849_vm13 = vcmp.gt.f32.partialorder %v663_v1, 0.0  ;;  %v687_v17 = vadd.f32 %v1907_v56, %v2114_v47 }
 0x134   : > { %v992_v16 = vsel %vm852_vm10, %v674_v4, %v924_v12  ;;  %v679_v18 = vadd.f32 %v678_v62, %v2114_v47  ;;  %v1028_v20 = vsel %vm888_vm11, %v818_v5, %v960_v13  ;;  %v1025_v23 = vsel %vm885_vm12, %v807_v2, %v957_v11 }
 0x135   : > { %v1690_v19 = vpack.c.bf16 %v992_v16, %v991_v7  ;;  %vm850_vm14 = vcmp.gt.f32.partialorder %v666_v14, 0.0  ;;  %v922_v21 = vmul.f32 %v2116_v48, %v666_v14  ;;  %v1780_v24 = vpack.c.bf16 %v1028_v20, %v1027_v8 }
 0x136   : > { %vm886_vm15 = vcmp.gt.f32.partialorder %v810_v15, 0.0  ;;  %v958_v25 = vmul.f32 %v2116_v48, %v810_v15  ;;  %v989_v26 = vsel %vm849_vm13, %v663_v1, %v921_v9  ;;  %v927_v28 = vmul.f32 %v2116_v48, %v687_v17 }
 0x137   : > { %1796 = vst [vmem:[%s2137_s13 + $0x78] sm:$0xff] %v1690_v19   ;;  %v990_v27 = vsel %vm850_vm14, %v666_v14, %v922_v21  ;;  %v925_v29 = vmul.f32 %v2116_v48, %v679_v18  ;;  %1814 = vst [vmem:[%s2137_s13 + $0x108] sm:$0xff] %v1780_v24   ;;  %v690_v32 = vadd.f32 %v1908_v10, %v2114_v47  ;;  %vm855_vm0 = vcmp.gt.f32.partialorder %v687_v17, 0.0 }
 0x138   : > { %v1685_v30 = vpack.c.bf16 %v990_v27, %v989_v26  ;;  %v1026_v31 = vsel %vm886_vm15, %v810_v15, %v958_v25  ;;  %v682_v33 = vadd.f32 %v681_v22, %v2114_v47  ;;  %vm853_vm1 = vcmp.gt.f32.partialorder %v679_v18, 0.0 }
 0x139   : > { %v1775_v34 = vpack.c.bf16 %v1026_v31, %v1025_v23  ;;  %vm856_vm2 = vcmp.gt.f32.partialorder %v690_v32, 0.0  ;;  %v928_v35 = vmul.f32 %v2116_v48, %v690_v32  ;;  %v995_v37 = vsel %vm855_vm0, %v687_v17, %v927_v28 }
 0x13a   : > { %1795 = vst [vmem:[%s2137_s13 + $0x70] sm:$0xff] %v1685_v30   ;;  %vm854_vm3 = vcmp.gt.f32.partialorder %v682_v33, 0.0  ;;  %v926_v36 = vmul.f32 %v2116_v48, %v682_v33  ;;  %v993_v38 = vsel %vm853_vm1, %v679_v18, %v925_v29 }
 0x13b   : > { %1813 = vst [vmem:[%s2137_s13 + $0x100] sm:$0xff] %v1775_v34   ;;  %v996_v39 = vsel %vm856_vm2, %v690_v32, %v928_v35 }
 0x13c   : > { %v994_v40 = vsel %vm854_vm3, %v682_v33, %v926_v36  ;;  %v1700_v41 = vpack.c.bf16 %v996_v39, %v995_v37 }
 0x13d   : > { %v1695_v42 = vpack.c.bf16 %v994_v40, %v993_v38 }
 0x13e   : > { %1798 = vst [vmem:[%s2137_s13 + $0x88] sm:$0xff] %v1700_v41  }
 0x13f   : > { %1797 = vst [vmem:[%s2137_s13 + $0x80] sm:$0xff] %v1695_v42  }
 0x140 PF: > { %s13_s12 = sadd.s32 1, %s2013_s12  }
 0x141   : > { %p10_p4 = scmp.ge.s32.totalorder %s13_s12, 4  }
 0x143   :  { %12 = sbr.rel (!%p10_p4) target bundleno = 1 (0x1), region = 62 }

// kernel: onet_forward.5
= control target key start
LH: loop header
LB: loop body
LE: loop exit
PB: predicated region body
PF: predicated region fallthrough
CT: control target
= control target key end

     0   :  { %s2368_s12 = smov 0   ;;  %s2750_s0 = inlined_call_operand.vmem [shape: bf16[448,576], index: 0, kind: input, shape index: {}]   ;;  %s2751_s1 = inlined_call_operand.vmem [shape: bf16[576,128], index: 1, kind: input, shape index: {}]   ;;  %s2752_s2 = inlined_call_operand.vmem [shape: f32[2,128], index: 2, kind: input, shape index: {}]   ;;  %s2753_s3 = inlined_call_operand.vmem [shape: bf16[448,128], index: 3, kind: output, shape index: {}]  }
   0x1 LB: > { %s1667_s13 = sadd.s32 4294967295, %s2346_s12   ;;  %p1671_p0 = scmp.ge.s32.totalorder %s2346_s12, 1  ;;  %s2346_s12 = sphi %s2368_s12, %s13_s12  }
   0x2   : > { %p139_p1 = scmp.lt.s32.totalorder %s2346_s12, 3 }
   0x4   : > { %p140_p2 = pnand %p1671_p0, %p139_p1 }
   0x6   : > { %143 = sbr.rel (%p140_p2) target bundleno = 389 (0x185), region = 32 }
   0xb   : > { %v2206_v0 = vld [vmem:[%s2751_s1 + $0x78] sm:$0xff]   ;;  %v2210_v4 = vld [vmem:[%s2751_s1 + $0x70] sm:$0xff]   ;;  %v2214_v8 = vld [vmem:[%s2751_s1 + $0x68] sm:$0xff]   ;;  %s164_s17 = smul.u32 28, %s1667_s13  ;;  %vm905_vm0 = vcmask 523264  }
   0xc   : > { %v2207_v1 = vld [vmem:[%s2751_s1 + $0xf8] sm:$0xff]   ;;  %1935 = vmatprep.subr.bf16.mxu0 %v2206_v0  ;;  %v2211_v5 = vld [vmem:[%s2751_s1 + $0xf0] sm:$0xff]   ;;  %v2215_v9 = vld [vmem:[%s2751_s1 + $0xe8] sm:$0xff]  }
   0xd   : > { %v2208_v2 = vld [vmem:[%s2751_s1 + $0x38] sm:$0xff]   ;;  %2035 = vmatprep.subr.bf16.mxu1 %v2207_v1  ;;  %v2212_v6 = vld [vmem:[%s2751_s1 + $0x30] sm:$0xff]   ;;  %v2216_v10 = vld [vmem:[%s2751_s1 + $0x28] sm:$0xff]   ;;  %p165_p3 = scmp.lt.s32.totalorder %s164_s17, 55 }
   0xe   : > { %v2209_v3 = vld [vmem:[%s2751_s1 + $0xb8] sm:$0xff]   ;;  %1936 = vmatpush3.bf16.msra.mxu0 %v2208_v2  ;;  %v2213_v7 = vld [vmem:[%s2751_s1 + $0xb0] sm:$0xff]   ;;  %v2217_v11 = vld [vmem:[%s2751_s1 + $0xa8] sm:$0xff]  }
   0xf   : > { %2036 = vmatpush3.bf16.msra.mxu1 %v2209_v3  ;;  %1937 = vmatprep.subr.bf16.mxu0 %v2210_v4  ;;  %v2218_v12 = vld [vmem:[%s2751_s1 + $0x60] sm:$0xff]   ;;  %v2222_v16 = vld [vmem:[%s2751_s1 + $0x58] sm:$0xff]   ;;  %v2226_v20 = vld [vmem:[%s2751_s1 + $0x50] sm:$0xff]   ;;  %s2775_s17 = smov (!%p165_p3, %s164_s17), 55 }
  0x10   : > { %2037 = vmatprep.subr.bf16.mxu1 %v2211_v5  ;;  %v2219_v13 = vld [vmem:[%s2751_s1 + $0xe0] sm:$0xff]   ;;  %v2223_v17 = vld [vmem:[%s2751_s1 + $0xd8] sm:$0xff]   ;;  %v2227_v21 = vld [vmem:[%s2751_s1 + $0xd0] sm:$0xff]   ;;  %s2197_s16 = smul.u32 20, %s2775_s17  ;;  %s1673_s18 = sshll.u32 %s2775_s17, 2 }
  0x11   : > { %v2220_v14 = vld [vmem:[%s2751_s1 + $0x20] sm:$0xff]   ;;  %v2224_v18 = vld [vmem:[%s2751_s1 + $0x18] sm:$0xff]   ;;  %v2228_v22 = vld [vmem:[%s2751_s1 + $0x10] sm:$0xff]   ;;  %s2685_s21 = scalar_lea.vmem %s2753_s3, %s1673_s18 }
  0x12   : > { %1938 = vmatpush3.bf16.msra.mxu0 %v2212_v6  ;;  %v2221_v15 = vld [vmem:[%s2751_s1 + $0xa0] sm:$0xff]   ;;  %v2225_v19 = vld [vmem:[%s2751_s1 + $0x98] sm:$0xff]   ;;  %v2229_v23 = vld [vmem:[%s2751_s1 + $0x90] sm:$0xff]   ;;  %s2474_s27 = scalar_lea.vmem %s2750_s0, %s2197_s16 }
  0x13   : > { %2038 = vmatpush3.bf16.msra.mxu1 %v2213_v7  ;;  %1939 = vmatprep.subr.bf16.mxu0 %v2214_v8  ;;  %v2230_v24 = vld [vmem:[%s2751_s1 + $0x48] sm:$0xff]   ;;  %v2234_v28 = vld [vmem:[%s2751_s1 + $0x40] sm:$0xff]   ;;  %v2244_v36 = vld [vmem:[%s2751_s1 + $0x118] sm:$0xff]  }
  0x14   : > { %2039 = vmatprep.subr.bf16.mxu1 %v2215_v9  ;;  %v2231_v25 = vld [vmem:[%s2751_s1 + $0xc8] sm:$0xff]   ;;  %v2235_v29 = vld [vmem:[%s2751_s1 + $0xc0] sm:$0xff]   ;;  %v2253_v42 = vld [vmem:[%s2474_s27 + $0x5c] ss:$20 sps:$4 sm:$0xff]  }
  0x15   : > { %v2232_v26 = vld [vmem:[%s2751_s1 + $0x8] sm:$0xff]   ;;  %v2236_v30 = vld [vmem:[%s2751_s1] sm:$0xff]   ;;  %v2263_v43 = vld [vmem:[%s2751_s1 + $0x110] sm:$0xff]  }
  0x16   : > { %1940 = vmatpush3.bf16.msra.mxu0 %v2216_v10  ;;  %v2233_v27 = vld [vmem:[%s2751_s1 + $0x88] sm:$0xff]   ;;  %v2237_v31 = vld [vmem:[%s2751_s1 + $0x80] sm:$0xff]   ;;  %v2257_v46 = vld [vmem:[%s2474_s27 + $0x7c] ss:$20 sps:$4 sm:$0xff]  }
  0x17   : > { %2040 = vmatpush3.bf16.msra.mxu1 %v2217_v11  ;;  %1941 = vmatprep.subr.bf16.mxu0 %v2218_v12  ;;  %v2238_v32 = vld [vmem:[%s2474_s27] ss:$20 sps:$4 sm:$0xff]   ;;  %v2240_v33 = vld [vmem:[%s2474_s27 + $0x4] ss:$20 sps:$4 sm:$0xff]   ;;  %v2241_v34 = vld [vmem:[%s2474_s27 + $0x8] ss:$20 sps:$4 sm:$0xff]  }
  0x18   : > { %2041 = vmatprep.subr.bf16.mxu1 %v2219_v13  ;;  %v2243_v35 = vld [vmem:[%s2474_s27 + $0xc] ss:$20 sps:$4 sm:$0xff]   ;;  %980 = vmatprep.mubr.bf16.mxu0 %v2240_v33  ;;  %v2247_v38 = vld [vmem:[%s2474_s27 + $0x34] ss:$20 sps:$4 sm:$0xff]   ;;  %v2250_v40 = vld [vmem:[%s2474_s27 + $0x30] ss:$20 sps:$4 sm:$0xff]  }
  0x19   : > { %1125 = vmatprep.mubr.bf16.mxu1 %v2243_v35  ;;  %v2245_v37 = vld [vmem:[%s2474_s27 + $0x2c] ss:$20 sps:$4 sm:$0xff]   ;;  %v2249_v39 = vld [vmem:[%s2474_s27 + $0x28] ss:$20 sps:$4 sm:$0xff]   ;;  %v2255_v44 = vld [vmem:[%s2474_s27 + $0x50] ss:$20 sps:$4 sm:$0xff]  }
  0x1a   : > { %1942 = vmatpush3.bf16.msra.mxu0 %v2220_v14  ;;  %v2251_v41 = vld [vmem:[%s2474_s27 + $0x54] ss:$20 sps:$4 sm:$0xff]   ;;  %v2256_v45 = vld [vmem:[%s2474_s27 + $0x58] ss:$20 sps:$4 sm:$0xff]   ;;  %v2307_v56 = vld [vmem:[%s2751_s1 + $0x100] sm:$0xff]  }
  0x1b   : > { %2042 = vmatpush3.bf16.msra.mxu1 %v2221_v15  ;;  %1943 = vmatprep.subr.bf16.mxu0 %v2222_v16  ;;  %v2259_v47 = vld [vmem:[%s2474_s27 + $0x84] ss:$20 sps:$4 sm:$0xff]   ;;  %v2262_v49 = vld [vmem:[%s2474_s27 + $0x80] ss:$20 sps:$4 sm:$0xff]   ;;  %v2288_v50 = vld [vmem:[%s2751_s1 + $0x108] sm:$0xff]  }
  0x1c   : > { %2043 = vmatprep.subr.bf16.mxu1 %v2223_v17  ;;  %v2261_v48 = vld [vmem:[%s2474_s27 + $0x78] ss:$20 sps:$4 sm:$0xff]   ;;  %v2268_v53 = vld [vmem:[%s2474_s27 + $0xa0] ss:$20 sps:$4 sm:$0xff]   ;;  %v2269_v54 = vld [vmem:[%s2474_s27 + $0xa8] ss:$20 sps:$4 sm:$0xff]  }
  0x1d   : > { %v2264_v51 = vld [vmem:[%s2474_s27 + $0xa4] ss:$20 sps:$4 sm:$0xff]   ;;  %v2266_v52 = vld [vmem:[%s2474_s27 + $0xac] ss:$20 sps:$4 sm:$0xff]   ;;  %v2272_v57 = vld [vmem:[%s2474_s27 + $0xd4] ss:$20 sps:$4 sm:$0xff]  }
  0x1e   : > { %1944 = vmatpush3.bf16.msra.mxu0 %v2224_v18  ;;  %v2270_v55 = vld [vmem:[%s2474_s27 + $0xcc] ss:$20 sps:$4 sm:$0xff]   ;;  %v2274_v58 = vld [vmem:[%s2474_s27 + $0xc8] ss:$20 sps:$4 sm:$0xff]   ;;  %v2275_v59 = vld [vmem:[%s2474_s27 + $0xd0] ss:$20 sps:$4 sm:$0xff]  }
  0x1f   : > { %2044 = vmatpush3.bf16.msra.mxu1 %v2225_v19  ;;  %1945 = vmatprep.subr.bf16.mxu0 %v2226_v20  ;;  %v2276_v60 = vld [vmem:[%s2474_s27 + $0xf4] ss:$20 sps:$4 sm:$0xff]   ;;  %v2278_v61 = vld [vmem:[%s2474_s27 + $0xfc] ss:$20 sps:$4 sm:$0xff]   ;;  %v2281_v63 = vld [vmem:[%s2474_s27 + $0xf8] ss:$20 sps:$4 sm:$0xff]  }
  0x20   : > { %2045 = vmatprep.subr.bf16.mxu1 %v2227_v21  ;;  %v2280_v62 = vld [vmem:[%s2474_s27 + $0xf0] ss:$20 sps:$4 sm:$0xff]   ;;  %v2286_v2 = vld [vmem:[%s2474_s27 + $0x118] ss:$20 sps:$4 sm:$0xff]   ;;  %v2287_v3 = vld [vmem:[%s2474_s27 + $0x120] ss:$20 sps:$4 sm:$0xff]  }
  0x21   : > { %v2282_v0 = vld [vmem:[%s2474_s27 + $0x11c] ss:$20 sps:$4 sm:$0xff]   ;;  %v2284_v1 = vld [vmem:[%s2474_s27 + $0x124] ss:$20 sps:$4 sm:$0xff]   ;;  %v2291_v5 = vld [vmem:[%s2474_s27 + $0x14c] ss:$20 sps:$4 sm:$0xff]  }
  0x22   : > { %1946 = vmatpush3.bf16.msra.mxu0 %v2228_v22  ;;  %v2289_v4 = vld [vmem:[%s2474_s27 + $0x144] ss:$20 sps:$4 sm:$0xff]   ;;  %v2293_v6 = vld [vmem:[%s2474_s27 + $0x140] ss:$20 sps:$4 sm:$0xff]   ;;  %v2294_v7 = vld [vmem:[%s2474_s27 + $0x148] ss:$20 sps:$4 sm:$0xff]  }
  0x23   : > { %2046 = vmatpush3.bf16.msra.mxu1 %v2229_v23  ;;  %1947 = vmatprep.subr.bf16.mxu0 %v2230_v24  ;;  %v2295_v8 = vld [vmem:[%s2474_s27 + $0x16c] ss:$20 sps:$4 sm:$0xff]   ;;  %v2297_v9 = vld [vmem:[%s2474_s27 + $0x174] ss:$20 sps:$4 sm:$0xff]   ;;  %v2300_v11 = vld [vmem:[%s2474_s27 + $0x170] ss:$20 sps:$4 sm:$0xff]  }
  0x24   : > { %2047 = vmatprep.subr.bf16.mxu1 %v2231_v25  ;;  %v2299_v10 = vld [vmem:[%s2474_s27 + $0x168] ss:$20 sps:$4 sm:$0xff]   ;;  %v2305_v14 = vld [vmem:[%s2474_s27 + $0x190] ss:$20 sps:$4 sm:$0xff]   ;;  %v2306_v15 = vld [vmem:[%s2474_s27 + $0x198] ss:$20 sps:$4 sm:$0xff]  }
  0x25   : > { %v2301_v12 = vld [vmem:[%s2474_s27 + $0x194] ss:$20 sps:$4 sm:$0xff]   ;;  %v2303_v13 = vld [vmem:[%s2474_s27 + $0x19c] ss:$20 sps:$4 sm:$0xff]   ;;  %v2310_v17 = vld [vmem:[%s2474_s27 + $0x1c4] ss:$20 sps:$4 sm:$0xff]  }
  0x26   : > { %1948 = vmatpush3.bf16.msra.mxu0 %v2232_v26  ;;  %v2308_v16 = vld [vmem:[%s2474_s27 + $0x1bc] ss:$20 sps:$4 sm:$0xff]   ;;  %v2312_v18 = vld [vmem:[%s2474_s27 + $0x1b8] ss:$20 sps:$4 sm:$0xff]   ;;  %v2313_v19 = vld [vmem:[%s2474_s27 + $0x1c0] ss:$20 sps:$4 sm:$0xff]  }
  0x27   : > { %2048 = vmatpush3.bf16.msra.mxu1 %v2233_v27  ;;  %1949 = vmatprep.subr.bf16.mxu0 %v2234_v28  ;;  %v2314_v20 = vld [vmem:[%s2474_s27 + $0x1e4] ss:$20 sps:$4 sm:$0xff]   ;;  %v2316_v21 = vld [vmem:[%s2474_s27 + $0x1ec] ss:$20 sps:$4 sm:$0xff]   ;;  %v2319_v23 = vld [vmem:[%s2474_s27 + $0x1e8] ss:$20 sps:$4 sm:$0xff]  }
  0x28   : > { %2049 = vmatprep.subr.bf16.mxu1 %v2235_v29  ;;  %v2318_v22 = vld [vmem:[%s2474_s27 + $0x1e0] ss:$20 sps:$4 sm:$0xff]   ;;  %v2324_v26 = vld [vmem:[%s2474_s27 + $0x208] ss:$20 sps:$4 sm:$0xff]   ;;  %v2325_v27 = vld [vmem:[%s2474_s27 + $0x210] ss:$20 sps:$4 sm:$0xff]  }
  0x29   : > { %v2320_v24 = vld [vmem:[%s2474_s27 + $0x20c] ss:$20 sps:$4 sm:$0xff]   ;;  %v2322_v25 = vld [vmem:[%s2474_s27 + $0x214] ss:$20 sps:$4 sm:$0xff]   ;;  %v2326_v28 = vld [vmem:[%s2474_s27 + $0x10] ss:$20 sps:$4 sm:$0xff]  }
  0x2a   : > { %1950 = vmatpush3.bf16.msra.mxu0 %v2236_v30  ;;  %v2327_v29 = vld [vmem:[%s2474_s27 + $0x150] ss:$20 sps:$4 sm:$0xff]   ;;  %v2328_v30 = vld [vmem:[%s2474_s27 + $0x38] ss:$20 sps:$4 sm:$0xff]   ;;  %v2331_v33 = vld [vmem:[%s2474_s27 + $0x1a0] ss:$20 sps:$4 sm:$0xff]  }
  0x2b   : > { %2050 = vmatpush3.bf16.msra.mxu1 %v2237_v31  ;;  %2153 = vmatprep.subr.bf16.mxu0 %v2244_v36  ;;  %v2329_v31 = vld [vmem:[%s2474_s27 + $0x178] ss:$20 sps:$4 sm:$0xff]   ;;  %v2333_v35 = vld [vmem:[%s2474_s27 + $0x1c8] ss:$20 sps:$4 sm:$0xff]  }
  0x2c   : > { %2189 = vmatprep.subr.bf16.mxu1 %v2244_v36 }
  0x2d   : > { %981 = vmatmul.mubr.bf16.vlgmr.msra.gmra.mxu0 %v2238_v32  ;;  %v2330_v32 = vld [vmem:[%s2474_s27 + $0x60] ss:$20 sps:$4 sm:$0xff]  }
  0x2e   : > { %1126 = vmatmul.mubr.bf16.vlgmr.msra.gmra.mxu1 %v2241_v34  ;;  %2154 = vmatpush3.bf16.msra.mxu0 %v2244_v36  ;;  %v2332_v34 = vld [vmem:[%s2474_s27 + $0x88] ss:$20 sps:$4 sm:$0xff]  }
  0x2f   : > { %988 = vmatprep.mubr.bf16.mxu0 %v2245_v37  ;;  %1133 = vmatprep.mubr.bf16.mxu1 %v2247_v38  ;;  %v2335_v37 = vld [vmem:[%s2474_s27 + $0x1f0] ss:$20 sps:$4 sm:$0xff]   ;;  %v2336_v38 = vld [vmem:[%s2474_s27 + $0xd8] ss:$20 sps:$4 sm:$0xff]  }
  0x30   : > { %2193 = vmatpush3.bf16.msra.mxu1 %v2244_v36  ;;  %2155 = vmatprep.subr.bf16.mxu0 %v2263_v43  ;;  %v2334_v36 = vld [vmem:[%s2474_s27 + $0xb0] ss:$20 sps:$4 sm:$0xff]  }
  0x31   : > { %2190 = vmatprep.subr.bf16.mxu1 %v2263_v43 }
  0x32   : > { %2156 = vmatpush3.bf16.msra.mxu0 %v2263_v43 }
  0x33   : > { %2157 = vmatprep.subr.bf16.mxu0 %v2288_v50 }
  0x34   : > { %2194 = vmatpush3.bf16.msra.mxu1 %v2263_v43 }
  0x35   : > { %989 = vmatmul.mubr.bf16.gmra.mxu0 %v2249_v39  ;;  %2191 = vmatprep.subr.bf16.mxu1 %v2288_v50  ;;  %v2337_v39 = vld [vmem:[%s2474_s27 + $0x218] ss:$20 sps:$4 sm:$0xff]  }
  0x36   : > { %1134 = vmatmul.mubr.bf16.gmra.mxu1 %v2250_v40  ;;  %996 = vmatprep.mubr.bf16.mxu0 %v2251_v41  ;;  %v2338_v40 = vld [vmem:[%s2474_s27 + $0x100] ss:$20 sps:$4 sm:$0xff]   ;;  %v2339_v41 = vld [vmem:[%s2474_s27 + $0x128] ss:$20 sps:$4 sm:$0xff]  }
  0x37   : > { %1141 = vmatprep.mubr.bf16.mxu1 %v2253_v42  ;;  %2158 = vmatpush3.bf16.msra.mxu0 %v2288_v50  ;;  %v335_v42 = vlaneseq }
  0x38   : > { %2195 = vmatpush3.bf16.msra.mxu1 %v2288_v50  ;;  %2159 = vmatprep.subr.bf16.mxu0 %v2307_v56 }
  0x39   : > { %2192 = vmatprep.subr.bf16.mxu1 %v2307_v56  ;;  %v2578_v43 = vshrl.u32 %v335_v42, 7 }
  0x3b   : > { %2160 = vmatpush3.bf16.msra.mxu0 %v2307_v56 }
  0x3c   : > { %2196 = vmatpush3.bf16.msra.mxu1 %v2307_v56 }
  0x3d   : > { %997 = vmatmul.mubr.bf16.gmra.mxu0 %v2255_v44  ;;  %v337_v44 = vsub.s32 0, %v2578_v43 }
  0x3e   : > { %1142 = vmatmul.mubr.bf16.gmra.mxu1 %v2256_v45  ;;  %1004 = vmatprep.mubr.bf16.mxu0 %v2257_v46  ;;  %v2584_v45 = vld [vmem:[%s2752_s2] sm:$0x3] }
  0x3f   : > { %1149 = vmatprep.mubr.bf16.mxu1 %v2259_v47 }
  0x45   : > { %1005 = vmatmul.mubr.bf16.gmra.mxu0 %v2261_v48  ;;  %v2587_v48 = vrot.slane %v2584_v45, %v337_v44 }
  0x46   : > { %1150 = vmatmul.mubr.bf16.gmra.mxu1 %v2262_v49  ;;  %1012 = vmatprep.mubr.bf16.mxu0 %v2264_v51 }
  0x47   : > { %1157 = vmatprep.mubr.bf16.mxu1 %v2266_v52 }
  0x4d   : > { %1013 = vmatmul.mubr.bf16.gmra.mxu0 %v2268_v53 }
  0x4e   : > { %1158 = vmatmul.mubr.bf16.gmra.mxu1 %v2269_v54  ;;  %1020 = vmatprep.mubr.bf16.mxu0 %v2270_v55 }
  0x4f   : > { %1165 = vmatprep.mubr.bf16.mxu1 %v2272_v57 }
  0x55   : > { %1021 = vmatmul.mubr.bf16.gmra.mxu0 %v2274_v58 }
  0x56   : > { %1166 = vmatmul.mubr.bf16.gmra.mxu1 %v2275_v59  ;;  %1028 = vmatprep.mubr.bf16.mxu0 %v2276_v60 }
  0x57   : > { %1173 = vmatprep.mubr.bf16.mxu1 %v2278_v61 }
  0x5d   : > { %1029 = vmatmul.mubr.bf16.gmra.mxu0 %v2280_v62 }
  0x5e   : > { %1174 = vmatmul.mubr.bf16.gmra.mxu1 %v2281_v63  ;;  %1036 = vmatprep.mubr.bf16.mxu0 %v2282_v0 }
  0x5f   : > { %1181 = vmatprep.mubr.bf16.mxu1 %v2284_v1 }
  0x65   : > { %1037 = vmatmul.mubr.bf16.gmra.mxu0 %v2286_v2 }
  0x66   : > { %1182 = vmatmul.mubr.bf16.gmra.mxu1 %v2287_v3  ;;  %1044 = vmatprep.mubr.bf16.mxu0 %v2289_v4 }
  0x67   : > { %1189 = vmatprep.mubr.bf16.mxu1 %v2291_v5 }
  0x6d   : > { %1045 = vmatmul.mubr.bf16.gmra.mxu0 %v2293_v6 }
  0x6e   : > { %1190 = vmatmul.mubr.bf16.gmra.mxu1 %v2294_v7  ;;  %1052 = vmatprep.mubr.bf16.mxu0 %v2295_v8 }
  0x6f   : > { %1197 = vmatprep.mubr.bf16.mxu1 %v2297_v9 }
  0x75   : > { %1053 = vmatmul.mubr.bf16.gmra.mxu0 %v2299_v10 }
  0x76   : > { %1198 = vmatmul.mubr.bf16.gmra.mxu1 %v2300_v11  ;;  %1060 = vmatprep.mubr.bf16.mxu0 %v2301_v12 }
  0x77   : > { %1205 = vmatprep.mubr.bf16.mxu1 %v2303_v13 }
  0x7d   : > { %1061 = vmatmul.mubr.bf16.gmra.mxu0 %v2305_v14 }
  0x7e   : > { %1206 = vmatmul.mubr.bf16.gmra.mxu1 %v2306_v15  ;;  %1068 = vmatprep.mubr.bf16.mxu0 %v2308_v16 }
  0x7f   : > { %1213 = vmatprep.mubr.bf16.mxu1 %v2310_v17 }
  0x85   : > { %1069 = vmatmul.mubr.bf16.gmra.mxu0 %v2312_v18 }
  0x86   : > { %1214 = vmatmul.mubr.bf16.gmra.mxu1 %v2313_v19  ;;  %1076 = vmatprep.mubr.bf16.mxu0 %v2314_v20 }
  0x87   : > { %1221 = vmatprep.mubr.bf16.mxu1 %v2316_v21 }
  0x8d   : > { %1077 = vmatmul.mubr.bf16.gmra.mxu0 %v2318_v22 }
  0x8e   : > { %1222 = vmatmul.mubr.bf16.gmra.mxu1 %v2319_v23  ;;  %1084 = vmatprep.mubr.bf16.mxu0 %v2320_v24 }
  0x8f   : > { %1229 = vmatprep.mubr.bf16.mxu1 %v2322_v25 }
  0x95   : > { %1085 = vmatmul.mubr.bf16.gmra.mxu0 %v2324_v26 }
  0x96   : > { %1230 = vmatmul.mubr.bf16.gmra.mxu1 %v2325_v27  ;;  %2161 = vmatprep.mubr.msk.bf16.mxu0 %vm905_vm0, %v2326_v28 }
  0x97   : > { %2177 = vmatprep.mubr.msk.bf16.mxu1 %vm905_vm0, %v2327_v29 }
  0x9d   : > { %2162 = vmatmul.mubr.msk.bf16.vlgmr.msra.gmra.mxu0 %vm905_vm0, %v2328_v30 }
  0x9e   : > { %2178 = vmatmul.mubr.msk.bf16.vlgmr.msra.gmra.mxu1 %vm905_vm0, %v2329_v31  ;;  %2165 = vmatprep.mubr.msk.bf16.mxu0 %vm905_vm0, %v2330_v32 }
  0x9f   : > { %2181 = vmatprep.mubr.msk.bf16.mxu1 %vm905_vm0, %v2331_v33 }
  0xa5   : > { %2166 = vmatmul.mubr.msk.bf16.gmra.mxu0 %vm905_vm0, %v2332_v34 }
  0xa6   : > { %2182 = vmatmul.mubr.msk.bf16.gmra.mxu1 %vm905_vm0, %v2333_v35  ;;  %2169 = vmatprep.mubr.msk.bf16.mxu0 %vm905_vm0, %v2334_v36 }
  0xa7   : > { %2185 = vmatprep.mubr.msk.bf16.mxu1 %vm905_vm0, %v2335_v37 }
  0xad   : > { %2170 = vmatmul.mubr.msk.bf16.gmra.mxu0 %vm905_vm0, %v2336_v38 }
  0xae   : > { %2186 = vmatmul.mubr.msk.bf16.gmra.mxu1 %vm905_vm0, %v2337_v39  ;;  %2173 = vmatprep.mubr.msk.bf16.mxu0 %vm905_vm0, %v2338_v40 }
  0xb5   : > { %2174 = vmatmul.mubr.msk.bf16.gmra.mxu0 %vm905_vm0, %v2339_v41 }
  0xed   : > { %v1951_v46 = vpop.f32.mrf.mxu0 }
  0xee   : > { %v2051_v47 = vpop.f32.mrf.mxu1 }
  0xef   : > { %v1952_v49 = vpop.f32.mrf.mxu0 }
  0xf0   : > { %v1953_v50 = vadd.f32 %v1952_v49, %v1951_v46  ;;  %v2052_v51 = vpop.f32.mrf.mxu1 }
  0xf1   : > { %v2053_v52 = vadd.f32 %v2052_v51, %v2051_v47  ;;  %v1954_v53 = vpop.f32.mrf.mxu0 }
  0xf2   : > { %v983_v54 = vadd.f32 %v1953_v50, %v2587_v48  ;;  %v2054_v55 = vpop.f32.mrf.mxu1 }
  0xf3   : > { %v1955_v56 = vpop.f32.mrf.mxu0 }
  0xf4   : > { %v1956_v57 = vadd.f32 %v1955_v56, %v1954_v53  ;;  %v2055_v58 = vpop.f32.mrf.mxu1  ;;  %v2590_v59 = vadd.f32 %v2053_v52, %v983_v54 }
  0xf5   : > { %v2056_v60 = vadd.f32 %v2055_v58, %v2054_v55  ;;  %v1957_v61 = vpop.f32.mrf.mxu0 }
  0xf6   : > { %v986_v62 = vadd.f32 %v1956_v57, %v2587_v48  ;;  %v2057_v63 = vpop.f32.mrf.mxu1 }
  0xf7   : > { %v1958_v0 = vpop.f32.mrf.mxu0 }
  0xf8   : > { %v1959_v1 = vadd.f32 %v1958_v0, %v1957_v61  ;;  %v2058_v2 = vpop.f32.mrf.mxu1  ;;  %v2593_v3 = vadd.f32 %v2056_v60, %v986_v62 }
  0xf9   : > { %v2059_v4 = vadd.f32 %v2058_v2, %v2057_v63  ;;  %v1960_v5 = vpop.f32.mrf.mxu0 }
  0xfa   : > { %v991_v6 = vadd.f32 %v1959_v1, %v2587_v48  ;;  %v2060_v7 = vpop.f32.mrf.mxu1 }
  0xfb   : > { %v1961_v8 = vpop.f32.mrf.mxu0 }
  0xfc   : > { %v1962_v9 = vadd.f32 %v1961_v8, %v1960_v5  ;;  %v2061_v10 = vpop.f32.mrf.mxu1  ;;  %v2596_v11 = vadd.f32 %v2059_v4, %v991_v6 }
  0xfd   : > { %v2062_v12 = vadd.f32 %v2061_v10, %v2060_v7  ;;  %v1963_v13 = vpop.f32.mrf.mxu0 }
  0xfe   : > { %v994_v14 = vadd.f32 %v1962_v9, %v2587_v48  ;;  %v2063_v15 = vpop.f32.mrf.mxu1 }
  0xff   : > { %v1964_v16 = vpop.f32.mrf.mxu0 }
 0x100   : > { %v1965_v17 = vadd.f32 %v1964_v16, %v1963_v13  ;;  %v2064_v18 = vpop.f32.mrf.mxu1  ;;  %v2599_v19 = vadd.f32 %v2062_v12, %v994_v14 }
 0x101   : > { %v2065_v20 = vadd.f32 %v2064_v18, %v2063_v15  ;;  %v1966_v21 = vpop.f32.mrf.mxu0 }
 0x102   : > { %v999_v22 = vadd.f32 %v1965_v17, %v2587_v48  ;;  %v2066_v23 = vpop.f32.mrf.mxu1 }
 0x103   : > { %v1967_v24 = vpop.f32.mrf.mxu0 }
 0x104   : > { %v1968_v25 = vadd.f32 %v1967_v24, %v1966_v21  ;;  %v2067_v26 = vpop.f32.mrf.mxu1  ;;  %v2602_v27 = vadd.f32 %v2065_v20, %v999_v22 }
 0x105   : > { %v2068_v28 = vadd.f32 %v2067_v26, %v2066_v23  ;;  %v1969_v29 = vpop.f32.mrf.mxu0 }
 0x106   : > { %v1002_v30 = vadd.f32 %v1968_v25, %v2587_v48  ;;  %v2069_v31 = vpop.f32.mrf.mxu1 }
 0x107   : > { %v1970_v32 = vpop.f32.mrf.mxu0 }
 0x108   : > { %v1971_v33 = vadd.f32 %v1970_v32, %v1969_v29  ;;  %v2070_v34 = vpop.f32.mrf.mxu1  ;;  %v2605_v35 = vadd.f32 %v2068_v28, %v1002_v30 }
 0x109   : > { %v2071_v36 = vadd.f32 %v2070_v34, %v2069_v31  ;;  %v1972_v37 = vpop.f32.mrf.mxu0 }
 0x10a   : > { %2754 = vst [vmem:[#allocation2_spill] sm:$0xff] %v2605_v35  ;;  %v1007_v38 = vadd.f32 %v1971_v33, %v2587_v48  ;;  %v2072_v39 = vpop.f32.mrf.mxu1 }
 0x10b   : > { %v1973_v40 = vpop.f32.mrf.mxu0 }
 0x10c   : > { %v1974_v41 = vadd.f32 %v1973_v40, %v1972_v37  ;;  %v2073_v42 = vpop.f32.mrf.mxu1  ;;  %v2608_v44 = vadd.f32 %v2071_v36, %v1007_v38 }
 0x10d   : > { %v2074_v46 = vadd.f32 %v2073_v42, %v2072_v39  ;;  %v1975_v47 = vpop.f32.mrf.mxu0 }
 0x10e   : > { %v1010_v49 = vadd.f32 %v1974_v41, %v2587_v48  ;;  %v2075_v50 = vpop.f32.mrf.mxu1 }
 0x10f   : > { %v1976_v51 = vpop.f32.mrf.mxu0 }
 0x110   : > { %v1977_v52 = vadd.f32 %v1976_v51, %v1975_v47  ;;  %v2076_v53 = vpop.f32.mrf.mxu1  ;;  %v2611_v54 = vadd.f32 %v2074_v46, %v1010_v49 }
 0x111   : > { %v2077_v55 = vadd.f32 %v2076_v53, %v2075_v50  ;;  %v1978_v56 = vpop.f32.mrf.mxu0 }
 0x112   : > { %2755 = vst [vmem:[#allocation3_spill] sm:$0xff] %v2611_v54  ;;  %v1015_v57 = vadd.f32 %v1977_v52, %v2587_v48  ;;  %v2078_v58 = vpop.f32.mrf.mxu1 }
 0x113   : > { %v1979_v60 = vpop.f32.mrf.mxu0 }
 0x114   : > { %v1980_v61 = vadd.f32 %v1979_v60, %v1978_v56  ;;  %v2079_v62 = vpop.f32.mrf.mxu1  ;;  %v2614_v63 = vadd.f32 %v2077_v55, %v1015_v57 }
 0x115   : > { %v2080_v0 = vadd.f32 %v2079_v62, %v2078_v58  ;;  %v1981_v1 = vpop.f32.mrf.mxu0 }
 0x116   : > { %2756 = vst [vmem:[#allocation4_spill] sm:$0xff] %v2614_v63  ;;  %v1018_v2 = vadd.f32 %v1980_v61, %v2587_v48  ;;  %v2081_v4 = vpop.f32.mrf.mxu1 }
 0x117   : > { %v1982_v5 = vpop.f32.mrf.mxu0 }
 0x118   : > { %v1983_v6 = vadd.f32 %v1982_v5, %v1981_v1  ;;  %v2082_v7 = vpop.f32.mrf.mxu1  ;;  %v2617_v8 = vadd.f32 %v2080_v0, %v1018_v2 }
 0x119   : > { %v2083_v9 = vadd.f32 %v2082_v7, %v2081_v4  ;;  %v1984_v10 = vpop.f32.mrf.mxu0 }
 0x11a   : > { %2757 = vst [vmem:[#allocation5_spill] sm:$0xff] %v2617_v8  ;;  %v1023_v12 = vadd.f32 %v1983_v6, %v2587_v48  ;;  %v2084_v13 = vpop.f32.mrf.mxu1 }
 0x11b   : > { %v1985_v14 = vpop.f32.mrf.mxu0 }
 0x11c   : > { %v1986_v15 = vadd.f32 %v1985_v14, %v1984_v10  ;;  %v2085_v16 = vpop.f32.mrf.mxu1  ;;  %v2620_v17 = vadd.f32 %v2083_v9, %v1023_v12 }
 0x11d   : > { %v2086_v18 = vadd.f32 %v2085_v16, %v2084_v13  ;;  %v1987_v20 = vpop.f32.mrf.mxu0 }
 0x11e   : > { %2758 = vst [vmem:[#allocation6_spill] sm:$0xff] %v2620_v17  ;;  %v1026_v21 = vadd.f32 %v1986_v15, %v2587_v48  ;;  %v2087_v22 = vpop.f32.mrf.mxu1 }
 0x11f   : > { %v1988_v23 = vpop.f32.mrf.mxu0 }
 0x120   : > { %v1989_v24 = vadd.f32 %v1988_v23, %v1987_v20  ;;  %v2088_v25 = vpop.f32.mrf.mxu1  ;;  %v2623_v26 = vadd.f32 %v2086_v18, %v1026_v21 }
 0x121   : > { %v2089_v28 = vadd.f32 %v2088_v25, %v2087_v22  ;;  %v1990_v29 = vpop.f32.mrf.mxu0 }
 0x122   : > { %2759 = vst [vmem:[#allocation7_spill] sm:$0xff] %v2623_v26  ;;  %v1031_v30 = vadd.f32 %v1989_v24, %v2587_v48  ;;  %v2090_v31 = vpop.f32.mrf.mxu1 }
 0x123   : > { %v1991_v32 = vpop.f32.mrf.mxu0 }
 0x124   : > { %v1992_v33 = vadd.f32 %v1991_v32, %v1990_v29  ;;  %v2091_v34 = vpop.f32.mrf.mxu1  ;;  %v2626_v36 = vadd.f32 %v2089_v28, %v1031_v30 }
 0x125   : > { %v2092_v37 = vadd.f32 %v2091_v34, %v2090_v31  ;;  %v1993_v38 = vpop.f32.mrf.mxu0 }
 0x126   : > { %2760 = vst [vmem:[#allocation8_spill] sm:$0xff] %v2626_v36  ;;  %v1034_v39 = vadd.f32 %v1992_v33, %v2587_v48  ;;  %v2093_v40 = vpop.f32.mrf.mxu1 }
 0x127   : > { %v1994_v41 = vpop.f32.mrf.mxu0 }
 0x128   : > { %v1995_v42 = vadd.f32 %v1994_v41, %v1993_v38  ;;  %v2094_v46 = vpop.f32.mrf.mxu1  ;;  %v2629_v47 = vadd.f32 %v2092_v37, %v1034_v39 }
 0x129   : > { %v2095_v49 = vadd.f32 %v2094_v46, %v2093_v40  ;;  %v1996_v50 = vpop.f32.mrf.mxu0 }
 0x12a   : > { %2761 = vst [vmem:[#allocation9_spill] sm:$0xff] %v2629_v47  ;;  %v1039_v51 = vadd.f32 %v1995_v42, %v2587_v48  ;;  %v2096_v52 = vpop.f32.mrf.mxu1 }
 0x12b   : > { %v1997_v53 = vpop.f32.mrf.mxu0 }
 0x12c   : > { %v1998_v55 = vadd.f32 %v1997_v53, %v1996_v50  ;;  %v2097_v56 = vpop.f32.mrf.mxu1  ;;  %v2632_v57 = vadd.f32 %v2095_v49, %v1039_v51 }
 0x12d   : > { %v2098_v58 = vadd.f32 %v2097_v56, %v2096_v52  ;;  %v1999_v60 = vpop.f32.mrf.mxu0 }
 0x12e   : > { %2762 = vst [vmem:[#allocation10_spill] sm:$0xff] %v2632_v57  ;;  %v1042_v61 = vadd.f32 %v1998_v55, %v2587_v48  ;;  %v2099_v62 = vpop.f32.mrf.mxu1  ;;  %v1413_v57 = vsub.s32 1, %v2578_v43 }
 0x12f   : > { %v2000_v0 = vpop.f32.mrf.mxu0 }
 0x130   : > { %v2100_v1 = vpop.f32.mrf.mxu1  ;;  %v2635_v2 = vadd.f32 %v2098_v58, %v1042_v61  ;;  %v2001_v50 = vadd.f32 %v2000_v0, %v1999_v60 }
 0x131   : > { %v2002_v4 = vpop.f32.mrf.mxu0  ;;  %v2101_v47 = vadd.f32 %v2100_v1, %v2099_v62 }
 0x132   : > { %2763 = vst [vmem:[#allocation11_spill] sm:$0xff] %v2635_v2  ;;  %v2102_v5 = vpop.f32.mrf.mxu1  ;;  %v1047_v26 = vadd.f32 %v2001_v50, %v2587_v48 }
 0x133   : > { %v2003_v6 = vpop.f32.mrf.mxu0 }
 0x134   : > { %v2103_v7 = vpop.f32.mrf.mxu1  ;;  %v2004_v52 = vadd.f32 %v2003_v6, %v2002_v4 }
 0x135   : > { %v2005_v9 = vpop.f32.mrf.mxu0  ;;  %v2104_v63 = vadd.f32 %v2103_v7, %v2102_v5 }
 0x136   : > { %v2105_v10 = vpop.f32.mrf.mxu1  ;;  %v1050_v60 = vadd.f32 %v2004_v52, %v2587_v48 }
 0x137   : > { %v2006_v12 = vpop.f32.mrf.mxu0 }
 0x138   : > { %v2106_v13 = vpop.f32.mrf.mxu1  ;;  %v2007_v53 = vadd.f32 %v2006_v12, %v2005_v9 }
 0x139   : > { %v2008_v14 = vpop.f32.mrf.mxu0  ;;  %v2107_v4 = vadd.f32 %v2106_v13, %v2105_v10 }
 0x13a   : > { %v2108_v15 = vpop.f32.mrf.mxu1  ;;  %v1055_v0 = vadd.f32 %v2007_v53, %v2587_v48 }
 0x13b   : > { %v2009_v16 = vpop.f32.mrf.mxu0 }
 0x13c   : > { %v2109_v18 = vpop.f32.mrf.mxu1  ;;  %v2010_v56 = vadd.f32 %v2009_v16, %v2008_v14 }
 0x13d   : > { %v2011_v20 = vpop.f32.mrf.mxu0  ;;  %v2110_v6 = vadd.f32 %v2109_v18, %v2108_v15 }
 0x13e   : > { %v2111_v21 = vpop.f32.mrf.mxu1  ;;  %v1058_v62 = vadd.f32 %v2010_v56, %v2587_v48 }
 0x13f   : > { %v2012_v22 = vpop.f32.mrf.mxu0 }
 0x140   : > { %v2112_v23 = vpop.f32.mrf.mxu1  ;;  %v2013_v58 = vadd.f32 %v2012_v22, %v2011_v20 }
 0x141   : > { %v2014_v24 = vpop.f32.mrf.mxu0  ;;  %v2113_v12 = vadd.f32 %v2112_v23, %v2111_v21  ;;  %v2649_v23 = vrot.slane %v2584_v45, %v1413_v57 }
 0x142   : > { %v2114_v25 = vpop.f32.mrf.mxu1  ;;  %v1063_v1 = vadd.f32 %v2013_v58, %v2587_v48 }
 0x143   : > { %v2015_v28 = vpop.f32.mrf.mxu0 }
 0x144   : > { %v2115_v29 = vpop.f32.mrf.mxu1  ;;  %v2016_v2 = vadd.f32 %v2015_v28, %v2014_v24 }
 0x145   : > { %v2017_v30 = vpop.f32.mrf.mxu0  ;;  %v2116_v5 = vadd.f32 %v2115_v29, %v2114_v25  ;;  %v1200_v25 = vadd.f32 %v2107_v4, %v1055_v0  ;;  %v1195_v29 = vadd.f32 %v2104_v63, %v1050_v60 }
 0x146   : > { %v2117_v31 = vpop.f32.mrf.mxu1  ;;  %v1066_v16 = vadd.f32 %v2016_v2, %v2587_v48 }
 0x147   : > { %v2018_v32 = vpop.f32.mrf.mxu0 }
 0x148   : > { %v2118_v33 = vpop.f32.mrf.mxu1  ;;  %v2019_v36 = vadd.f32 %v2018_v32, %v2017_v30 }
 0x149   : > { %v2020_v34 = vpop.f32.mrf.mxu0  ;;  %v2119_v20 = vadd.f32 %v2118_v33, %v2117_v31  ;;  %v2651_v33 = vadd.f32 %v2113_v12, %v1063_v1 }
 0x14a   : > { %v2120_v37 = vpop.f32.mrf.mxu1  ;;  %v1071_v7 = vadd.f32 %v2019_v36, %v2587_v48  ;;  %v1192_v36 = vadd.f32 %v2101_v47, %v1047_v26 }
 0x14b   : > { %v2021_v38 = vpop.f32.mrf.mxu0 }
 0x14c   : > { %v2121_v39 = vpop.f32.mrf.mxu1  ;;  %v2022_v17 = vadd.f32 %v2021_v38, %v2020_v34  ;;  %v1216_v38 = vadd.f32 %v2119_v20, %v1071_v7 }
 0x14d   : > { %v2023_v40 = vpop.f32.mrf.mxu0  ;;  %v2122_v28 = vadd.f32 %v2121_v39, %v2120_v37 }
 0x14e   : > { %v2123_v41 = vpop.f32.mrf.mxu1  ;;  %v1074_v24 = vadd.f32 %v2022_v17, %v2587_v48  ;;  %v1203_v17 = vadd.f32 %v2110_v6, %v1058_v62 }
 0x14f   : > { %v2024_v42 = vpop.f32.mrf.mxu0 }
 0x150   : > { %v2124_v46 = vpop.f32.mrf.mxu1  ;;  %v2025_v35 = vadd.f32 %v2024_v42, %v2023_v40 }
 0x151   : > { %v2026_v49 = vpop.f32.mrf.mxu0  ;;  %v2125_v13 = vadd.f32 %v2124_v46, %v2123_v41 }
 0x152   : > { %v2126_v51 = vpop.f32.mrf.mxu1  ;;  %v1079_v10 = vadd.f32 %v2025_v35, %v2587_v48  ;;  %v2653_v35 = vadd.f32 %v2116_v5, %v1066_v16 }
 0x153   : > { %v2027_v55 = vpop.f32.mrf.mxu0 }
 0x154   : > { %v2127_v61 = vpop.f32.mrf.mxu1  ;;  %v2028_v18 = vadd.f32 %v2027_v55, %v2026_v49  ;;  %v2658_v39 = vadd.f32 %v2125_v13, %v1079_v10 }
 0x155   : > { %v2029_v8 = vpop.f32.mrf.mxu0  ;;  %v2663_v26 = vadd.f32 %v2127_v61, %v2126_v51 }
 0x156   : > { %v2129_v54 = vpop.f32.mrf.mxu1  ;;  %v2661_v45 = vadd.f32 %v2028_v18, %v2587_v48 }
 0x157   : > { %v2030_v9 = vpop.f32.mrf.mxu0 }
 0x158   : > { %v2031_v43 = vadd.f32 %v2030_v9, %v2029_v8  ;;  %v2130_v14 = vpop.f32.mrf.mxu1 }
 0x159   : > { %v2032_v22 = vpop.f32.mrf.mxu0  ;;  %v2131_v21 = vadd.f32 %v2130_v14, %v2129_v54  ;;  %v2656_v54 = vadd.f32 %v2122_v28, %v1074_v24 }
 0x15a   : > { %v2132_v15 = vpop.f32.mrf.mxu1  ;;  %v1087_v30 = vadd.f32 %v2031_v43, %v2587_v48 }
 0x15b   : > { %v2033_v8 = vpop.f32.mrf.mxu0 }
 0x15c   : > { %v2133_v2 = vpop.f32.mrf.mxu1  ;;  %v2034_v31 = vadd.f32 %v2033_v8, %v2032_v22  ;;  %v2665_v57 = vadd.f32 %v2131_v21, %v1087_v30 }
 0x15d   : > { %v2163_v32 = vpop.f32.mrf.mxu0  ;;  %v2667_v40 = vadd.f32 %v2133_v2, %v2132_v15 }
 0x15e   : > { %v1281_v34 = vadd.f32 %v2163_v32, %v2596_v11  ;;  %v2179_v37 = vpop.f32.mrf.mxu1  ;;  %v2672_v46 = vadd.f32 %v2034_v31, %v2587_v48 }
 0x15f   : > { %v1345_v63 = vadd.f32 %v2179_v37, %v1200_v25  ;;  %v1272_v47 = vpop.f32.mrf.mxu0  ;;  %v2764_v25 = vld [vmem:[#allocation3_spill] sm:$0xff] }
 0x160   : > { %vm1385_vm1 = vcmp.gt.f32.partialorder %v1281_v34, 0.0  ;;  %v1417_v11 = vmul.f32 %v2649_v23, %v1281_v34  ;;  %v1273_v41 = vadd.f32 %v1272_v47, %v2590_v59  ;;  %v1336_v42 = vpop.f32.mrf.mxu1  ;;  %v2765_v47 = vld [vmem:[#allocation2_spill] sm:$0xff] }
 0x161   : > { %vm1401_vm2 = vcmp.gt.f32.partialorder %v1345_v63, 0.0  ;;  %v1433_v49 = vmul.f32 %v2649_v23, %v1345_v63  ;;  %v1337_v50 = vadd.f32 %v1336_v42, %v1192_v36  ;;  %v2164_v51 = vpop.f32.mrf.mxu0 }
 0x162   : > { %v1445_v52 = vsel %vm1385_vm1, %v1281_v34, %v1417_v11  ;;  %vm1383_vm3 = vcmp.gt.f32.partialorder %v1273_v41, 0.0  ;;  %v1415_v53 = vmul.f32 %v2649_v23, %v1273_v41  ;;  %v1284_v55 = vadd.f32 %v2164_v51, %v2599_v19  ;;  %v2180_v56 = vpop.f32.mrf.mxu1  ;;  %v2766_v51 = vld [vmem:[#allocation6_spill] sm:$0xff] }
 0x163   : > { %v1461_v58 = vsel %vm1401_vm2, %v1345_v63, %v1433_v49  ;;  %vm1399_vm4 = vcmp.gt.f32.partialorder %v1337_v50, 0.0  ;;  %v1431_v59 = vmul.f32 %v2649_v23, %v1337_v50  ;;  %v1348_v61 = vadd.f32 %v2180_v56, %v1203_v17  ;;  %v1275_v48 = vpop.f32.mrf.mxu0 }
 0x164   : > { %v1443_v60 = vsel %vm1383_vm3, %v1273_v41, %v1415_v53  ;;  %vm1386_vm5 = vcmp.gt.f32.partialorder %v1284_v55, 0.0  ;;  %v1418_v0 = vmul.f32 %v2649_v23, %v1284_v55  ;;  %v1276_v4 = vadd.f32 %v1275_v48, %v2593_v3  ;;  %v1339_v6 = vpop.f32.mrf.mxu1 }
 0x165   : > { %v1459_v9 = vsel %vm1399_vm4, %v1337_v50, %v1431_v59  ;;  %vm1402_vm6 = vcmp.gt.f32.partialorder %v1348_v61, 0.0  ;;  %v1434_v62 = vmul.f32 %v2649_v23, %v1348_v61  ;;  %v1340_v19 = vadd.f32 %v1339_v6, %v1195_v29  ;;  %v2167_v1 = vpop.f32.mrf.mxu0 }
 0x166   : > { %v1446_v12 = vsel %vm1386_vm5, %v1284_v55, %v1418_v0  ;;  %vm1384_vm7 = vcmp.gt.f32.partialorder %v1276_v4, 0.0  ;;  %v1416_v43 = vmul.f32 %v2649_v23, %v1276_v4  ;;  %v1297_v14 = vadd.f32 %v2167_v1, %v2608_v44  ;;  %v2183_v3 = vpop.f32.mrf.mxu1  ;;  %v2767_v0 = vld [vmem:[#allocation4_spill] sm:$0xff] }
 0x167   : > { %v1860_v16 = vpack.c.bf16 %v1446_v12, %v1445_v52  ;;  %v1462_v5 = vsel %vm1402_vm6, %v1348_v61, %v1434_v62  ;;  %vm1400_vm8 = vcmp.gt.f32.partialorder %v1340_v19, 0.0  ;;  %v1432_v7 = vmul.f32 %v2649_v23, %v1340_v19  ;;  %v1288_v20 = vpop.f32.mrf.mxu0 }
 0x168   : > { %v1900_v22 = vpack.c.bf16 %v1462_v5, %v1461_v58  ;;  %v1444_v24 = vsel %vm1384_vm7, %v1276_v4, %v1416_v43  ;;  %vm1389_vm9 = vcmp.gt.f32.partialorder %v1297_v14, 0.0  ;;  %v1421_v28 = vmul.f32 %v2649_v23, %v1297_v14  ;;  %v1352_v10 = vpop.f32.mrf.mxu1 }
 0x169   : > { %1922 = vst [vmem:[%s2685_s21 + $0x8] sm:$0xff] %v1860_v16   ;;  %v1855_v13 = vpack.c.bf16 %v1444_v24, %v1443_v60  ;;  %v1460_v15 = vsel %vm1400_vm8, %v1340_v19, %v1432_v7  ;;  %v1361_v44 = vadd.f32 %v2183_v3, %v1216_v38  ;;  %v1289_v18 = vadd.f32 %v1288_v20, %v2602_v27  ;;  %v2168_v30 = vpop.f32.mrf.mxu0 }
 0x16a   : > { %1930 = vst [vmem:[%s2685_s21 + $0x48] sm:$0xff] %v1900_v22   ;;  %v1895_v21 = vpack.c.bf16 %v1460_v15, %v1459_v9  ;;  %v1449_v8 = vsel %vm1389_vm9, %v1297_v14, %v1421_v28  ;;  %v1353_v2 = vadd.f32 %v1352_v10, %v2651_v33  ;;  %v1300_v36 = vadd.f32 %v2168_v30, %v2764_v25  ;;  %v2184_v29 = vpop.f32.mrf.mxu1  ;;  %v2768_v22 = vld [vmem:[#allocation7_spill] sm:$0xff]  ;;  %v2769_v10 = vld [vmem:[#allocation5_spill] sm:$0xff] }
 0x16b   : > { %1856 = vst [vmem:[%s2685_s21] sm:$0xff] %v1855_v13   ;;  %vm1405_vm10 = vcmp.gt.f32.partialorder %v1361_v44, 0.0  ;;  %v1437_v31 = vmul.f32 %v2649_v23, %v1361_v44  ;;  %vm1387_vm11 = vcmp.gt.f32.partialorder %v1289_v18, 0.0  ;;  %v1419_v32 = vmul.f32 %v2649_v23, %v1289_v18  ;;  %v1291_v17 = vpop.f32.mrf.mxu0 }
 0x16c   : > { %1929 = vst [vmem:[%s2685_s21 + $0x40] sm:$0xff] %v1895_v21   ;;  %vm1403_vm12 = vcmp.gt.f32.partialorder %v1353_v2, 0.0  ;;  %v1435_v27 = vmul.f32 %v2649_v23, %v1353_v2  ;;  %vm1390_vm13 = vcmp.gt.f32.partialorder %v1300_v36, 0.0  ;;  %v1422_v34 = vmul.f32 %v2649_v23, %v1300_v36  ;;  %v1355_v37 = vpop.f32.mrf.mxu1 }
 0x16d   : > { %v1465_v33 = vsel %vm1405_vm10, %v1361_v44, %v1437_v31  ;;  %v1447_v38 = vsel %vm1387_vm11, %v1289_v18, %v1419_v32  ;;  %v1364_v63 = vadd.f32 %v2184_v29, %v2656_v54  ;;  %v1292_v11 = vadd.f32 %v1291_v17, %v2765_v47  ;;  %v2171_v41 = vpop.f32.mrf.mxu0 }
 0x16e   : > { %v1463_v42 = vsel %vm1403_vm12, %v1353_v2, %v1435_v27  ;;  %v1450_v49 = vsel %vm1390_vm13, %v1300_v36, %v1422_v34  ;;  %v1356_v50 = vadd.f32 %v1355_v37, %v2653_v35  ;;  %v1313_v52 = vadd.f32 %v2171_v41, %v2766_v51  ;;  %v2187_v53 = vpop.f32.mrf.mxu1  ;;  %v2771_v27 = vld [vmem:[#allocation8_spill] sm:$0xff]  ;;  %v2773_v51 = vld [vmem:[#allocation9_spill] sm:$0xff] }
 0x16f   : > { %v1870_v55 = vpack.c.bf16 %v1450_v49, %v1449_v8  ;;  %vm1406_vm14 = vcmp.gt.f32.partialorder %v1364_v63, 0.0  ;;  %v1438_v56 = vmul.f32 %v2649_v23, %v1364_v63  ;;  %vm1388_vm15 = vcmp.gt.f32.partialorder %v1292_v11, 0.0  ;;  %v1304_v58 = vpop.f32.mrf.mxu0 }
 0x170   : > { %v1420_v59 = vmul.f32 %v2649_v23, %v1292_v11  ;;  %vm1404_vm0 = vcmp.gt.f32.partialorder %v1356_v50, 0.0  ;;  %v1436_v54 = vmul.f32 %v2649_v23, %v1356_v50  ;;  %vm1393_vm1 = vcmp.gt.f32.partialorder %v1313_v52, 0.0  ;;  %v1368_v61 = vpop.f32.mrf.mxu1 }
 0x171   : > { %1924 = vst [vmem:[%s2685_s21 + $0x18] sm:$0xff] %v1870_v55   ;;  %v1466_v48 = vsel %vm1406_vm14, %v1364_v63, %v1438_v56  ;;  %v1425_v35 = vmul.f32 %v2649_v23, %v1313_v52  ;;  %v1377_v60 = vadd.f32 %v2187_v53, %v2665_v57  ;;  %v1305_v4 = vadd.f32 %v1304_v58, %v2767_v0  ;;  %v2172_v6 = vpop.f32.mrf.mxu0 }
 0x172   : > { %v1910_v9 = vpack.c.bf16 %v1466_v48, %v1465_v33  ;;  %v1448_v62 = vsel %vm1388_vm15, %v1292_v11, %v1420_v59  ;;  %v1464_v19 = vsel %vm1404_vm0, %v1356_v50, %v1436_v54  ;;  %v1369_v1 = vadd.f32 %v1368_v61, %v2658_v39  ;;  %v2188_v12 = vpop.f32.mrf.mxu1 }
 0x173   : > { %v1865_v43 = vpack.c.bf16 %v1448_v62, %v1447_v38  ;;  %v1905_v14 = vpack.c.bf16 %v1464_v19, %v1463_v42  ;;  %v1235_v3 = vadd.f32 %v2667_v40, %v2672_v46  ;;  %v1307_v16 = vpop.f32.mrf.mxu0  ;;  %v1453_v57 = vsel %vm1393_vm1, %v1313_v52, %v1425_v35  ;;  %v2772_v42 = vld [vmem:[#allocation11_spill] sm:$0xff] }
 0x174   : > { %1932 = vst [vmem:[%s2685_s21 + $0x58] sm:$0xff] %v1910_v9   ;;  %vm1409_vm2 = vcmp.gt.f32.partialorder %v1377_v60, 0.0  ;;  %v1441_v5 = vmul.f32 %v2649_v23, %v1377_v60  ;;  %v1227_v7 = vadd.f32 %v2663_v26, %v2661_v45  ;;  %v1371_v20 = vpop.f32.mrf.mxu1  ;;  %v1423_v39 = vmul.f32 %v2649_v23, %v1305_v4  ;;  %v2770_v45 = vld [vmem:[#allocation10_spill] sm:$0xff] }
 0x175   : > { %1923 = vst [vmem:[%s2685_s21 + $0x10] sm:$0xff] %v1865_v43   ;;  %1931 = vst [vmem:[%s2685_s21 + $0x50] sm:$0xff] %v1905_v14   ;;  %v1316_v24 = vadd.f32 %v2172_v6, %v2768_v22  ;;  %v1380_v28 = vadd.f32 %v2188_v12, %v1235_v3  ;;  %v1308_v40 = vadd.f32 %v1307_v16, %v2769_v10  ;;  %v2175_v46 = vpop.f32.mrf.mxu0  ;;  %vm1391_vm3 = vcmp.gt.f32.partialorder %v1305_v4, 0.0 }
 0x176   : > { %vm1407_vm4 = vcmp.gt.f32.partialorder %v1369_v1, 0.0  ;;  %v1439_v13 = vmul.f32 %v2649_v23, %v1369_v1  ;;  %v1372_v15 = vadd.f32 %v1371_v20, %v1227_v7  ;;  %v1329_v26 = vadd.f32 %v2175_v46, %v2770_v45 }
 0x177   : > { %vm1394_vm5 = vcmp.gt.f32.partialorder %v1316_v24, 0.0  ;;  %v1426_v44 = vmul.f32 %v2649_v23, %v1316_v24  ;;  %vm1410_vm6 = vcmp.gt.f32.partialorder %v1380_v28, 0.0  ;;  %v1320_v18 = vpop.f32.mrf.mxu0  ;;  %v1442_v30 = vmul.f32 %v2649_v23, %v1380_v28 }
 0x178   : > { %vm1392_vm7 = vcmp.gt.f32.partialorder %v1308_v40, 0.0  ;;  %v1424_v21 = vmul.f32 %v2649_v23, %v1308_v40  ;;  %vm1408_vm8 = vcmp.gt.f32.partialorder %v1372_v15, 0.0  ;;  %v1469_v8 = vsel %vm1409_vm2, %v1377_v60, %v1441_v5 }
 0x179   : > { %v1451_v2 = vsel %vm1391_vm3, %v1305_v4, %v1423_v39  ;;  %v1454_v25 = vsel %vm1394_vm5, %v1316_v24, %v1426_v44  ;;  %v1440_v36 = vmul.f32 %v2649_v23, %v1372_v15  ;;  %v2176_v29 = vpop.f32.mrf.mxu0  ;;  %v1470_v32 = vsel %vm1410_vm6, %v1380_v28, %v1442_v30 }
 0x17a   : > { %v1880_v31 = vpack.c.bf16 %v1454_v25, %v1453_v57  ;;  %v1452_v17 = vsel %vm1392_vm7, %v1308_v40, %v1424_v21  ;;  %v1321_v34 = vadd.f32 %v1320_v18, %v2771_v27  ;;  %v1467_v37 = vsel %vm1407_vm4, %v1369_v1, %v1439_v13 }
 0x17b   : > { %v1920_v33 = vpack.c.bf16 %v1470_v32, %v1469_v8  ;;  %v1875_v38 = vpack.c.bf16 %v1452_v17, %v1451_v2  ;;  %v1468_v63 = vsel %vm1408_vm8, %v1372_v15, %v1440_v36  ;;  %v1323_v47 = vpop.f32.mrf.mxu0  ;;  %v1429_v41 = vmul.f32 %v2649_v23, %v1329_v26 }
 0x17c   : > { %1926 = vst [vmem:[%s2685_s21 + $0x28] sm:$0xff] %v1880_v31   ;;  %v1915_v11 = vpack.c.bf16 %v1468_v63, %v1467_v37  ;;  %v1332_v49 = vadd.f32 %v2176_v29, %v2772_v42  ;;  %vm1397_vm9 = vcmp.gt.f32.partialorder %v1329_v26, 0.0  ;;  %v1427_v50 = vmul.f32 %v2649_v23, %v1321_v34 }
 0x17d   : > { %1934 = vst [vmem:[%s2685_s21 + $0x68] sm:$0xff] %v1920_v33   ;;  %1925 = vst [vmem:[%s2685_s21 + $0x20] sm:$0xff] %v1875_v38   ;;  %v1324_v52 = vadd.f32 %v1323_v47, %v2773_v51  ;;  %vm1395_vm10 = vcmp.gt.f32.partialorder %v1321_v34, 0.0  ;;  %v1457_v56 = vsel %vm1397_vm9, %v1329_v26, %v1429_v41 }
 0x17e   : > { %1933 = vst [vmem:[%s2685_s21 + $0x60] sm:$0xff] %v1915_v11   ;;  %vm1398_vm11 = vcmp.gt.f32.partialorder %v1332_v49, 0.0  ;;  %v1430_v53 = vmul.f32 %v2649_v23, %v1332_v49  ;;  %v1455_v59 = vsel %vm1395_vm10, %v1321_v34, %v1427_v50 }
 0x17f   : > { %vm1396_vm12 = vcmp.gt.f32.partialorder %v1324_v52, 0.0  ;;  %v1428_v55 = vmul.f32 %v2649_v23, %v1324_v52 }
 0x180   : > { %v1458_v58 = vsel %vm1398_vm11, %v1332_v49, %v1430_v53 }
 0x181   : > { %v1890_v54 = vpack.c.bf16 %v1458_v58, %v1457_v56  ;;  %v1456_v61 = vsel %vm1396_vm12, %v1324_v52, %v1428_v55 }
 0x182   : > { %v1885_v48 = vpack.c.bf16 %v1456_v61, %v1455_v59 }
 0x183   : > { %1928 = vst [vmem:[%s2685_s21 + $0x38] sm:$0xff] %v1890_v54  }
 0x184   : > { %1927 = vst [vmem:[%s2685_s21 + $0x30] sm:$0xff] %v1885_v48  }
 0x185 PF: > { %s13_s12 = sadd.s32 1, %s2346_s12  }
 0x186   : > { %p10_p4 = scmp.ge.s32.totalorder %s13_s12, 4  }
 0x188   :  { %12 = sbr.rel (!%p10_p4) target bundleno = 1 (0x1), region = 62 }

// kernel: onet_forward.6
= control target key start
LH: loop header
LB: loop body
LE: loop exit
PB: predicated region body
PF: predicated region fallthrough
CT: control target
= control target key end

     0   :  { %s1605_s12 = smov 0   ;;  %s1867_s0 = inlined_call_operand.vmem [shape: bf16[64,1152], index: 0, kind: input, shape index: {}]   ;;  %s1868_s1 = inlined_call_operand.vmem [shape: bf16[1152,128], index: 1, kind: input, shape index: {}]   ;;  %s1869_s2 = inlined_call_operand.vmem [shape: f32[2,128], index: 2, kind: input, shape index: {}]   ;;  %s1870_s3 = inlined_call_operand.vmem [shape: bf16[64,128], index: 3, kind: output, shape index: {}]  }
   0x1 LB: > { %s1208_s13 = sadd.s32 4294967295, %s1583_s12   ;;  %p1212_p0 = scmp.ge.s32.totalorder %s1583_s12, 1  ;;  %s1583_s12 = sphi %s1605_s12, %s13_s12  }
   0x2   : > { %p139_p1 = scmp.lt.s32.totalorder %s1583_s12, 3 }
   0x4   : > { %p140_p2 = pnand %p1212_p0, %p139_p1 }
   0x5   : > { %s1213_s17 = sshll.u32 (!%p140_p2), %s1208_s13, 2 }
   0x6   : > { %143 = sbr.rel (%p140_p2) target bundleno = 315 (0x13b), region = 32  ;;  %p165_p3 = scmp.lt.s32.totalorder (!%p140_p2), %s1213_s17, 7 }
   0xb   : > { %v1479_v0 = vld [vmem:[%s1868_s1 + $0x78] sm:$0xff]   ;;  %v1483_v4 = vld [vmem:[%s1868_s1 + $0x70] sm:$0xff]   ;;  %v1487_v8 = vld [vmem:[%s1868_s1 + $0x68] sm:$0xff]   ;;  %s1872_s17 = smov (!%p165_p3, %s1213_s17), 7 }
   0xc   : > { %v1480_v1 = vld [vmem:[%s1868_s1 + $0x38] sm:$0xff]   ;;  %1328 = vmatprep.subr.bf16.mxu0 %v1479_v0  ;;  %v1484_v5 = vld [vmem:[%s1868_s1 + $0x30] sm:$0xff]   ;;  %v1488_v9 = vld [vmem:[%s1868_s1 + $0x28] sm:$0xff]   ;;  %s1470_s14 = smul.u32 36, %s1872_s17  ;;  %s1216_s16 = sshll.u32 %s1872_s17, 2 }
   0xd   : > { %v1481_v2 = vld [vmem:[%s1868_s1 + $0xf8] sm:$0xff]   ;;  %1329 = vmatpush3.bf16.msra.mxu0 %v1480_v1  ;;  %v1485_v6 = vld [vmem:[%s1868_s1 + $0xf0] sm:$0xff]   ;;  %v1489_v10 = vld [vmem:[%s1868_s1 + $0xe8] sm:$0xff]   ;;  %s175_s20 = scalar_lea.vmem %s1870_s3, %s1216_s16 }
   0xe   : > { %v1482_v3 = vld [vmem:[%s1868_s1 + $0xb8] sm:$0xff]   ;;  %1356 = vmatprep.subr.bf16.mxu1 %v1481_v2  ;;  %1330 = vmatprep.subr.bf16.mxu0 %v1483_v4  ;;  %v1486_v7 = vld [vmem:[%s1868_s1 + $0xb0] sm:$0xff]   ;;  %v1490_v11 = vld [vmem:[%s1868_s1 + $0xa8] sm:$0xff]   ;;  %s1708_s13 = scalar_lea.vmem %s1867_s0, %s1470_s14 }
   0xf   : > { %1357 = vmatpush3.bf16.msra.mxu1 %v1482_v3  ;;  %v1491_v12 = vld [vmem:[%s1868_s1 + $0x60] sm:$0xff]   ;;  %v1495_v16 = vld [vmem:[%s1868_s1 + $0x58] sm:$0xff]   ;;  %v1499_v20 = vld [vmem:[%s1868_s1 + $0x50] sm:$0xff]  }
  0x10   : > { %1358 = vmatprep.subr.bf16.mxu1 %v1485_v6  ;;  %v1492_v13 = vld [vmem:[%s1868_s1 + $0x20] sm:$0xff]   ;;  %v1496_v17 = vld [vmem:[%s1868_s1 + $0x18] sm:$0xff]   ;;  %v1500_v21 = vld [vmem:[%s1868_s1 + $0x10] sm:$0xff]  }
  0x11   : > { %1331 = vmatpush3.bf16.msra.mxu0 %v1484_v5  ;;  %v1493_v14 = vld [vmem:[%s1868_s1 + $0xe0] sm:$0xff]   ;;  %v1497_v18 = vld [vmem:[%s1868_s1 + $0xd8] sm:$0xff]   ;;  %v1501_v22 = vld [vmem:[%s1868_s1 + $0xd0] sm:$0xff]  }
  0x12   : > { %1332 = vmatprep.subr.bf16.mxu0 %v1487_v8  ;;  %v1494_v15 = vld [vmem:[%s1868_s1 + $0xa0] sm:$0xff]   ;;  %v1498_v19 = vld [vmem:[%s1868_s1 + $0x98] sm:$0xff]   ;;  %v1502_v23 = vld [vmem:[%s1868_s1 + $0x90] sm:$0xff]  }
  0x13   : > { %1359 = vmatpush3.bf16.msra.mxu1 %v1486_v7  ;;  %v1503_v24 = vld [vmem:[%s1868_s1 + $0x48] sm:$0xff]   ;;  %v1507_v28 = vld [vmem:[%s1868_s1 + $0x40] sm:$0xff]   ;;  %v1514_v34 = vld [vmem:[%s1868_s1 + $0x178] sm:$0xff]  }
  0x14   : > { %1360 = vmatprep.subr.bf16.mxu1 %v1489_v10  ;;  %v1504_v25 = vld [vmem:[%s1868_s1 + $0x8] sm:$0xff]   ;;  %v1508_v29 = vld [vmem:[%s1868_s1] sm:$0xff]   ;;  %v1518_v37 = vld [vmem:[%s1868_s1 + $0x138] sm:$0xff]  }
  0x15   : > { %1333 = vmatpush3.bf16.msra.mxu0 %v1488_v9  ;;  %v1505_v26 = vld [vmem:[%s1868_s1 + $0xc8] sm:$0xff]   ;;  %v1509_v30 = vld [vmem:[%s1868_s1 + $0xc0] sm:$0xff]   ;;  %v1519_v38 = vld [vmem:[%s1868_s1 + $0x1f8] sm:$0xff]  }
  0x16   : > { %1334 = vmatprep.subr.bf16.mxu0 %v1491_v12  ;;  %v1506_v27 = vld [vmem:[%s1868_s1 + $0x88] sm:$0xff]   ;;  %v1510_v31 = vld [vmem:[%s1708_s13] ss:$36 sps:$4 sm:$0xff]   ;;  %v1520_v39 = vld [vmem:[%s1868_s1 + $0x1b8] sm:$0xff]  }
  0x17   : > { %1361 = vmatpush3.bf16.msra.mxu1 %v1490_v11  ;;  %v1512_v32 = vld [vmem:[%s1708_s13 + $0x4] ss:$36 sps:$4 sm:$0xff]   ;;  %v1517_v36 = vld [vmem:[%s1708_s13 + $0xc] ss:$36 sps:$4 sm:$0xff]   ;;  %v1533_v52 = vld [vmem:[%s1868_s1 + $0x158] sm:$0xff]  }
  0x18   : > { %1362 = vmatprep.subr.bf16.mxu1 %v1493_v14  ;;  %v1513_v33 = vld [vmem:[%s1868_s1 + $0x80] sm:$0xff]   ;;  %903 = vmatprep.mubr.bf16.mxu0 %v1512_v32  ;;  %v1515_v35 = vld [vmem:[%s1708_s13 + $0x8] ss:$36 sps:$4 sm:$0xff]   ;;  %v1521_v40 = vld [vmem:[%s1868_s1 + $0x170] sm:$0xff]  }
  0x19   : > { %1335 = vmatpush3.bf16.msra.mxu0 %v1492_v13  ;;  %952 = vmatprep.mubr.bf16.mxu1 %v1517_v36  ;;  %v1522_v41 = vld [vmem:[%s1868_s1 + $0x130] sm:$0xff]   ;;  %v1525_v44 = vld [vmem:[%s1868_s1 + $0x168] sm:$0xff]   ;;  %v1529_v48 = vld [vmem:[%s1868_s1 + $0x160] sm:$0xff]  }
  0x1a   : > { %1336 = vmatprep.subr.bf16.mxu0 %v1495_v16  ;;  %v1523_v42 = vld [vmem:[%s1868_s1 + $0x1f0] sm:$0xff]   ;;  %v1526_v45 = vld [vmem:[%s1868_s1 + $0x128] sm:$0xff]   ;;  %v1530_v49 = vld [vmem:[%s1868_s1 + $0x120] sm:$0xff]  }
  0x1b   : > { %1363 = vmatpush3.bf16.msra.mxu1 %v1494_v15  ;;  %v1524_v43 = vld [vmem:[%s1868_s1 + $0x1b0] sm:$0xff]   ;;  %v1527_v46 = vld [vmem:[%s1868_s1 + $0x1e8] sm:$0xff]   ;;  %v1531_v50 = vld [vmem:[%s1868_s1 + $0x1e0] sm:$0xff]  }
  0x1c   : > { %1364 = vmatprep.subr.bf16.mxu1 %v1497_v18  ;;  %v1528_v47 = vld [vmem:[%s1868_s1 + $0x1a8] sm:$0xff]   ;;  %v1532_v51 = vld [vmem:[%s1868_s1 + $0x1a0] sm:$0xff]   ;;  %v1534_v53 = vld [vmem:[%s1868_s1 + $0x118] sm:$0xff]  }
  0x1d   : > { %1337 = vmatpush3.bf16.msra.mxu0 %v1496_v17  ;;  %v1535_v54 = vld [vmem:[%s1708_s13 + $0x4c] ss:$36 sps:$4 sm:$0xff]   ;;  %v1537_v55 = vld [vmem:[%s1868_s1 + $0x1d8] sm:$0xff]   ;;  %v1551_v4 = vld [vmem:[%s1868_s1 + $0x140] sm:$0xff]  }
  0x1e   : > { %1338 = vmatprep.subr.bf16.mxu0 %v1499_v20  ;;  %v1538_v56 = vld [vmem:[%s1708_s13 + $0x48] ss:$36 sps:$4 sm:$0xff]   ;;  %v1539_v57 = vld [vmem:[%s1868_s1 + $0x198] sm:$0xff]   ;;  %v1542_v59 = vld [vmem:[%s1868_s1 + $0x150] sm:$0xff]  }
  0x1f   : > { %1365 = vmatpush3.bf16.msra.mxu1 %v1498_v19  ;;  %v1540_v58 = vld [vmem:[%s1708_s13 + $0x54] ss:$36 sps:$4 sm:$0xff]   ;;  %v1547_v0 = vld [vmem:[%s1868_s1 + $0x148] sm:$0xff]   ;;  %v1552_v5 = vld [vmem:[%s1868_s1 + $0x100] sm:$0xff]  }
  0x20   : > { %1366 = vmatprep.subr.bf16.mxu1 %v1501_v22  ;;  %v1543_v60 = vld [vmem:[%s1708_s13 + $0x50] ss:$36 sps:$4 sm:$0xff]   ;;  %v1548_v1 = vld [vmem:[%s1868_s1 + $0x108] sm:$0xff]   ;;  %v1553_v6 = vld [vmem:[%s1868_s1 + $0x1c0] sm:$0xff]  }
  0x21   : > { %1339 = vmatpush3.bf16.msra.mxu0 %v1500_v21  ;;  %v1544_v61 = vld [vmem:[%s1868_s1 + $0x110] sm:$0xff]   ;;  %v1549_v2 = vld [vmem:[%s1868_s1 + $0x1c8] sm:$0xff]   ;;  %v1557_v9 = vld [vmem:[%s1868_s1 + $0x180] sm:$0xff]  }
  0x22   : > { %1340 = vmatprep.subr.bf16.mxu0 %v1503_v24  ;;  %v1545_v62 = vld [vmem:[%s1868_s1 + $0x1d0] sm:$0xff]   ;;  %v1550_v3 = vld [vmem:[%s1868_s1 + $0x188] sm:$0xff]   ;;  %v1558_v10 = vld [vmem:[%s1868_s1 + $0x238] sm:$0xff]  }
  0x23   : > { %1367 = vmatpush3.bf16.msra.mxu1 %v1502_v23  ;;  %v1546_v63 = vld [vmem:[%s1868_s1 + $0x190] sm:$0xff]   ;;  %v1559_v11 = vld [vmem:[%s1708_s13 + $0x18] ss:$36 sps:$4 sm:$0xff]   ;;  %v1566_v16 = vld [vmem:[%s1868_s1 + $0x228] sm:$0xff]  }
  0x24   : > { %1368 = vmatprep.subr.bf16.mxu1 %v1505_v26  ;;  %v1554_v7 = vld [vmem:[%s1708_s13 + $0x10] ss:$36 sps:$4 sm:$0xff]   ;;  %v1561_v12 = vld [vmem:[%s1708_s13 + $0x1c] ss:$36 sps:$4 sm:$0xff]   ;;  %v1567_v17 = vld [vmem:[%s1708_s13 + $0x64] ss:$36 sps:$4 sm:$0xff]  }
  0x25   : > { %1341 = vmatpush3.bf16.msra.mxu0 %v1504_v25  ;;  %v1556_v8 = vld [vmem:[%s1708_s13 + $0x14] ss:$36 sps:$4 sm:$0xff]   ;;  %v1563_v14 = vld [vmem:[%s1708_s13 + $0x5c] ss:$36 sps:$4 sm:$0xff]   ;;  %v1573_v23 = vld [vmem:[%s1868_s1 + $0x208] sm:$0xff]  }
  0x26   : > { %1342 = vmatprep.subr.bf16.mxu0 %v1507_v28  ;;  %v1562_v13 = vld [vmem:[%s1868_s1 + $0x230] sm:$0xff]   ;;  %v1565_v15 = vld [vmem:[%s1708_s13 + $0x58] ss:$36 sps:$4 sm:$0xff]   ;;  %v1569_v18 = vld [vmem:[%s1708_s13 + $0x60] ss:$36 sps:$4 sm:$0xff]  }
  0x27   : > { %1369 = vmatpush3.bf16.msra.mxu1 %v1506_v27  ;;  %v1570_v19 = vld [vmem:[%s1868_s1 + $0x220] sm:$0xff]   ;;  %v1571_v20 = vld [vmem:[%s1868_s1 + $0x218] sm:$0xff]   ;;  %v1572_v22 = vld [vmem:[%s1868_s1 + $0x210] sm:$0xff]  }
  0x28   : > { %1370 = vmatprep.subr.bf16.mxu1 %v1509_v30  ;;  %v1575_v21 = vld [vmem:[%s1708_s13 + $0x20] ss:$36 sps:$4 sm:$0xff]   ;;  %v1576_v25 = vld [vmem:[%s1708_s13 + $0x68] ss:$36 sps:$4 sm:$0xff]  }
  0x29   : > { %1343 = vmatpush3.bf16.msra.mxu0 %v1508_v29  ;;  %v1574_v24 = vld [vmem:[%s1868_s1 + $0x200] sm:$0xff]  }
  0x2a   : > { %1384 = vmatprep.subr.bf16.mxu0 %v1514_v34 }
  0x2b   : > { %1371 = vmatpush3.bf16.msra.mxu1 %v1513_v33 }
  0x2c   : > { %904 = vmatmul.mubr.bf16.vlgmr.msra.gmra.mxu0 %v1510_v31  ;;  %1412 = vmatprep.subr.bf16.mxu1 %v1519_v38 }
  0x2d   : > { %1385 = vmatpush3.bf16.msra.mxu0 %v1518_v37  ;;  %911 = vmatprep.mubr.bf16.mxu0 %v1535_v54  ;;  %v342_v54 = vld [vmem:[%s1869_s2] sm:$0x3] }
  0x2e   : > { %953 = vmatmul.mubr.bf16.vlgmr.msra.gmra.mxu1 %v1515_v35  ;;  %1386 = vmatprep.subr.bf16.mxu0 %v1521_v40 }
  0x2f   : > { %1413 = vmatpush3.bf16.msra.mxu1 %v1520_v39  ;;  %960 = vmatprep.mubr.bf16.mxu1 %v1540_v58 }
  0x30   : > { %1414 = vmatprep.subr.bf16.mxu1 %v1523_v42 }
  0x31   : > { %1387 = vmatpush3.bf16.msra.mxu0 %v1522_v41 }
  0x32   : > { %1388 = vmatprep.subr.bf16.mxu0 %v1525_v44 }
  0x33   : > { %1415 = vmatpush3.bf16.msra.mxu1 %v1524_v43 }
  0x34   : > { %1416 = vmatprep.subr.bf16.mxu1 %v1527_v46  ;;  %912 = vmatmul.mubr.bf16.gmra.mxu0 %v1538_v56 }
  0x35   : > { %1389 = vmatpush3.bf16.msra.mxu0 %v1526_v45  ;;  %1001 = vmatprep.mubr.bf16.mxu0 %v1556_v8 }
  0x36   : > { %1390 = vmatprep.subr.bf16.mxu0 %v1529_v48  ;;  %961 = vmatmul.mubr.bf16.gmra.mxu1 %v1543_v60 }
  0x37   : > { %1417 = vmatpush3.bf16.msra.mxu1 %v1528_v47  ;;  %1050 = vmatprep.mubr.bf16.mxu1 %v1561_v12  ;;  %v343_v47 = vlaneseq }
  0x38   : > { %1418 = vmatprep.subr.bf16.mxu1 %v1531_v50 }
  0x39   : > { %1391 = vmatpush3.bf16.msra.mxu0 %v1530_v49  ;;  %v344_v50 = vshrl.u32 %v343_v47, 7 }
  0x3a   : > { %1392 = vmatprep.subr.bf16.mxu0 %v1533_v52 }
  0x3b   : > { %1419 = vmatpush3.bf16.msra.mxu1 %v1532_v51 }
  0x3c   : > { %1420 = vmatprep.subr.bf16.mxu1 %v1537_v55 }
  0x3d   : > { %1393 = vmatpush3.bf16.msra.mxu0 %v1534_v53  ;;  %v345_v53 = vsub.s32 0, %v344_v50 }
  0x3e   : > { %1394 = vmatprep.subr.bf16.mxu0 %v1542_v59 }
  0x3f   : > { %1421 = vmatpush3.bf16.msra.mxu1 %v1539_v57  ;;  %v346_v57 = vrot.slane %v342_v54, %v345_v53 }
  0x40   : > { %1422 = vmatprep.subr.bf16.mxu1 %v1545_v62 }
  0x41   : > { %1395 = vmatpush3.bf16.msra.mxu0 %v1544_v61 }
  0x42   : > { %1396 = vmatprep.subr.bf16.mxu0 %v1547_v0 }
  0x43   : > { %1423 = vmatpush3.bf16.msra.mxu1 %v1546_v63 }
  0x44   : > { %1424 = vmatprep.subr.bf16.mxu1 %v1549_v2 }
  0x45   : > { %1397 = vmatpush3.bf16.msra.mxu0 %v1548_v1 }
  0x46   : > { %1398 = vmatprep.subr.bf16.mxu0 %v1551_v4 }
  0x47   : > { %1425 = vmatpush3.bf16.msra.mxu1 %v1550_v3 }
  0x48   : > { %1426 = vmatprep.subr.bf16.mxu1 %v1553_v6 }
  0x49   : > { %1399 = vmatpush3.bf16.msra.mxu0 %v1552_v5 }
  0x4a   : > { %1450 = vmatprep.subr.bf16.mxu0 %v1558_v10 }
  0x4b   : > { %1427 = vmatpush3.bf16.msra.mxu1 %v1557_v9 }
  0x4c   : > { %1002 = vmatmul.mubr.bf16.vlgmr.msra.gmra.mxu0 %v1554_v7 }
  0x4d   : > { %1451 = vmatpush3.bf16.msra.mxu0 %v1558_v10  ;;  %1009 = vmatprep.mubr.bf16.mxu0 %v1563_v14 }
  0x4e   : > { %1051 = vmatmul.mubr.bf16.vlgmr.msra.gmra.mxu1 %v1559_v11  ;;  %1452 = vmatprep.subr.bf16.mxu0 %v1562_v13 }
  0x4f   : > { %1058 = vmatprep.mubr.bf16.mxu1 %v1567_v17 }
  0x51   : > { %1453 = vmatpush3.bf16.msra.mxu0 %v1562_v13 }
  0x52   : > { %1454 = vmatprep.subr.bf16.mxu0 %v1566_v16 }
  0x54   : > { %1010 = vmatmul.mubr.bf16.gmra.mxu0 %v1565_v15 }
  0x55   : > { %1455 = vmatpush3.bf16.msra.mxu0 %v1566_v16  ;;  %1466 = vmatprep.mubr.bf16.mxu0 %v1575_v21 }
  0x56   : > { %1059 = vmatmul.mubr.bf16.gmra.mxu1 %v1569_v18  ;;  %1456 = vmatprep.subr.bf16.mxu0 %v1570_v19 }
  0x59   : > { %1457 = vmatpush3.bf16.msra.mxu0 %v1570_v19 }
  0x5a   : > { %1458 = vmatprep.subr.bf16.mxu0 %v1571_v20 }
  0x5d   : > { %1459 = vmatpush3.bf16.msra.mxu0 %v1571_v20 }
  0x5e   : > { %1460 = vmatprep.subr.bf16.mxu0 %v1572_v22 }
  0x61   : > { %1461 = vmatpush3.bf16.msra.mxu0 %v1572_v22 }
  0x62   : > { %1462 = vmatprep.subr.bf16.mxu0 %v1573_v23 }
  0x65   : > { %1463 = vmatpush3.bf16.msra.mxu0 %v1573_v23 }
  0x66   : > { %1464 = vmatprep.subr.bf16.mxu0 %v1574_v24 }
  0x69   : > { %1465 = vmatpush3.bf16.msra.mxu0 %v1574_v24 }
  0x6c   : > { %1467 = vmatmul.mubr.bf16.vlgmr.msra.gmra.mxu0 %v1576_v25  ;;  %v1122_v25 = vsub.s32 1, %v344_v50 }
  0xec   : > { %v1344_v26 = vpop.f32.mrf.mxu0 }
  0xee   : > { %v1372_v27 = vpop.f32.mrf.mxu1  ;;  %v1345_v28 = vpop.f32.mrf.mxu0 }
  0xef   : > { %v1346_v58 = vadd.f32 %v1345_v28, %v1344_v26 }
  0xf0   : > { %v1373_v29 = vpop.f32.mrf.mxu1  ;;  %v1347_v30 = vpop.f32.mrf.mxu0 }
  0xf1   : > { %v906_v63 = vadd.f32 %v1346_v58, %v346_v57  ;;  %v1374_v0 = vadd.f32 %v1373_v29, %v1372_v27 }
  0xf2   : > { %v1375_v31 = vpop.f32.mrf.mxu1  ;;  %v1348_v32 = vpop.f32.mrf.mxu0 }
  0xf3   : > { %v1349_v1 = vadd.f32 %v1348_v32, %v1347_v30  ;;  %v955_v10 = vadd.f32 %v1374_v0, %v906_v63 }
  0xf4   : > { %v1350_v33 = vpop.f32.mrf.mxu0  ;;  %v1376_v34 = vpop.f32.mrf.mxu1 }
  0xf5   : > { %v909_v11 = vadd.f32 %v1349_v1, %v346_v57  ;;  %v1377_v12 = vadd.f32 %v1376_v34, %v1375_v31  ;;  %v1123_v34 = vrot.slane %v342_v54, %v1122_v25 }
  0xf6   : > { %v1378_v35 = vpop.f32.mrf.mxu1  ;;  %v1351_v36 = vpop.f32.mrf.mxu0 }
  0xf7   : > { %v1352_v59 = vadd.f32 %v1351_v36, %v1350_v33  ;;  %v958_v22 = vadd.f32 %v1377_v12, %v909_v11 }
  0xf8   : > { %v1379_v37 = vpop.f32.mrf.mxu1  ;;  %v1353_v38 = vpop.f32.mrf.mxu0 }
  0xf9   : > { %v914_v2 = vadd.f32 %v1352_v59, %v346_v57  ;;  %v1380_v3 = vadd.f32 %v1379_v37, %v1378_v35 }
  0xfa   : > { %v1381_v39 = vpop.f32.mrf.mxu1  ;;  %v1354_v40 = vpop.f32.mrf.mxu0 }
  0xfb   : > { %v1355_v62 = vadd.f32 %v1354_v40, %v1353_v38  ;;  %v963_v14 = vadd.f32 %v1380_v3, %v914_v2 }
  0xfc   : > { %v1382_v42 = vpop.f32.mrf.mxu1 }
  0xfd   : > { %v917_v6 = vadd.f32 %v1355_v62, %v346_v57  ;;  %v1383_v7 = vadd.f32 %v1382_v42, %v1381_v39 }
  0xff   : > { %v966_v16 = vadd.f32 %v1383_v7, %v917_v6 }
 0x10c   : > { %v1400_v41 = vpop.f32.mrf.mxu0 }
 0x10e   : > { %v1401_v43 = vpop.f32.mrf.mxu0  ;;  %v1428_v44 = vpop.f32.mrf.mxu1 }
 0x10f   : > { %v1402_v8 = vadd.f32 %v1401_v43, %v1400_v41 }
 0x110   : > { %v1403_v45 = vpop.f32.mrf.mxu0  ;;  %v1429_v46 = vpop.f32.mrf.mxu1 }
 0x111   : > { %v1004_v17 = vadd.f32 %v1402_v8, %v955_v10  ;;  %v1430_v18 = vadd.f32 %v1429_v46, %v1428_v44 }
 0x112   : > { %v1404_v48 = vpop.f32.mrf.mxu0  ;;  %v1431_v49 = vpop.f32.mrf.mxu1 }
 0x113   : > { %v1405_v19 = vadd.f32 %v1404_v48, %v1403_v45  ;;  %v1053_v29 = vadd.f32 %v1430_v18, %v1004_v17 }
 0x114   : > { %v1406_v51 = vpop.f32.mrf.mxu0  ;;  %v1432_v52 = vpop.f32.mrf.mxu1 }
 0x115   : > { %v1007_v27 = vadd.f32 %v1405_v19, %v958_v22  ;;  %v1433_v28 = vadd.f32 %v1432_v52, %v1431_v49 }
 0x116   : > { %v1407_v55 = vpop.f32.mrf.mxu0  ;;  %v1434_v56 = vpop.f32.mrf.mxu1 }
 0x117   : > { %v1408_v9 = vadd.f32 %v1407_v55, %v1406_v51  ;;  %v1056_v38 = vadd.f32 %v1433_v28, %v1007_v27 }
 0x118   : > { %v1409_v60 = vpop.f32.mrf.mxu0  ;;  %v1435_v61 = vpop.f32.mrf.mxu1 }
 0x119   : > { %v1012_v20 = vadd.f32 %v1408_v9, %v963_v14  ;;  %v1436_v21 = vadd.f32 %v1435_v61, %v1434_v56 }
 0x11a   : > { %v1410_v4 = vpop.f32.mrf.mxu0  ;;  %v1437_v5 = vpop.f32.mrf.mxu1 }
 0x11b   : > { %v1411_v13 = vadd.f32 %v1410_v4, %v1409_v60  ;;  %v1061_v30 = vadd.f32 %v1436_v21, %v1012_v20 }
 0x11c   : > { %v1438_v15 = vpop.f32.mrf.mxu1 }
 0x11d   : > { %v1015_v23 = vadd.f32 %v1411_v13, %v966_v16  ;;  %v1439_v24 = vadd.f32 %v1438_v15, %v1437_v5 }
 0x11f   : > { %v1064_v33 = vadd.f32 %v1439_v24, %v1015_v23 }
 0x12c   : > { %v1468_v26 = vpop.f32.mrf.mxu0 }
 0x12d   : > { %v1110_v35 = vadd.f32 %v1468_v26, %v1061_v30 }
 0x12e   : > { %v1101_v31 = vpop.f32.mrf.mxu0 }
 0x12f   : > { %v1102_v32 = vadd.f32 %v1101_v31, %v1053_v29  ;;  %v1126_v43 = vmul.f32 %v1123_v34, %v1110_v35  ;;  %vm1118_vm2 = vcmp.gt.f32.partialorder %v1110_v35, 0.0 }
 0x130   : > { %v1469_v36 = vpop.f32.mrf.mxu0 }
 0x131   : > { %v1113_v37 = vadd.f32 %v1469_v36, %v1064_v33  ;;  %v1124_v40 = vmul.f32 %v1123_v34, %v1102_v32  ;;  %vm1116_vm1 = vcmp.gt.f32.partialorder %v1102_v32, 0.0  ;;  %v1130_v48 = vsel %vm1118_vm2, %v1110_v35, %v1126_v43 }
 0x132   : > { %v1104_v39 = vpop.f32.mrf.mxu0 }
 0x133   : > { %vm1119_vm0 = vcmp.gt.f32.partialorder %v1113_v37, 0.0  ;;  %v1127_v41 = vmul.f32 %v1123_v34, %v1113_v37  ;;  %v1105_v42 = vadd.f32 %v1104_v39, %v1056_v38  ;;  %v1128_v46 = vsel %vm1116_vm1, %v1102_v32, %v1124_v40 }
 0x135   : > { %vm1117_vm3 = vcmp.gt.f32.partialorder %v1105_v42, 0.0  ;;  %v1125_v44 = vmul.f32 %v1123_v34, %v1105_v42  ;;  %v1131_v45 = vsel %vm1119_vm0, %v1113_v37, %v1127_v41 }
 0x136   : > { %v1325_v50 = vpack.c.bf16 %v1131_v45, %v1130_v48 }
 0x137   : > { %v1129_v47 = vsel %vm1117_vm3, %v1105_v42, %v1125_v44 }
 0x138   : > { %v1320_v49 = vpack.c.bf16 %v1129_v47, %v1128_v46  ;;  %1327 = vst [vmem:[%s175_s20 + $0x8] sm:$0xff] %v1325_v50  }
 0x13a   : > { %1321 = vst [vmem:[%s175_s20] sm:$0xff] %v1320_v49  }
 0x13b PF: > { %s13_s12 = sadd.s32 1, %s1583_s12  }
 0x13c   : > { %p10_p4 = scmp.ge.s32.totalorder %s13_s12, 4  }
 0x13e   :  { %12 = sbr.rel (!%p10_p4) target bundleno = 1 (0x1), region = 62 }

// kernel: onet_forward.7
= control target key start
LH: loop header
LB: loop body
LE: loop exit
PB: predicated region body
PF: predicated region fallthrough
CT: control target
= control target key end

     0   :  { %v3004_v50 = vmov 0   ;;  %s3709_s1 = inlined_call_operand.vmem [shape: bf16[256,128], index: 1, kind: input, shape index: {}]   ;;  %s3710_s0 = inlined_call_operand.vmem [shape: bf16[9,16,256], index: 0, kind: input, shape index: {}]   ;;  %s3711_s3 = inlined_call_operand.vmem [shape: bf16[9,128,256], index: 3, kind: input, shape index: {}]   ;;  %s3712_s2 = inlined_call_operand.vmem [shape: f32[2,128], index: 2, kind: input, shape index: {}]   ;;  %s3713_s5 = inlined_call_operand.vmem [shape: bf16[256,128], index: 5, kind: input, shape index: {}]   ;;  %s3714_s4 = inlined_call_operand.vmem [shape: f32[2,256], index: 4, kind: input, shape index: {}]   ;;  %s3715_s6 = inlined_call_operand.vmem [shape: f32[1,128], index: 6, kind: input, shape index: {}]   ;;  %s3716_s7 = inlined_call_operand.vmem [shape: f32[16,128], index: 7, kind: output, shape index: {}]  }
   0x1   :  { %v2720_v0 = vld [vmem:[%s3709_s1 + $0x78] sm:$0xff]   ;;  %v2722_v2 = vld [vmem:[%s3709_s1 + $0x70] sm:$0xff]   ;;  %v2724_v4 = vld [vmem:[%s3709_s1 + $0x68] sm:$0xff]   ;;  %665 = vmatprep.mubr.bf16.mxu1 %v3004_v50 }
   0x2   :  { %v2721_v1 = vld [vmem:[%s3709_s1 + $0x38] sm:$0xff]   ;;  %2627 = vmatprep.subr.bf16.mxu0 %v2720_v0  ;;  %v2723_v3 = vld [vmem:[%s3709_s1 + $0x30] sm:$0xff]   ;;  %v2725_v5 = vld [vmem:[%s3709_s1 + $0x28] sm:$0xff]  }
   0x3   :  { %2628 = vmatpush3.bf16.msra.mxu0 %v2721_v1  ;;  %v2726_v6 = vld [vmem:[%s3709_s1 + $0x60] sm:$0xff]   ;;  %v2728_v8 = vld [vmem:[%s3709_s1 + $0x58] sm:$0xff]   ;;  %v2730_v10 = vld [vmem:[%s3709_s1 + $0x50] sm:$0xff]  }
   0x4   :  { %2629 = vmatprep.subr.bf16.mxu0 %v2722_v2  ;;  %v2727_v7 = vld [vmem:[%s3709_s1 + $0x20] sm:$0xff]   ;;  %v2729_v9 = vld [vmem:[%s3709_s1 + $0x18] sm:$0xff]   ;;  %v2731_v12 = vld [vmem:[%s3709_s1 + $0x10] sm:$0xff]  }
   0x5   :  { %v2738_v11 = vld [vmem:[%s3710_s0 + $0x4] ss:$8 sps:$4 sm:$0xff]   ;;  %v2736_v17 = vld [vmem:[%s3710_s0] ss:$8 sps:$4 sm:$0xff]   ;;  %v2763_v18 = vld [vmem:[%s3711_s3 + $0x74] ss:$8 sps:$4 sm:$0xff]  }
   0x6   :  { %300 = vmatprep.mubr.bf16.mxu0 %v2738_v11  ;;  %v2732_v13 = vld [vmem:[%s3709_s1 + $0x48] sm:$0xff]   ;;  %v2734_v15 = vld [vmem:[%s3709_s1 + $0x40] sm:$0xff]   ;;  %v2739_v19 = vld [vmem:[%s3710_s0 + $0x14] ss:$8 sps:$4 sm:$0xff]   ;;  %633 = vmatprep.subr.bf16.mxu1 %v2763_v18 }
   0x7   :  { %2630 = vmatpush3.bf16.msra.mxu0 %v2723_v3  ;;  %v2733_v14 = vld [vmem:[%s3709_s1 + $0x8] sm:$0xff]   ;;  %v2735_v16 = vld [vmem:[%s3709_s1] sm:$0xff]   ;;  %v2765_v20 = vld [vmem:[%s3711_s3 + $0x70] ss:$8 sps:$4 sm:$0xff]  }
   0x8   :  { %2631 = vmatprep.subr.bf16.mxu0 %v2724_v4  ;;  %v2766_v21 = vld [vmem:[%s3711_s3 + $0x64] ss:$8 sps:$4 sm:$0xff]   ;;  %v2768_v22 = vld [vmem:[%s3711_s3 + $0x60] ss:$8 sps:$4 sm:$0xff]   ;;  %634 = vmatpush1.bf16.msra.mxu1 %v2765_v20  ;;  %v2741_v23 = vld [vmem:[%s3710_s0 + $0x10] ss:$8 sps:$4 sm:$0xff]  }
   0x9   :  { %635 = vmatprep.subr.bf16.mxu1 %v2766_v21  ;;  %v2742_v24 = vld [vmem:[%s3710_s0 + $0x24] ss:$8 sps:$4 sm:$0xff]   ;;  %v2744_v25 = vld [vmem:[%s3710_s0 + $0x20] ss:$8 sps:$4 sm:$0xff]   ;;  %v2745_v26 = vld [vmem:[%s3710_s0 + $0x34] ss:$8 sps:$4 sm:$0xff]  }
   0xa   :  { %v2747_v27 = vld [vmem:[%s3710_s0 + $0x30] ss:$8 sps:$4 sm:$0xff]   ;;  %v2748_v28 = vld [vmem:[%s3710_s0 + $0x44] ss:$8 sps:$4 sm:$0xff]   ;;  %v2750_v29 = vld [vmem:[%s3710_s0 + $0x40] ss:$8 sps:$4 sm:$0xff]  }
   0xb   :  { %2632 = vmatpush3.bf16.msra.mxu0 %v2725_v5  ;;  %v2751_v30 = vld [vmem:[%s3710_s0 + $0x54] ss:$8 sps:$4 sm:$0xff]   ;;  %v2753_v31 = vld [vmem:[%s3710_s0 + $0x50] ss:$8 sps:$4 sm:$0xff]   ;;  %v2754_v32 = vld [vmem:[%s3710_s0 + $0x64] ss:$8 sps:$4 sm:$0xff]   ;;  %v78_v5 = vlaneseq }
   0xc   :  { %2633 = vmatprep.subr.bf16.mxu0 %v2726_v6  ;;  %636 = vmatpush1.bf16.msra.mxu1 %v2768_v22  ;;  %v2756_v33 = vld [vmem:[%s3710_s0 + $0x60] ss:$8 sps:$4 sm:$0xff]   ;;  %v2757_v34 = vld [vmem:[%s3710_s0 + $0x74] ss:$8 sps:$4 sm:$0xff]   ;;  %v2759_v35 = vld [vmem:[%s3710_s0 + $0x70] ss:$8 sps:$4 sm:$0xff]  }
   0xd   :  { %v2760_v36 = vld [vmem:[%s3710_s0 + $0x84] ss:$8 sps:$4 sm:$0xff]   ;;  %v2762_v37 = vld [vmem:[%s3710_s0 + $0x80] ss:$8 sps:$4 sm:$0xff]   ;;  %v2769_v38 = vld [vmem:[%s3711_s3 + $0x54] ss:$8 sps:$4 sm:$0xff]  }
   0xe   :  { %v2771_v39 = vld [vmem:[%s3711_s3 + $0x50] ss:$8 sps:$4 sm:$0xff]   ;;  %637 = vmatprep.subr.bf16.mxu1 %v2769_v38  ;;  %v2772_v40 = vld [vmem:[%s3711_s3 + $0x44] ss:$8 sps:$4 sm:$0xff]   ;;  %v2774_v41 = vld [vmem:[%s3711_s3 + $0x40] ss:$8 sps:$4 sm:$0xff]  }
   0xf   :  { %2634 = vmatpush3.bf16.msra.mxu0 %v2727_v7  ;;  %v2775_v42 = vld [vmem:[%s3711_s3 + $0x34] ss:$8 sps:$4 sm:$0xff]   ;;  %v2777_v43 = vld [vmem:[%s3711_s3 + $0x30] ss:$8 sps:$4 sm:$0xff]   ;;  %v2778_v44 = vld [vmem:[%s3711_s3 + $0x24] ss:$8 sps:$4 sm:$0xff]  }
  0x10   :  { %2635 = vmatprep.subr.bf16.mxu0 %v2728_v8  ;;  %638 = vmatpush1.bf16.msra.mxu1 %v2771_v39  ;;  %v2780_v45 = vld [vmem:[%s3711_s3 + $0x20] ss:$8 sps:$4 sm:$0xff]   ;;  %v2781_v46 = vld [vmem:[%s3711_s3 + $0x14] ss:$8 sps:$4 sm:$0xff]   ;;  %v2783_v47 = vld [vmem:[%s3711_s3 + $0x10] ss:$8 sps:$4 sm:$0xff]  }
  0x11   :  { %639 = vmatprep.subr.bf16.mxu1 %v2772_v40  ;;  %v2784_v48 = vld [vmem:[%s3711_s3 + $0x4] ss:$8 sps:$4 sm:$0xff]   ;;  %v2786_v49 = vld [vmem:[%s3711_s3] ss:$8 sps:$4 sm:$0xff]   ;;  %v2789_v51 = vld [vmem:[%s3711_s3 + $0xf4] ss:$8 sps:$4 sm:$0xff]  }
  0x12   :  { %v2806_v52 = vld [vmem:[%s3711_s3 + $0x1f0] ss:$8 sps:$4 sm:$0xff]   ;;  %v2808_v53 = vld [vmem:[%s3711_s3 + $0x1f4] ss:$8 sps:$4 sm:$0xff]   ;;  %v2815_v54 = vld [vmem:[%s3711_s3 + $0x1e0] ss:$8 sps:$4 sm:$0xff]  }
  0x13   :  { %2636 = vmatpush3.bf16.msra.mxu0 %v2729_v9  ;;  %v2817_v55 = vld [vmem:[%s3711_s3 + $0x1e4] ss:$8 sps:$4 sm:$0xff]   ;;  %v2828_v56 = vld [vmem:[%s3711_s3 + $0x1d0] ss:$8 sps:$4 sm:$0xff]   ;;  %v2830_v57 = vld [vmem:[%s3711_s3 + $0x1d4] ss:$8 sps:$4 sm:$0xff]  }
  0x14   :  { %2637 = vmatprep.subr.bf16.mxu0 %v2730_v10  ;;  %640 = vmatpush1.bf16.msra.mxu1 %v2774_v41  ;;  %v2836_v58 = vld [vmem:[%s3711_s3 + $0x1c4] ss:$8 sps:$4 sm:$0xff]   ;;  %v2834_v59 = vld [vmem:[%s3711_s3 + $0x1c0] ss:$8 sps:$4 sm:$0xff]   ;;  %v2842_v60 = vld [vmem:[%s3711_s3 + $0x1b4] ss:$8 sps:$4 sm:$0xff]  }
  0x15   :  { %641 = vmatprep.subr.bf16.mxu1 %v2775_v42  ;;  %v2840_v61 = vld [vmem:[%s3711_s3 + $0x1b0] ss:$8 sps:$4 sm:$0xff]   ;;  %v2848_v62 = vld [vmem:[%s3711_s3 + $0x1a4] ss:$8 sps:$4 sm:$0xff]   ;;  %v2846_v63 = vld [vmem:[%s3711_s3 + $0x1a0] ss:$8 sps:$4 sm:$0xff]  }
  0x16   :  { %v2854_v0 = vld [vmem:[%s3711_s3 + $0x194] ss:$8 sps:$4 sm:$0xff]   ;;  %v2852_v1 = vld [vmem:[%s3711_s3 + $0x190] ss:$8 sps:$4 sm:$0xff]   ;;  %v2860_v2 = vld [vmem:[%s3711_s3 + $0x184] ss:$8 sps:$4 sm:$0xff]  }
  0x17   :  { %2638 = vmatpush3.bf16.msra.mxu0 %v2731_v12  ;;  %v2858_v3 = vld [vmem:[%s3711_s3 + $0x180] ss:$8 sps:$4 sm:$0xff]   ;;  %v2868_v4 = vld [vmem:[%s3711_s3 + $0x2f4] ss:$8 sps:$4 sm:$0xff]   ;;  %v3251_v6 = vshrl.u32 %v78_v5, 7 }
  0x18   :  { %2639 = vmatprep.subr.bf16.mxu0 %v2732_v13  ;;  %642 = vmatpush1.bf16.msra.mxu1 %v2777_v43  ;;  %v45_v8 = vld [vmem:[%s3712_s2] sm:$0x3]  ;;  %v2787_v42 = vld [vmem:[%s3711_s3 + $0xf0] ss:$8 sps:$4 sm:$0xff]   ;;  %v2793_v43 = vld [vmem:[%s3711_s3 + $0xe4] ss:$8 sps:$4 sm:$0xff]  }
  0x19   :  { %643 = vmatprep.subr.bf16.mxu1 %v2778_v44  ;;  %v3254_v7 = vsub.s32 0, %v3251_v6  ;;  %v3263_v11 = vsub.s32 1, %v3251_v6  ;;  %v2797_v5 = vld [vmem:[%s3711_s3 + $0xc0] ss:$8 sps:$4 sm:$0xff]  }
  0x1b   :  { %2640 = vmatpush3.bf16.msra.mxu0 %v2733_v14  ;;  %v3260_v10 = vrot.slane %v45_v8, %v3254_v7 }
  0x1c   :  { %2641 = vmatprep.subr.bf16.mxu0 %v2734_v15  ;;  %644 = vmatpush1.bf16.msra.mxu1 %v2780_v45 }
  0x1d   :  { %645 = vmatprep.subr.bf16.mxu1 %v2781_v46 }
  0x1f   :  { %2642 = vmatpush3.bf16.msra.mxu0 %v2735_v16  ;;  %v3267_v16 = vrot.slane %v45_v8, %v3263_v11 }
  0x20   :  { %646 = vmatpush1.bf16.msra.mxu1 %v2783_v47  ;;  %1113 = vmatprep.subr.bf16.mxu0 %v2808_v53 }
  0x21   :  { %647 = vmatprep.subr.bf16.mxu1 %v2784_v48 }
  0x22   :  { %301 = vmatmul.mubr.bf16.vlgmr.msra.gmra.mxu0 %v2736_v17 }
  0x23   :  { %308 = vmatprep.mubr.bf16.mxu0 %v2739_v19  ;;  %1114 = vmatpush1.bf16.msra.mxu0 %v2806_v52  ;;  %v2791_v52 = vld [vmem:[%s3711_s3 + $0xe0] ss:$8 sps:$4 sm:$0xff]  }
  0x24   :  { %648 = vmatpush1.bf16.msra.mxu1 %v2786_v49  ;;  %1115 = vmatprep.subr.bf16.mxu0 %v2817_v55 }
  0x25   :  { %793 = vmatprep.subr.bf16.mxu1 %v2789_v51 }
  0x27   :  { %1116 = vmatpush1.bf16.msra.mxu0 %v2815_v54  ;;  %v2796_v54 = vld [vmem:[%s3711_s3 + $0xd4] ss:$8 sps:$4 sm:$0xff]  }
  0x28   :  { %1117 = vmatprep.subr.bf16.mxu0 %v2830_v57 }
  0x2a   :  { %309 = vmatmul.mubr.bf16.gmra.mxu0 %v2741_v23 }
  0x2b   :  { %316 = vmatprep.mubr.bf16.mxu0 %v2742_v24  ;;  %1118 = vmatpush1.bf16.msra.mxu0 %v2828_v56 }
  0x2c   :  { %1119 = vmatprep.subr.bf16.mxu0 %v2836_v58 }
  0x2f   :  { %1120 = vmatpush1.bf16.msra.mxu0 %v2834_v59 }
  0x30   :  { %1121 = vmatprep.subr.bf16.mxu0 %v2842_v60 }
  0x32   :  { %317 = vmatmul.mubr.bf16.gmra.mxu0 %v2744_v25 }
  0x33   :  { %324 = vmatprep.mubr.bf16.mxu0 %v2745_v26  ;;  %1122 = vmatpush1.bf16.msra.mxu0 %v2840_v61  ;;  %v2794_v61 = vld [vmem:[%s3711_s3 + $0xd0] ss:$8 sps:$4 sm:$0xff]  }
  0x34   :  { %1123 = vmatprep.subr.bf16.mxu0 %v2848_v62 }
  0x37   :  { %1124 = vmatpush1.bf16.msra.mxu0 %v2846_v63 }
  0x38   :  { %1125 = vmatprep.subr.bf16.mxu0 %v2854_v0  ;;  %v2799_v0 = vld [vmem:[%s3711_s3 + $0xc4] ss:$8 sps:$4 sm:$0xff]  }
  0x3a   :  { %325 = vmatmul.mubr.bf16.gmra.mxu0 %v2747_v27 }
  0x3b   :  { %332 = vmatprep.mubr.bf16.mxu0 %v2748_v28  ;;  %1126 = vmatpush1.bf16.msra.mxu0 %v2852_v1 }
  0x3c   :  { %1127 = vmatprep.subr.bf16.mxu0 %v2860_v2 }
  0x3f   :  { %1128 = vmatpush1.bf16.msra.mxu0 %v2858_v3 }
  0x40   :  { %1433 = vmatprep.subr.bf16.mxu0 %v2868_v4 }
  0x42   :  { %333 = vmatmul.mubr.bf16.gmra.mxu0 %v2750_v29 }
  0x43   :  { %340 = vmatprep.mubr.bf16.mxu0 %v2751_v30 }
  0x4a   :  { %341 = vmatmul.mubr.bf16.gmra.mxu0 %v2753_v31 }
  0x4b   :  { %348 = vmatprep.mubr.bf16.mxu0 %v2754_v32 }
  0x52   :  { %349 = vmatmul.mubr.bf16.gmra.mxu0 %v2756_v33 }
  0x53   :  { %356 = vmatprep.mubr.bf16.mxu0 %v2757_v34 }
  0x5a   :  { %357 = vmatmul.mubr.bf16.gmra.mxu0 %v2759_v35 }
  0x5b   :  { %364 = vmatprep.mubr.bf16.mxu0 %v2760_v36 }
  0x62   :  { %365 = vmatmul.mubr.bf16.gmra.mxu0 %v2762_v37 }
  0x63   :  { %1145 = vmatprep.mubr.bf16.mxu0 %v3004_v50 }
  0xe2   :  { %v2643_v9 = vpop.f32.mrf.mxu0 }
  0xe4   :  { %v2644_v12 = vpop.f32.mrf.mxu0 }
  0xe5   :  { %v2645_v13 = vadd.f32 %v2644_v12, %v2643_v9  ;;  %v2802_v9 = vld [vmem:[%s3711_s3 + $0xb4] ss:$8 sps:$4 sm:$0xff]  }
  0xe6   :  { %v2646_v14 = vpop.f32.mrf.mxu0 }
  0xe7   :  { %v303_v15 = vadd.f32 %v2645_v13, %v3260_v10 }
  0xe8   :  { %v2647_v17 = vpop.f32.mrf.mxu0 }
  0xe9   :  { %v2648_v18 = vadd.f32 %v2647_v17, %v2646_v14  ;;  %v395_v20 = vmul.f32 %v3267_v16, %v303_v15  ;;  %vm373_vm0 = vcmp.gt.f32.partialorder %v303_v15, 0.0 }
  0xea   :  { %v2649_v19 = vpop.f32.mrf.mxu0 }
  0xeb   :  { %v306_v21 = vadd.f32 %v2648_v18, %v3260_v10  ;;  %v413_v26 = vsel %vm373_vm0, %v303_v15, %v395_v20 }
  0xec   :  { %v2650_v22 = vpop.f32.mrf.mxu0 }
  0xed   :  { %vm374_vm1 = vcmp.gt.f32.partialorder %v306_v21, 0.0  ;;  %v396_v23 = vmul.f32 %v3267_v16, %v306_v21  ;;  %v2651_v24 = vadd.f32 %v2650_v22, %v2649_v19  ;;  %v2800_v19 = vld [vmem:[%s3711_s3 + $0xb0] ss:$8 sps:$4 sm:$0xff]   ;;  %v2805_v22 = vld [vmem:[%s3711_s3 + $0xa4] ss:$8 sps:$4 sm:$0xff]  }
  0xee   :  { %v2652_v25 = vpop.f32.mrf.mxu0 }
  0xef   :  { %v414_v27 = vsel %vm374_vm1, %v306_v21, %v396_v23  ;;  %v311_v28 = vadd.f32 %v2651_v24, %v3260_v10 }
  0xf0   :  { %v2577_v29 = vpack.c.bf16 %v414_v27, %v413_v26  ;;  %v2653_v30 = vpop.f32.mrf.mxu0  ;;  %v2803_v27 = vld [vmem:[%s3711_s3 + $0xa0] ss:$8 sps:$4 sm:$0xff]  }
  0xf1   :  { %v397_v31 = vmul.f32 %v3267_v16, %v311_v28  ;;  %v2654_v32 = vadd.f32 %v2653_v30, %v2652_v25  ;;  %vm375_vm2 = vcmp.gt.f32.partialorder %v311_v28, 0.0 }
  0xf2   :  { %2578 = vst [vmem:[#allocation2] sm:$0xff] %v2577_v29   ;;  %v2655_v33 = vpop.f32.mrf.mxu0  ;;  %v2811_v29 = vld [vmem:[%s3711_s3 + $0x94] ss:$8 sps:$4 sm:$0xff]  }
  0xf3   :  { %v314_v34 = vadd.f32 %v2654_v32, %v3260_v10  ;;  %v415_v36 = vsel %vm375_vm2, %v311_v28, %v397_v31 }
  0xf4   :  { %v2656_v35 = vpop.f32.mrf.mxu0 }
  0xf5   :  { %vm376_vm3 = vcmp.gt.f32.partialorder %v314_v34, 0.0  ;;  %v398_v37 = vmul.f32 %v3267_v16, %v314_v34  ;;  %v2657_v38 = vadd.f32 %v2656_v35, %v2655_v33 }
  0xf6   :  { %v2658_v39 = vpop.f32.mrf.mxu0 }
  0xf7   :  { %v416_v40 = vsel %vm376_vm3, %v314_v34, %v398_v37  ;;  %v319_v41 = vadd.f32 %v2657_v38, %v3260_v10  ;;  %v2809_v34 = vld [vmem:[%s3711_s3 + $0x90] ss:$8 sps:$4 sm:$0xff]   ;;  %v2814_v37 = vld [vmem:[%s3711_s3 + $0x84] ss:$8 sps:$4 sm:$0xff]  }
  0xf8   :  { %v2582_v44 = vpack.c.bf16 %v416_v40, %v415_v36  ;;  %v2659_v45 = vpop.f32.mrf.mxu0  ;;  %v2866_v38 = vld [vmem:[%s3711_s3 + $0x2f0] ss:$8 sps:$4 sm:$0xff]   ;;  %v2874_v40 = vld [vmem:[%s3711_s3 + $0x2e4] ss:$8 sps:$4 sm:$0xff]  }
  0xf9   :  { %v2790_v46 = vld [vmem:[#allocation2] sm:$0xff]   ;;  %v399_v47 = vmul.f32 %v3267_v16, %v319_v41  ;;  %v2660_v48 = vadd.f32 %v2659_v45, %v2658_v39  ;;  %vm377_vm4 = vcmp.gt.f32.partialorder %v319_v41, 0.0 }
  0xfa   :  { %2619 = vst [vmem:[#allocation2 + $0x8] sm:$0xff] %v2582_v44   ;;  %v2661_v49 = vpop.f32.mrf.mxu0  ;;  %666 = vmatmul.mubr.bf16.vlgmr.msra.gmra.mxu1 %v2790_v46 }
  0xfb   :  { %v322_v51 = vadd.f32 %v2660_v48, %v3260_v10  ;;  %794 = vmatpush1.bf16.msra.mxu1 %v2787_v42  ;;  %825 = vmatprep.mubr.bf16.mxu1 %v3004_v50  ;;  %v417_v55 = vsel %vm377_vm4, %v319_v41, %v399_v47  ;;  %v2812_v47 = vld [vmem:[%s3711_s3 + $0x80] ss:$8 sps:$4 sm:$0xff]  }
  0xfc   :  { %v2662_v53 = vpop.f32.mrf.mxu0  ;;  %795 = vmatprep.subr.bf16.mxu1 %v2793_v43  ;;  %v2872_v48 = vld [vmem:[%s3711_s3 + $0x2e0] ss:$8 sps:$4 sm:$0xff]  }
  0xfd   :  { %vm378_vm5 = vcmp.gt.f32.partialorder %v322_v51, 0.0  ;;  %v400_v56 = vmul.f32 %v3267_v16, %v322_v51  ;;  %v2663_v57 = vadd.f32 %v2662_v53, %v2661_v49  ;;  %v2880_v53 = vld [vmem:[%s3711_s3 + $0x2d4] ss:$8 sps:$4 sm:$0xff]  }
  0xfe   :  { %v2664_v58 = vpop.f32.mrf.mxu0 }
  0xff   :  { %v418_v59 = vsel %vm378_vm5, %v322_v51, %v400_v56  ;;  %v327_v60 = vadd.f32 %v2663_v57, %v3260_v10  ;;  %796 = vmatpush1.bf16.msra.mxu1 %v2791_v52  ;;  %v2821_v51 = vld [vmem:[%s3711_s3 + $0x174] ss:$8 sps:$4 sm:$0xff]  }
 0x100   :  { %v2587_v62 = vpack.c.bf16 %v418_v59, %v417_v55  ;;  %v2665_v63 = vpop.f32.mrf.mxu0  ;;  %797 = vmatprep.subr.bf16.mxu1 %v2796_v54  ;;  %v2819_v59 = vld [vmem:[%s3711_s3 + $0x170] ss:$8 sps:$4 sm:$0xff]  }
 0x101   :  { %v401_v1 = vmul.f32 %v3267_v16, %v327_v60  ;;  %v2666_v2 = vadd.f32 %v2665_v63, %v2664_v58  ;;  %vm379_vm6 = vcmp.gt.f32.partialorder %v327_v60, 0.0 }
 0x102   :  { %2620 = vst [vmem:[#allocation2 + $0x10] sm:$0xff] %v2587_v62   ;;  %v2667_v3 = vpop.f32.mrf.mxu0 }
 0x103   :  { %v330_v4 = vadd.f32 %v2666_v2, %v3260_v10  ;;  %798 = vmatpush1.bf16.msra.mxu1 %v2794_v61  ;;  %v419_v12 = vsel %vm379_vm6, %v327_v60, %v401_v1  ;;  %v2824_v60 = vld [vmem:[%s3711_s3 + $0x164] ss:$8 sps:$4 sm:$0xff]   ;;  %v2878_v61 = vld [vmem:[%s3711_s3 + $0x2d0] ss:$8 sps:$4 sm:$0xff]  }
 0x104   :  { %v2668_v8 = vpop.f32.mrf.mxu0  ;;  %799 = vmatprep.subr.bf16.mxu1 %v2799_v0  ;;  %v2818_v0 = vld [vmem:[#allocation2 + $0x8] sm:$0xff]  }
 0x105   :  { %vm380_vm7 = vcmp.gt.f32.partialorder %v330_v4, 0.0  ;;  %v402_v13 = vmul.f32 %v3267_v16, %v330_v4  ;;  %v2669_v14 = vadd.f32 %v2668_v8, %v2667_v3  ;;  %v2886_v3 = vld [vmem:[%s3711_s3 + $0x2c4] ss:$8 sps:$4 sm:$0xff]   ;;  %v2822_v8 = vld [vmem:[%s3711_s3 + $0x160] ss:$8 sps:$4 sm:$0xff]  }
 0x106   :  { %v2670_v15 = vpop.f32.mrf.mxu0 }
 0x107   :  { %v420_v17 = vsel %vm380_vm7, %v330_v4, %v402_v13  ;;  %v335_v18 = vadd.f32 %v2669_v14, %v3260_v10  ;;  %800 = vmatpush1.bf16.msra.mxu1 %v2797_v5  ;;  %v2884_v13 = vld [vmem:[%s3711_s3 + $0x2c0] ss:$8 sps:$4 sm:$0xff]  }
 0x108   :  { %v2592_v20 = vpack.c.bf16 %v420_v17, %v419_v12  ;;  %v2671_v21 = vpop.f32.mrf.mxu0  ;;  %801 = vmatprep.subr.bf16.mxu1 %v2802_v9  ;;  %v2827_v12 = vld [vmem:[%s3711_s3 + $0x154] ss:$8 sps:$4 sm:$0xff]  }
 0x109   :  { %v403_v23 = vmul.f32 %v3267_v16, %v335_v18  ;;  %v2672_v24 = vadd.f32 %v2671_v21, %v2670_v15  ;;  %vm381_vm8 = vcmp.gt.f32.partialorder %v335_v18, 0.0 }
 0x10a   :  { %2621 = vst [vmem:[#allocation2 + $0x18] sm:$0xff] %v2592_v20   ;;  %v2673_v25 = vpop.f32.mrf.mxu0 }
 0x10b   :  { %v338_v26 = vadd.f32 %v2672_v24, %v3260_v10  ;;  %802 = vmatpush1.bf16.msra.mxu1 %v2800_v19  ;;  %v421_v30 = vsel %vm381_vm8, %v335_v18, %v403_v23  ;;  %v2892_v18 = vld [vmem:[%s3711_s3 + $0x2b4] ss:$8 sps:$4 sm:$0xff]   ;;  %v2833_v23 = vld [vmem:[%s3711_s3 + $0x144] ss:$8 sps:$4 sm:$0xff]  }
 0x10c   :  { %v2674_v28 = vpop.f32.mrf.mxu0  ;;  %803 = vmatprep.subr.bf16.mxu1 %v2805_v22  ;;  %v2825_v22 = vld [vmem:[%s3711_s3 + $0x150] ss:$8 sps:$4 sm:$0xff]  }
 0x10d   :  { %vm382_vm9 = vcmp.gt.f32.partialorder %v338_v26, 0.0  ;;  %v404_v31 = vmul.f32 %v3267_v16, %v338_v26  ;;  %v2675_v32 = vadd.f32 %v2674_v28, %v2673_v25 }
 0x10e   :  { %v2676_v33 = vpop.f32.mrf.mxu0 }
 0x10f   :  { %v422_v35 = vsel %vm382_vm9, %v338_v26, %v404_v31  ;;  %v343_v36 = vadd.f32 %v2675_v32, %v3260_v10  ;;  %804 = vmatpush1.bf16.msra.mxu1 %v2803_v27  ;;  %v2890_v26 = vld [vmem:[%s3711_s3 + $0x2b0] ss:$8 sps:$4 sm:$0xff]   ;;  %v2831_v32 = vld [vmem:[%s3711_s3 + $0x140] ss:$8 sps:$4 sm:$0xff]  }
 0x110   :  { %v2597_v39 = vpack.c.bf16 %v422_v35, %v421_v30  ;;  %v2677_v41 = vpop.f32.mrf.mxu0  ;;  %805 = vmatprep.subr.bf16.mxu1 %v2811_v29  ;;  %v2898_v29 = vld [vmem:[%s3711_s3 + $0x2a4] ss:$8 sps:$4 sm:$0xff]   ;;  %v2896_v35 = vld [vmem:[%s3711_s3 + $0x2a0] ss:$8 sps:$4 sm:$0xff]  }
 0x111   :  { %v2865_v42 = vld [vmem:[#allocation2 + $0x18] sm:$0xff]   ;;  %v405_v43 = vmul.f32 %v3267_v16, %v343_v36  ;;  %v2678_v44 = vadd.f32 %v2677_v41, %v2676_v33  ;;  %vm383_vm10 = vcmp.gt.f32.partialorder %v343_v36, 0.0 }
 0x112   :  { %2622 = vst [vmem:[#allocation2 + $0x20] sm:$0xff] %v2597_v39   ;;  %v2679_v45 = vpop.f32.mrf.mxu0  ;;  %1146 = vmatmul.mubr.bf16.vlgmr.msra.gmra.mxu0 %v2865_v42  ;;  %v2904_v39 = vld [vmem:[%s3711_s3 + $0x294] ss:$8 sps:$4 sm:$0xff]  }
 0x113   :  { %v346_v46 = vadd.f32 %v2678_v44, %v3260_v10  ;;  %806 = vmatpush1.bf16.msra.mxu1 %v2809_v34  ;;  %1434 = vmatpush1.bf16.msra.mxu0 %v2866_v38  ;;  %v423_v52 = vsel %vm383_vm10, %v343_v36, %v405_v43  ;;  %v2839_v34 = vld [vmem:[%s3711_s3 + $0x134] ss:$8 sps:$4 sm:$0xff]   ;;  %v2837_v43 = vld [vmem:[%s3711_s3 + $0x130] ss:$8 sps:$4 sm:$0xff]   ;;  %v2845_v44 = vld [vmem:[%s3711_s3 + $0x124] ss:$8 sps:$4 sm:$0xff]  }
 0x114   :  { %v2680_v49 = vpop.f32.mrf.mxu0  ;;  %807 = vmatprep.subr.bf16.mxu1 %v2814_v37  ;;  %1435 = vmatprep.subr.bf16.mxu0 %v2874_v40 }
 0x115   :  { %vm384_vm11 = vcmp.gt.f32.partialorder %v346_v46, 0.0  ;;  %v406_v54 = vmul.f32 %v3267_v16, %v346_v46  ;;  %v2681_v55 = vadd.f32 %v2680_v49, %v2679_v45  ;;  %1465 = vmatprep.mubr.bf16.mxu0 %v3004_v50  ;;  %v2902_v45 = vld [vmem:[%s3711_s3 + $0x290] ss:$8 sps:$4 sm:$0xff]  }
 0x116   :  { %v2682_v56 = vpop.f32.mrf.mxu0 }
 0x117   :  { %v424_v57 = vsel %vm384_vm11, %v346_v46, %v406_v54  ;;  %v351_v58 = vadd.f32 %v2681_v55, %v3260_v10  ;;  %808 = vmatpush1.bf16.msra.mxu1 %v2812_v47  ;;  %1436 = vmatpush1.bf16.msra.mxu0 %v2872_v48  ;;  %v2843_v54 = vld [vmem:[%s3711_s3 + $0x120] ss:$8 sps:$4 sm:$0xff]   ;;  %v2851_v55 = vld [vmem:[%s3711_s3 + $0x114] ss:$8 sps:$4 sm:$0xff]  }
 0x118   :  { %v2602_v62 = vpack.c.bf16 %v424_v57, %v423_v52  ;;  %v2683_v63 = vpop.f32.mrf.mxu0  ;;  %953 = vmatprep.subr.bf16.mxu1 %v2821_v51  ;;  %1437 = vmatprep.subr.bf16.mxu0 %v2880_v53  ;;  %v2910_v51 = vld [vmem:[%s3711_s3 + $0x284] ss:$8 sps:$4 sm:$0xff]  }
 0x119   :  { %v407_v1 = vmul.f32 %v3267_v16, %v351_v58  ;;  %v2684_v2 = vadd.f32 %v2683_v63, %v2682_v56  ;;  %vm385_vm12 = vcmp.gt.f32.partialorder %v351_v58, 0.0  ;;  %v2908_v56 = vld [vmem:[%s3711_s3 + $0x280] ss:$8 sps:$4 sm:$0xff]   ;;  %v2924_v63 = vld [vmem:[%s3711_s3 + $0x3e4] ss:$8 sps:$4 sm:$0xff]  }
 0x11a   :  { %2623 = vst [vmem:[#allocation2 + $0x28] sm:$0xff] %v2602_v62   ;;  %v2685_v4 = vpop.f32.mrf.mxu0  ;;  %826 = vmatmul.mubr.bf16.vlgmr.msra.gmra.mxu1 %v2818_v0  ;;  %v2855_v0 = vld [vmem:[%s3711_s3 + $0x100] ss:$8 sps:$4 sm:$0xff]  }
 0x11b   :  { %v354_v5 = vadd.f32 %v2684_v2, %v3260_v10  ;;  %954 = vmatpush1.bf16.msra.mxu1 %v2819_v59  ;;  %985 = vmatprep.mubr.bf16.mxu1 %v3004_v50  ;;  %v425_v14 = vsel %vm385_vm12, %v351_v58, %v407_v1  ;;  %v2849_v59 = vld [vmem:[%s3711_s3 + $0x110] ss:$8 sps:$4 sm:$0xff]   ;;  %v2864_v1 = vld [vmem:[%s3711_s3 + $0x274] ss:$8 sps:$4 sm:$0xff]   ;;  %v2922_v2 = vld [vmem:[%s3711_s3 + $0x3e0] ss:$8 sps:$4 sm:$0xff]  }
 0x11c   :  { %v2686_v9 = vpop.f32.mrf.mxu0  ;;  %955 = vmatprep.subr.bf16.mxu1 %v2824_v60  ;;  %1438 = vmatpush1.bf16.msra.mxu0 %v2878_v61  ;;  %v2857_v60 = vld [vmem:[%s3711_s3 + $0x104] ss:$8 sps:$4 sm:$0xff]  }
 0x11d   :  { %vm386_vm13 = vcmp.gt.f32.partialorder %v354_v5, 0.0  ;;  %v408_v15 = vmul.f32 %v3267_v16, %v354_v5  ;;  %v2687_v17 = vadd.f32 %v2686_v9, %v2685_v4  ;;  %1439 = vmatprep.subr.bf16.mxu0 %v2886_v3  ;;  %v2930_v3 = vld [vmem:[%s3711_s3 + $0x3d4] ss:$8 sps:$4 sm:$0xff]   ;;  %v2862_v4 = vld [vmem:[%s3711_s3 + $0x270] ss:$8 sps:$4 sm:$0xff]  }
 0x11e   :  { %v2688_v19 = vpop.f32.mrf.mxu0  ;;  %v2861_v9 = vld [vmem:[#allocation2 + $0x10] sm:$0xff]  }
 0x11f   :  { %v426_v20 = vsel %vm386_vm13, %v354_v5, %v408_v15  ;;  %v359_v21 = vadd.f32 %v2687_v17, %v3260_v10  ;;  %956 = vmatpush1.bf16.msra.mxu1 %v2822_v8  ;;  %v2871_v5 = vld [vmem:[%s3711_s3 + $0x264] ss:$8 sps:$4 sm:$0xff]   ;;  %v2928_v8 = vld [vmem:[%s3711_s3 + $0x3d0] ss:$8 sps:$4 sm:$0xff]   ;;  %v2934_v15 = vld [vmem:[%s3711_s3 + $0x3c0] ss:$8 sps:$4 sm:$0xff]  }
 0x120   :  { %v2607_v24 = vpack.c.bf16 %v426_v20, %v425_v14  ;;  %v2689_v25 = vpop.f32.mrf.mxu0  ;;  %957 = vmatprep.subr.bf16.mxu1 %v2827_v12  ;;  %1440 = vmatpush1.bf16.msra.mxu0 %v2884_v13  ;;  %v2936_v12 = vld [vmem:[%s3711_s3 + $0x3c4] ss:$8 sps:$4 sm:$0xff]   ;;  %v2869_v13 = vld [vmem:[%s3711_s3 + $0x260] ss:$8 sps:$4 sm:$0xff]   ;;  %v2877_v14 = vld [vmem:[%s3711_s3 + $0x254] ss:$8 sps:$4 sm:$0xff]  }
 0x121   :  { %v409_v27 = vmul.f32 %v3267_v16, %v359_v21  ;;  %v2690_v28 = vadd.f32 %v2689_v25, %v2688_v19  ;;  %1441 = vmatprep.subr.bf16.mxu0 %v2892_v18  ;;  %vm387_vm14 = vcmp.gt.f32.partialorder %v359_v21, 0.0  ;;  %v2915_v61 = vld [vmem:[#allocation2 + $0x28] sm:$0xff]   ;;  %v2942_v17 = vld [vmem:[%s3711_s3 + $0x3b4] ss:$8 sps:$4 sm:$0xff]   ;;  %v2875_v18 = vld [vmem:[%s3711_s3 + $0x250] ss:$8 sps:$4 sm:$0xff]  }
 0x122   :  { %2624 = vst [vmem:[#allocation2 + $0x30] sm:$0xff] %v2607_v24   ;;  %v2691_v30 = vpop.f32.mrf.mxu0  ;;  %v2883_v19 = vld [vmem:[%s3711_s3 + $0x244] ss:$8 sps:$4 sm:$0xff]   ;;  %v2940_v20 = vld [vmem:[%s3711_s3 + $0x3b0] ss:$8 sps:$4 sm:$0xff]  }
 0x123   :  { %v362_v31 = vadd.f32 %v2690_v28, %v3260_v10  ;;  %958 = vmatpush1.bf16.msra.mxu1 %v2825_v22  ;;  %v427_v36 = vsel %vm387_vm14, %v359_v21, %v409_v27  ;;  %v2948_v21 = vld [vmem:[%s3711_s3 + $0x3a4] ss:$8 sps:$4 sm:$0xff]   ;;  %v2881_v22 = vld [vmem:[%s3711_s3 + $0x240] ss:$8 sps:$4 sm:$0xff]   ;;  %v2954_v25 = vld [vmem:[%s3711_s3 + $0x394] ss:$8 sps:$4 sm:$0xff]  }
 0x124   :  { %v2692_v33 = vpop.f32.mrf.mxu0  ;;  %959 = vmatprep.subr.bf16.mxu1 %v2833_v23  ;;  %1442 = vmatpush1.bf16.msra.mxu0 %v2890_v26  ;;  %v2889_v23 = vld [vmem:[%s3711_s3 + $0x234] ss:$8 sps:$4 sm:$0xff]   ;;  %v2946_v24 = vld [vmem:[%s3711_s3 + $0x3a0] ss:$8 sps:$4 sm:$0xff]   ;;  %v2887_v26 = vld [vmem:[%s3711_s3 + $0x230] ss:$8 sps:$4 sm:$0xff]  }
 0x125   :  { %vm388_vm15 = vcmp.gt.f32.partialorder %v362_v31, 0.0  ;;  %v410_v37 = vmul.f32 %v3267_v16, %v362_v31  ;;  %v2693_v38 = vadd.f32 %v2692_v33, %v2691_v30  ;;  %1443 = vmatprep.subr.bf16.mxu0 %v2898_v29  ;;  %v2895_v27 = vld [vmem:[%s3711_s3 + $0x224] ss:$8 sps:$4 sm:$0xff]   ;;  %v2952_v28 = vld [vmem:[%s3711_s3 + $0x390] ss:$8 sps:$4 sm:$0xff]  }
 0x126   :  { %v2694_v40 = vpop.f32.mrf.mxu0  ;;  %v2960_v29 = vld [vmem:[%s3711_s3 + $0x384] ss:$8 sps:$4 sm:$0xff]   ;;  %v2893_v30 = vld [vmem:[%s3711_s3 + $0x220] ss:$8 sps:$4 sm:$0xff]   ;;  %v2899_v33 = vld [vmem:[%s3711_s3 + $0x210] ss:$8 sps:$4 sm:$0xff]  }
 0x127   :  { %v428_v41 = vsel %vm388_vm15, %v362_v31, %v410_v37  ;;  %v367_v42 = vadd.f32 %v2693_v38, %v3260_v10  ;;  %960 = vmatpush1.bf16.msra.mxu1 %v2831_v32  ;;  %v2901_v31 = vld [vmem:[%s3711_s3 + $0x214] ss:$8 sps:$4 sm:$0xff]   ;;  %v2958_v32 = vld [vmem:[%s3711_s3 + $0x380] ss:$8 sps:$4 sm:$0xff]   ;;  %v2912_v38 = vld [vmem:[%s3711_s3 + $0x370] ss:$8 sps:$4 sm:$0xff]  }
 0x128   :  { %v2612_v46 = vpack.c.bf16 %v428_v41, %v427_v36  ;;  %v2695_v47 = vpop.f32.mrf.mxu0  ;;  %961 = vmatprep.subr.bf16.mxu1 %v2839_v34  ;;  %1444 = vmatpush1.bf16.msra.mxu0 %v2896_v35  ;;  %v2907_v35 = vld [vmem:[%s3711_s3 + $0x204] ss:$8 sps:$4 sm:$0xff]   ;;  %v2905_v36 = vld [vmem:[%s3711_s3 + $0x200] ss:$8 sps:$4 sm:$0xff]   ;;  %v2914_v37 = vld [vmem:[%s3711_s3 + $0x374] ss:$8 sps:$4 sm:$0xff]  }
 0x129   :  { %vm389_vm0 = vcmp.gt.f32.partialorder %v367_v42, 0.0  ;;  %v411_v48 = vmul.f32 %v3267_v16, %v367_v42  ;;  %v2696_v49 = vadd.f32 %v2695_v47, %v2694_v40  ;;  %1445 = vmatprep.subr.bf16.mxu0 %v2904_v39  ;;  %v2911_v39 = vld [vmem:[#allocation2 + $0x20] sm:$0xff]   ;;  %v2937_v47 = vld [vmem:[%s3711_s3 + $0x330] ss:$8 sps:$4 sm:$0xff]  }
 0x12a   :  { %2625 = vst [vmem:[#allocation2 + $0x38] sm:$0xff] %v2612_v46   ;;  %v2921_v40 = vld [vmem:[%s3711_s3 + $0x364] ss:$8 sps:$4 sm:$0xff]   ;;  %v2919_v41 = vld [vmem:[%s3711_s3 + $0x360] ss:$8 sps:$4 sm:$0xff]  }
 0x12b   :  { %v429_v52 = vsel %vm389_vm0, %v367_v42, %v411_v48  ;;  %v370_v53 = vadd.f32 %v2696_v49, %v3260_v10  ;;  %962 = vmatpush1.bf16.msra.mxu1 %v2837_v43  ;;  %v2918_v10 = vld [vmem:[%s3711_s3 + $0x3f4] ss:$8 sps:$4 sm:$0xff]   ;;  %v2925_v43 = vld [vmem:[%s3711_s3 + $0x350] ss:$8 sps:$4 sm:$0xff]   ;;  %v2945_v48 = vld [vmem:[%s3711_s3 + $0x324] ss:$8 sps:$4 sm:$0xff]  }
 0x12c   :  { %963 = vmatprep.subr.bf16.mxu1 %v2845_v44  ;;  %1446 = vmatpush1.bf16.msra.mxu0 %v2902_v45  ;;  %v2927_v42 = vld [vmem:[%s3711_s3 + $0x354] ss:$8 sps:$4 sm:$0xff]   ;;  %v2933_v44 = vld [vmem:[%s3711_s3 + $0x344] ss:$8 sps:$4 sm:$0xff]   ;;  %v2931_v45 = vld [vmem:[%s3711_s3 + $0x340] ss:$8 sps:$4 sm:$0xff]  }
 0x12d   :  { %vm390_vm1 = vcmp.gt.f32.partialorder %v370_v53, 0.0  ;;  %v412_v57 = vmul.f32 %v3267_v16, %v370_v53  ;;  %1447 = vmatprep.subr.bf16.mxu0 %v2910_v51  ;;  %v2916_v16 = vld [vmem:[%s3711_s3 + $0x3f0] ss:$8 sps:$4 sm:$0xff]   ;;  %v2939_v46 = vld [vmem:[%s3711_s3 + $0x334] ss:$8 sps:$4 sm:$0xff]  }
 0x12e   :  { %v2943_v49 = vld [vmem:[%s3711_s3 + $0x320] ss:$8 sps:$4 sm:$0xff]   ;;  %v2951_v51 = vld [vmem:[%s3711_s3 + $0x314] ss:$8 sps:$4 sm:$0xff]  }
 0x12f   :  { %v430_v58 = vsel %vm390_vm1, %v370_v53, %v412_v57  ;;  %964 = vmatpush1.bf16.msra.mxu1 %v2843_v54  ;;  %v2957_v53 = vld [vmem:[%s3711_s3 + $0x304] ss:$8 sps:$4 sm:$0xff]   ;;  %v2955_v54 = vld [vmem:[%s3711_s3 + $0x300] ss:$8 sps:$4 sm:$0xff]   ;;  %v2961_v57 = vld [vmem:[#allocation2 + $0x30] sm:$0xff]  }
 0x130   :  { %v2617_v62 = vpack.c.bf16 %v430_v58, %v429_v52  ;;  %965 = vmatprep.subr.bf16.mxu1 %v2851_v55  ;;  %1448 = vmatpush1.bf16.msra.mxu0 %v2908_v56  ;;  %v2949_v52 = vld [vmem:[%s3711_s3 + $0x310] ss:$8 sps:$4 sm:$0xff]   ;;  %v2964_v55 = vld [vmem:[%s3711_s3 + $0x474] ss:$8 sps:$4 sm:$0xff]   ;;  %v2966_v58 = vld [vmem:[%s3711_s3 + $0x460] ss:$8 sps:$4 sm:$0xff]  }
 0x131   :  { %1753 = vmatprep.subr.bf16.mxu0 %v2918_v10  ;;  %v2965_v34 = vld [vmem:[#allocation2 + $0x38] sm:$0xff]   ;;  %v2968_v10 = vld [vmem:[%s3711_s3 + $0x464] ss:$8 sps:$4 sm:$0xff]  }
 0x132   :  { %2626 = vst [vmem:[#allocation2 + $0x40] sm:$0xff] %v2617_v62   ;;  %v2962_v56 = vld [vmem:[%s3711_s3 + $0x470] ss:$8 sps:$4 sm:$0xff]   ;;  %v2977_v62 = vld [vmem:[%s3711_s3 + $0x434] ss:$8 sps:$4 sm:$0xff]  }
 0x133   :  { %966 = vmatpush1.bf16.msra.mxu1 %v2849_v59  ;;  %1466 = vmatmul.mubr.bf16.vlgmr.msra.gmra.mxu0 %v2915_v61  ;;  %v2971_v59 = vld [vmem:[%s3711_s3 + $0x454] ss:$8 sps:$4 sm:$0xff]   ;;  %v2974_v61 = vld [vmem:[%s3711_s3 + $0x444] ss:$8 sps:$4 sm:$0xff]  }
 0x134   :  { %967 = vmatprep.subr.bf16.mxu1 %v2857_v60  ;;  %1754 = vmatpush1.bf16.msra.mxu0 %v2916_v16  ;;  %v2969_v60 = vld [vmem:[%s3711_s3 + $0x450] ss:$8 sps:$4 sm:$0xff]  }
 0x135   :  { %1755 = vmatprep.subr.bf16.mxu0 %v2924_v63  ;;  %1785 = vmatprep.mubr.bf16.mxu0 %v3004_v50  ;;  %v2975_v16 = vld [vmem:[%s3711_s3 + $0x430] ss:$8 sps:$4 sm:$0xff]   ;;  %v2980_v63 = vld [vmem:[%s3711_s3 + $0x424] ss:$8 sps:$4 sm:$0xff]  }
 0x137   :  { %968 = vmatpush1.bf16.msra.mxu1 %v2855_v0  ;;  %v2978_v0 = vld [vmem:[%s3711_s3 + $0x420] ss:$8 sps:$4 sm:$0xff]  }
 0x138   :  { %1273 = vmatprep.subr.bf16.mxu1 %v2864_v1  ;;  %1756 = vmatpush1.bf16.msra.mxu0 %v2922_v2  ;;  %v2983_v1 = vld [vmem:[%s3711_s3 + $0x414] ss:$8 sps:$4 sm:$0xff]   ;;  %v2981_v2 = vld [vmem:[%s3711_s3 + $0x410] ss:$8 sps:$4 sm:$0xff]  }
 0x139   :  { %1757 = vmatprep.subr.bf16.mxu0 %v2930_v3  ;;  %v2986_v3 = vld [vmem:[%s3711_s3 + $0x404] ss:$8 sps:$4 sm:$0xff]  }
 0x13a   :  { %986 = vmatmul.mubr.bf16.vlgmr.msra.gmra.mxu1 %v2861_v9  ;;  %v2989_v9 = vld [vmem:[%s3713_s5 + $0x38] sm:$0xff]  }
 0x13b   :  { %1274 = vmatpush1.bf16.msra.mxu1 %v2862_v4  ;;  %1305 = vmatprep.mubr.bf16.mxu1 %v3004_v50  ;;  %v2984_v4 = vld [vmem:[%s3711_s3 + $0x400] ss:$8 sps:$4 sm:$0xff]  }
 0x13c   :  { %1275 = vmatprep.subr.bf16.mxu1 %v2871_v5  ;;  %1758 = vmatpush1.bf16.msra.mxu0 %v2928_v8  ;;  %v2987_v5 = vld [vmem:[#allocation2 + $0x40] sm:$0xff]   ;;  %v2988_v8 = vld [vmem:[%s3713_s5 + $0x78] sm:$0xff]  }
 0x13d   :  { %1759 = vmatprep.subr.bf16.mxu0 %v2936_v12  ;;  %v2990_v12 = vld [vmem:[%s3713_s5 + $0x70] sm:$0xff]  }
 0x13f   :  { %1276 = vmatpush1.bf16.msra.mxu1 %v2869_v13  ;;  %v2991_v13 = vld [vmem:[%s3713_s5 + $0x30] sm:$0xff]  }
 0x140   :  { %1277 = vmatprep.subr.bf16.mxu1 %v2877_v14  ;;  %1760 = vmatpush1.bf16.msra.mxu0 %v2934_v15  ;;  %v2992_v14 = vld [vmem:[%s3713_s5 + $0x68] sm:$0xff]  }
 0x141   :  { %1761 = vmatprep.subr.bf16.mxu0 %v2942_v17  ;;  %v2993_v15 = vld [vmem:[%s3713_s5 + $0x28] sm:$0xff]   ;;  %v2994_v17 = vld [vmem:[%s3713_s5 + $0x60] sm:$0xff]  }
 0x143   :  { %1278 = vmatpush1.bf16.msra.mxu1 %v2875_v18  ;;  %v2995_v18 = vld [vmem:[%s3713_s5 + $0x20] sm:$0xff]  }
 0x144   :  { %1279 = vmatprep.subr.bf16.mxu1 %v2883_v19  ;;  %1762 = vmatpush1.bf16.msra.mxu0 %v2940_v20  ;;  %v2996_v19 = vld [vmem:[%s3713_s5 + $0x58] sm:$0xff]  }
 0x145   :  { %1763 = vmatprep.subr.bf16.mxu0 %v2948_v21  ;;  %v2997_v20 = vld [vmem:[%s3713_s5 + $0x18] sm:$0xff]   ;;  %v2998_v21 = vld [vmem:[%s3713_s5 + $0x50] sm:$0xff]  }
 0x147   :  { %1280 = vmatpush1.bf16.msra.mxu1 %v2881_v22  ;;  %v2999_v22 = vld [vmem:[%s3713_s5 + $0x10] sm:$0xff]  }
 0x148   :  { %1281 = vmatprep.subr.bf16.mxu1 %v2889_v23  ;;  %1764 = vmatpush1.bf16.msra.mxu0 %v2946_v24  ;;  %v3000_v23 = vld [vmem:[%s3713_s5 + $0x48] sm:$0xff]  }
 0x149   :  { %1765 = vmatprep.subr.bf16.mxu0 %v2954_v25  ;;  %v3001_v24 = vld [vmem:[%s3713_s5 + $0x8] sm:$0xff]   ;;  %v3002_v25 = vld [vmem:[%s3713_s5 + $0x40] sm:$0xff]  }
 0x14b   :  { %1282 = vmatpush1.bf16.msra.mxu1 %v2887_v26  ;;  %v3003_v26 = vld [vmem:[%s3713_s5] sm:$0xff]  }
 0x14c   :  { %1283 = vmatprep.subr.bf16.mxu1 %v2895_v27  ;;  %1766 = vmatpush1.bf16.msra.mxu0 %v2952_v28 }
 0x14d   :  { %1767 = vmatprep.subr.bf16.mxu0 %v2960_v29 }
 0x14f   :  { %1284 = vmatpush1.bf16.msra.mxu1 %v2893_v30 }
 0x150   :  { %1285 = vmatprep.subr.bf16.mxu1 %v2901_v31  ;;  %1768 = vmatpush1.bf16.msra.mxu0 %v2958_v32 }
 0x151   :  { %2697 = vmatprep.subr.bf16.mxu0 %v2988_v8 }
 0x153   :  { %1286 = vmatpush1.bf16.msra.mxu1 %v2899_v33  ;;  %1786 = vmatmul.mubr.bf16.vlgmr.msra.gmra.mxu0 %v2965_v34 }
 0x154   :  { %1287 = vmatprep.subr.bf16.mxu1 %v2907_v35  ;;  %2698 = vmatpush3.bf16.msra.mxu0 %v2989_v9 }
 0x155   :  { %2699 = vmatprep.subr.bf16.mxu0 %v2990_v12  ;;  %v1964_v12 = vld [vmem:[%s3714_s4] sm:$0xf] }
 0x157   :  { %1288 = vmatpush1.bf16.msra.mxu1 %v2905_v36 }
 0x158   :  { %1593 = vmatprep.subr.bf16.mxu1 %v2914_v37  ;;  %2700 = vmatpush3.bf16.msra.mxu0 %v2991_v13 }
 0x159   :  { %2701 = vmatprep.subr.bf16.mxu0 %v2992_v14 }
 0x15a   :  { %1306 = vmatmul.mubr.bf16.vlgmr.msra.gmra.mxu1 %v2911_v39 }
 0x15b   :  { %1594 = vmatpush1.bf16.msra.mxu1 %v2912_v38  ;;  %1625 = vmatprep.mubr.bf16.mxu1 %v3004_v50 }
 0x15c   :  { %1595 = vmatprep.subr.bf16.mxu1 %v2921_v40  ;;  %2702 = vmatpush3.bf16.msra.mxu0 %v2993_v15 }
 0x15d   :  { %2703 = vmatprep.subr.bf16.mxu0 %v2994_v17 }
 0x15f   :  { %1596 = vmatpush1.bf16.msra.mxu1 %v2919_v41 }
 0x160   :  { %1597 = vmatprep.subr.bf16.mxu1 %v2927_v42  ;;  %2704 = vmatpush3.bf16.msra.mxu0 %v2995_v18 }
 0x161   :  { %2705 = vmatprep.subr.bf16.mxu0 %v2996_v19  ;;  %v1973_v19 = vrot.slane %v1964_v12, %v3254_v7 }
 0x163   :  { %1598 = vmatpush1.bf16.msra.mxu1 %v2925_v43 }
 0x164   :  { %1599 = vmatprep.subr.bf16.mxu1 %v2933_v44  ;;  %2706 = vmatpush3.bf16.msra.mxu0 %v2997_v20 }
 0x165   :  { %2707 = vmatprep.subr.bf16.mxu0 %v2998_v21  ;;  %v2002_v21 = vsub.s32 3, %v3251_v6 }
 0x167   :  { %1600 = vmatpush1.bf16.msra.mxu1 %v2931_v45 }
 0x168   :  { %1601 = vmatprep.subr.bf16.mxu1 %v2939_v46  ;;  %2708 = vmatpush3.bf16.msra.mxu0 %v2999_v22 }
 0x169   :  { %2709 = vmatprep.subr.bf16.mxu0 %v3000_v23 }
 0x16b   :  { %1602 = vmatpush1.bf16.msra.mxu1 %v2937_v47 }
 0x16c   :  { %1603 = vmatprep.subr.bf16.mxu1 %v2945_v48  ;;  %2710 = vmatpush3.bf16.msra.mxu0 %v3001_v24 }
 0x16d   :  { %2711 = vmatprep.subr.bf16.mxu0 %v3002_v25 }
 0x16f   :  { %1604 = vmatpush1.bf16.msra.mxu1 %v2943_v49 }
 0x170   :  { %1605 = vmatprep.subr.bf16.mxu1 %v2951_v51  ;;  %2712 = vmatpush3.bf16.msra.mxu0 %v3003_v26 }
 0x173   :  { %1606 = vmatpush1.bf16.msra.mxu1 %v2949_v52 }
 0x174   :  { %1607 = vmatprep.subr.bf16.mxu1 %v2957_v53 }
 0x177   :  { %1608 = vmatpush1.bf16.msra.mxu1 %v2955_v54 }
 0x178   :  { %1913 = vmatprep.subr.bf16.mxu1 %v2964_v55 }
 0x17a   :  { %1626 = vmatmul.mubr.bf16.vlgmr.msra.gmra.mxu1 %v2961_v57 }
 0x17b   :  { %1914 = vmatpush1.bf16.msra.mxu1 %v2962_v56  ;;  %1945 = vmatprep.mubr.bf16.mxu1 %v3004_v50  ;;  %v2972_v50 = vld [vmem:[%s3711_s3 + $0x440] ss:$8 sps:$4 sm:$0xff]  }
 0x17c   :  { %1915 = vmatprep.subr.bf16.mxu1 %v2968_v10 }
 0x17f   :  { %1916 = vmatpush1.bf16.msra.mxu1 %v2966_v58 }
 0x180   :  { %1917 = vmatprep.subr.bf16.mxu1 %v2971_v59 }
 0x183   :  { %1918 = vmatpush1.bf16.msra.mxu1 %v2969_v60 }
 0x184   :  { %1919 = vmatprep.subr.bf16.mxu1 %v2974_v61 }
 0x187   :  { %1920 = vmatpush1.bf16.msra.mxu1 %v2972_v50 }
 0x188   :  { %1921 = vmatprep.subr.bf16.mxu1 %v2977_v62 }
 0x18b   :  { %1922 = vmatpush1.bf16.msra.mxu1 %v2975_v16 }
 0x18c   :  { %1923 = vmatprep.subr.bf16.mxu1 %v2980_v63 }
 0x18f   :  { %1924 = vmatpush1.bf16.msra.mxu1 %v2978_v0 }
 0x190   :  { %1925 = vmatprep.subr.bf16.mxu1 %v2983_v1 }
 0x193   :  { %1926 = vmatpush1.bf16.msra.mxu1 %v2981_v2 }
 0x194   :  { %1927 = vmatprep.subr.bf16.mxu1 %v2986_v3 }
 0x197   :  { %1928 = vmatpush1.bf16.msra.mxu1 %v2984_v4  ;;  %v1976_v4 = vsub.s32 2, %v3251_v6 }
 0x199   :  { %v1977_v20 = vrot.slane %v1964_v12, %v1976_v4 }
 0x19a   :  { %1946 = vmatmul.mubr.bf16.vlgmr.msra.gmra.mxu1 %v2987_v5 }
 0x1ba   :  { %v667_v27 = vpop.f32.mrf.mxu1 }
 0x1bc   :  { %v669_v28 = vpop.f32.mrf.mxu1 }
 0x1be   :  { %v671_v29 = vpop.f32.mrf.mxu1 }
 0x1c0   :  { %v673_v30 = vpop.f32.mrf.mxu1 }
 0x1d2   :  { %v1147_v37 = vpop.f32.mrf.mxu0 }
 0x1d4   :  { %v1149_v39 = vpop.f32.mrf.mxu0 }
 0x1d6   :  { %v1151_v41 = vpop.f32.mrf.mxu0 }
 0x1d8   :  { %v1153_v43 = vpop.f32.mrf.mxu0 }
 0x1da   :  { %v827_v31 = vpop.f32.mrf.mxu1 }
 0x1db   :  { %v836_v48 = vadd.f32 %v827_v31, %v667_v27  ;;  %v1987_v31 = vrot.slane %v1977_v20, %v3254_v7 }
 0x1dc   :  { %v829_v32 = vpop.f32.mrf.mxu1 }
 0x1dd   :  { %v837_v49 = vadd.f32 %v829_v32, %v669_v28  ;;  %v2003_v32 = vrot.slane %v1964_v12, %v2002_v21 }
 0x1de   :  { %v831_v33 = vpop.f32.mrf.mxu1 }
 0x1df   :  { %v838_v52 = vadd.f32 %v831_v33, %v671_v29  ;;  %v1983_v29 = vrot.slane %v1973_v19, %v3254_v7 }
 0x1e0   :  { %v833_v34 = vpop.f32.mrf.mxu1 }
 0x1e1   :  { %v839_v10 = vadd.f32 %v833_v34, %v673_v30 }
 0x1f3   :  { %v1467_v45 = vpop.f32.mrf.mxu0 }
 0x1f5   :  { %v1469_v47 = vpop.f32.mrf.mxu0 }
 0x1f7   :  { %v1471_v55 = vpop.f32.mrf.mxu0 }
 0x1f9   :  { %v1473_v60 = vpop.f32.mrf.mxu0 }
 0x1fa   :  { %v987_v35 = vpop.f32.mrf.mxu1 }
 0x1fb   :  { %v996_v53 = vadd.f32 %v987_v35, %v836_v48 }
 0x1fc   :  { %v989_v36 = vpop.f32.mrf.mxu1 }
 0x1fd   :  { %v997_v54 = vadd.f32 %v989_v36, %v837_v49  ;;  %v1156_v58 = vadd.f32 %v1147_v37, %v996_v53  ;;  %v1999_v36 = vrot.slane %v1964_v12, %v3263_v11 }
 0x1fe   :  { %v991_v38 = vpop.f32.mrf.mxu1 }
 0x1ff   :  { %v998_v57 = vadd.f32 %v991_v38, %v838_v52  ;;  %v1157_v59 = vadd.f32 %v1149_v39, %v997_v54 }
 0x200   :  { %v993_v40 = vpop.f32.mrf.mxu1 }
 0x201   :  { %v999_v61 = vadd.f32 %v993_v40, %v839_v10  ;;  %v1158_v62 = vadd.f32 %v1151_v41, %v998_v57  ;;  %v2013_v41 = vrot.slane %v2003_v32, %v3263_v11  ;;  %v2539_v10 = vld [vmem:[%s3715_s6] ss:$0 sm:$0xff] }
 0x203   :  { %v1159_v2 = vadd.f32 %v1153_v43, %v999_v61 }
 0x213   :  { %v1787_v0 = vpop.f32.mrf.mxu0 }
 0x215   :  { %v1789_v9 = vpop.f32.mrf.mxu0 }
 0x217   :  { %v1791_v23 = vpop.f32.mrf.mxu0 }
 0x219   :  { %v1793_v34 = vpop.f32.mrf.mxu0 }
 0x21a   :  { %v1307_v42 = vpop.f32.mrf.mxu1 }
 0x21b   :  { %v1316_v16 = vadd.f32 %v1307_v42, %v1156_v58 }
 0x21c   :  { %v1309_v44 = vpop.f32.mrf.mxu1 }
 0x21d   :  { %v1317_v63 = vadd.f32 %v1309_v44, %v1157_v59  ;;  %v1476_v5 = vadd.f32 %v1467_v45, %v1316_v16  ;;  %v2009_v44 = vrot.slane %v1999_v36, %v3263_v11 }
 0x21e   :  { %v1311_v46 = vpop.f32.mrf.mxu1 }
 0x21f   :  { %v1318_v1 = vadd.f32 %v1311_v46, %v1158_v62  ;;  %v1477_v8 = vadd.f32 %v1469_v47, %v1317_v63 }
 0x220   :  { %v1313_v51 = vpop.f32.mrf.mxu1 }
 0x221   :  { %v1319_v13 = vadd.f32 %v1313_v51, %v1159_v2  ;;  %v1478_v14 = vadd.f32 %v1471_v55, %v1318_v1 }
 0x223   :  { %v1479_v24 = vadd.f32 %v1473_v60, %v1319_v13 }
 0x23a   :  { %v1627_v56 = vpop.f32.mrf.mxu1 }
 0x23b   :  { %v1636_v15 = vadd.f32 %v1627_v56, %v1476_v5 }
 0x23c   :  { %v1629_v50 = vpop.f32.mrf.mxu1 }
 0x23d   :  { %v1637_v17 = vadd.f32 %v1629_v50, %v1477_v8  ;;  %v1796_v26 = vadd.f32 %v1787_v0, %v1636_v15 }
 0x23e   :  { %v1631_v3 = vpop.f32.mrf.mxu1 }
 0x23f   :  { %v1638_v22 = vadd.f32 %v1631_v3, %v1478_v14  ;;  %v1797_v27 = vadd.f32 %v1789_v9, %v1637_v17 }
 0x240   :  { %v1633_v18 = vpop.f32.mrf.mxu1 }
 0x241   :  { %v1639_v28 = vadd.f32 %v1633_v18, %v1479_v24  ;;  %v1798_v33 = vadd.f32 %v1791_v23, %v1638_v22 }
 0x243   :  { %v1799_v39 = vadd.f32 %v1793_v34, %v1639_v28 }
 0x25a   :  { %v1947_v25 = vpop.f32.mrf.mxu1 }
 0x25b   :  { %v1956_v35 = vadd.f32 %v1947_v25, %v1796_v26 }
 0x25c   :  { %v1949_v30 = vpop.f32.mrf.mxu1 }
 0x25d   :  { %v1957_v37 = vadd.f32 %v1949_v30, %v1797_v27  ;;  %v1988_v43 = vadd.f32 %v1983_v29, %v1956_v35 }
 0x25e   :  { %v1951_v6 = vpop.f32.mrf.mxu1 }
 0x25f   :  { %v1958_v38 = vadd.f32 %v1951_v6, %v1798_v33  ;;  %v1989_v40 = vadd.f32 %v1987_v31, %v1957_v37  ;;  %v2014_v49 = vmul.f32 %v2009_v44, %v1988_v43  ;;  %vm1992_vm4 = vcmp.gt.f32.partialorder %v1988_v43, 0.0 }
 0x260   :  { %v1953_v42 = vpop.f32.mrf.mxu1 }
 0x261   :  { %v1990_v45 = vadd.f32 %v1983_v29, %v1958_v38  ;;  %v1959_v46 = vadd.f32 %v1953_v42, %v1799_v39  ;;  %v2015_v47 = vmul.f32 %v2013_v41, %v1989_v40  ;;  %vm1993_vm3 = vcmp.gt.f32.partialorder %v1989_v40, 0.0 }
 0x262   :  { %v2018_v55 = vsel %vm1992_vm4, %v1988_v43, %v2014_v49 }
 0x263   :  { %v2016_v7 = vmul.f32 %v2009_v44, %v1990_v45  ;;  %vm1994_vm2 = vcmp.gt.f32.partialorder %v1990_v45, 0.0  ;;  %v1991_v48 = vadd.f32 %v1987_v31, %v1959_v46  ;;  %v2019_v53 = vsel %vm1993_vm3, %v1989_v40, %v2015_v47 }
 0x265   :  { %vm1995_vm5 = vcmp.gt.f32.partialorder %v1991_v48, 0.0  ;;  %v2017_v51 = vmul.f32 %v2013_v41, %v1991_v48  ;;  %v2020_v52 = vsel %vm1994_vm2, %v1990_v45, %v2016_v7 }
 0x266   :  { %v2022_v57 = vpack.c.bf16 %v2020_v52, %v2018_v55 }
 0x267   :  { %v2021_v54 = vsel %vm1995_vm5, %v1991_v48, %v2017_v51 }
 0x268   :  { %v2023_v56 = vpack.c.bf16 %v2021_v54, %v2019_v53 }
 0x26a   :  { %2191 = vmatprep.mubr.bf16.mxu0 %v2023_v56 }
 0x26b   :  { %2192 = vmatmul.mubr.bf16.vlgmr.msra.gmra.mxu0 %v2022_v57 }
 0x32b   :  { %v2713_v11 = vpop.f32.mrf.mxu0 }
 0x32d   :  { %v2714_v58 = vpop.f32.mrf.mxu0 }
 0x32e   :  { %v2715_v59 = vadd.f32 %v2714_v58, %v2713_v11 }
 0x32f   :  { %v2716_v60 = vpop.f32.mrf.mxu0 }
 0x330   :  { %v2194_v61 = vadd.f32 %v2715_v59, %v2539_v10 }
 0x331   :  { %v2717_v50 = vpop.f32.mrf.mxu0 }
 0x332   :  { %2200 = vst [vmem:[%s3716_s7] sm:$0xff] %v2194_v61  ;;  %v2718_v62 = vadd.f32 %v2717_v50, %v2716_v60 }
 0x334   :  { %v2197_v16 = vadd.f32 %v2718_v62, %v2539_v10 }
 0x336   :  { %2201 = vst [vmem:[%s3716_s7 + $0x8] sm:$0xff] %v2197_v16 }

</bundles_post_ra>
